<compile_context>
chip_gen: v7x
topology: tpu7x:2x2x1
jax: 0.10.0
libtpu: 0.0.40
codegen_flags: <defaults>
</compile_context>

<pallas_src>
import functools

import jax
import jax.numpy as jnp
from jax import lax
from jax.experimental import pallas as pl
from jax.experimental.pallas import tpu as pltpu


def _basic_block_kernel(x_ref, w1_ref, b1_ref, w2_ref, b2_ref,
                        out_ref, y1p_ref):
    """One (batch, row-block) tile of the fused BasicBlock forward.

    x_ref   : (TH+4, W+2, Cp) f32   input window (2-row + 1-col zero halo)
    w1_ref  : (9, Cp, Cp)     bf16  conv1 taps (ky*3+kx), BN1 scale folded in
    b1_ref  : (1, Cp)         f32   folded BN1 bias
    w2_ref  : (9, Cp, Cp)     bf16  conv2 taps, BN2 scale folded in
    b2_ref  : (1, Cp)         f32   folded BN2 bias
    out_ref : (TH, W, Cp)     f32   output rows of this block
    y1p_ref : (TH+2, W+2, Cp) bf16  VMEM scratch: 1-px-padded intermediate
    """
    THp4, Wp, Cp = x_ref.shape
    TH, W = THp4 - 4, Wp - 2
    RB1 = TH + 2                      # conv1 rows (incl. 1-row halo each side)
    r = pl.program_id(1)
    n_r = pl.num_programs(1)

    # ---- conv1 (+ folded BN1 scale): bf16 operands, f32 accumulation -------
    x_bf = x_ref[...].astype(jnp.bfloat16)        # cast once, reused 9 times
    acc1 = jnp.zeros((RB1 * W, Cp), jnp.float32)
    for ky in range(3):
        for kx in range(3):
            patch = x_bf[ky:ky + RB1, kx:kx + W, :].reshape(RB1 * W, Cp)
            acc1 += jnp.dot(patch, w1_ref[ky * 3 + kx],
                            preferred_element_type=jnp.float32)

    # ---- BN1 bias + ReLU; write only the interior of the padded scratch ----
    y1 = jnp.maximum(acc1 + b1_ref[...], 0.0)
    y1p_ref[:, 1:1 + W, :] = y1.reshape(RB1, W, Cp).astype(jnp.bfloat16)

    # zero only the 1-pixel halo border (never the whole scratch)
    zcol = jnp.zeros((RB1, 1, Cp), jnp.bfloat16)
    y1p_ref[:, 0:1, :] = zcol
    y1p_ref[:, W + 1:W + 2, :] = zcol

    @pl.when(r == 0)                               # top image border row
    def _():
        y1p_ref[0:1, :, :] = jnp.zeros((1, Wp, Cp), jnp.bfloat16)

    @pl.when(r == n_r - 1)                         # bottom image border row
    def _():
        y1p_ref[TH + 1:TH + 2, :, :] = jnp.zeros((1, Wp, Cp), jnp.bfloat16)

    # ---- conv2 (+ folded BN2 scale) -----------------------------------------
    acc2 = jnp.zeros((TH * W, Cp), jnp.float32)
    for ky in range(3):
        for kx in range(3):
            patch = y1p_ref[ky:ky + TH, kx:kx + W, :].reshape(TH * W, Cp)
            acc2 += jnp.dot(patch, w2_ref[ky * 3 + kx],
                            preferred_element_type=jnp.float32)

    # ---- BN2 bias + residual (f32, from the resident input tile) + ReLU ----
    resid = x_ref[2:2 + TH, 1:1 + W, :].reshape(TH * W, Cp)
    out = jnp.maximum(acc2 + b2_ref[...] + resid, 0.0)
    out_ref[...] = out.reshape(TH, W, Cp).astype(out_ref.dtype)


def _fold_bn(gamma, beta, running_mean, running_var, eps=1e-5):
    scale = gamma / jnp.sqrt(running_var + eps)
    bias = beta - running_mean * scale
    return scale, bias


def _prep_conv_weights(w_oihw, scale, cin, cout, cp):
    """(Cout, Cin, 3, 3) -> (9, Cp, Cp) tap-major, BN scale folded, bf16."""
    wk = jnp.transpose(w_oihw, (2, 3, 1, 0)).reshape(9, cin, cout)
    wk = wk * scale[None, None, :]
    wk = jnp.pad(wk, ((0, 0), (0, cp - cin), (0, cp - cout)))
    return wk.astype(jnp.bfloat16)


def _pick_row_tile(H, W, Cp, budget_bytes):
    """Largest divisor of H whose (double-buffered) tiles fit the VMEM budget."""
    weights_b = 2 * 2 * (9 * Cp * Cp * 2)            # 2 convs, 2 bufs, bf16
    best = 1
    for th in sorted((d for d in range(1, H + 1) if H % d == 0), reverse=True):
        in_b = 2 * (th + 4) * (W + 2) * Cp * 4       # f32 window, double-buffered
        out_b = 2 * th * W * Cp * 4                  # f32 output, double-buffered
        scr_b = (th + 2) * (W + 2) * Cp * 2          # bf16 scratch, single buffer
        if weights_b + in_b + out_b + scr_b <= budget_bytes:
            return th
        best = th                                    # ends at the smallest divisor
    return best


@functools.partial(jax.jit, static_argnames=("row_tile",))
def basic_block_forward(x_nchw, w1, bn1_params, w2, bn2_params, *, row_tile=None):
    """x_nchw: (N, Cin, H, W) f32; w*: (Cout, Cin, 3, 3) PyTorch layout."""
    x_nchw = x_nchw.astype(jnp.float32)
    N, Cin, H, W = x_nchw.shape
    Cout = w1.shape[0]
    if Cin != Cout:
        raise ValueError("BasicBlock with downsample=None requires Cin == Cout")

    Cp = ((max(Cin, Cout) + 127) // 128) * 128       # lane-dense channel pad

    if row_tile is not None and H % row_tile == 0:
        TH = row_tile
    else:
        # 24 MiB tile budget keeps well under the 32 MiB scoped VMEM limit on
        # every TPU generation (v7x physical VMEM is 64 MiB).
        TH = _pick_row_tile(H, W, Cp, budget_bytes=24 * 1024 * 1024)
    R = H // TH

    s1, b1 = _fold_bn(*bn1_params)
    s2, b2 = _fold_bn(*bn2_params)
    w1_k = _prep_conv_weights(w1, s1, Cin, Cout, Cp)
    w2_k = _prep_conv_weights(w2, s2, Cout, Cout, Cp)
    b1_p = jnp.pad(b1, (0, Cp - Cout)).reshape(1, Cp).astype(jnp.float32)
    b2_p = jnp.pad(b2, (0, Cp - Cout)).reshape(1, Cp).astype(jnp.float32)

    # NCHW -> NHWC, then a single pad: channels to Cp, 2-row / 1-col zero halo.
    x_nhwc = jnp.transpose(x_nchw, (0, 2, 3, 1))
    x_sp = jnp.pad(x_nhwc, ((0, 0), (2, 2), (1, 1), (0, Cp - Cin)))

    if R == 1:
        # Whole image per grid step: no overlapping-window gather, zero HBM
        # duplication (this is the path taken for all standard ResNet shapes).
        x_win = x_sp[:, None]                        # (N, 1, H+4, W+2, Cp)
    else:
        # Fallback: gather overlapping row windows; block r covers padded rows
        # [r*TH, r*TH + TH + 4) so each grid step stays fully independent.
        x_win = jnp.stack([x_sp[:, r * TH:r * TH + TH + 4] for r in range(R)],
                          axis=1)                    # (N, R, TH+4, W+2, Cp)

    out = pl.pallas_call(
        _basic_block_kernel,
        out_shape=jax.ShapeDtypeStruct((N, R, TH, W, Cp), jnp.float32),
        grid=(N, R),
        in_specs=[
            pl.BlockSpec((None, None, TH + 4, W + 2, Cp),
                         lambda n, r: (n, r, 0, 0, 0)),
            pl.BlockSpec((9, Cp, Cp), lambda n, r: (0, 0, 0)),   # stays resident
            pl.BlockSpec((1, Cp), lambda n, r: (0, 0)),
            pl.BlockSpec((9, Cp, Cp), lambda n, r: (0, 0, 0)),
            pl.BlockSpec((1, Cp), lambda n, r: (0, 0)),
        ],
        out_specs=pl.BlockSpec((None, None, TH, W, Cp),
                               lambda n, r: (n, r, 0, 0, 0)),
        scratch_shapes=[pltpu.VMEM((TH + 2, W + 2, Cp), jnp.bfloat16)],
        compiler_params=pltpu.CompilerParams(
            # independent blocks -> both axes shardable across v7x's 2 TCs
            dimension_semantics=("parallel", "parallel"),
            # safe on all gens (v7x physical VMEM is 64 MiB); tile selection
            # above keeps double-buffered usage <= 24 MiB.
            vmem_limit_bytes=32 * 1024 * 1024,
        ),
    )(x_win, w1_k, b1_p, w2_k, b2_p)

    out = out.reshape(N, H, W, Cp)[:, :, :, :Cout]
    return jnp.transpose(out, (0, 3, 1, 2))          # back to NCHW


def _reference_forward(x_nchw, w1, bn1_params, w2, bn2_params, round_dtype=None):
    """Pure-JAX reference.  round_dtype=None  -> exact f32 module semantics.
    round_dtype=bfloat16 -> mirrors the kernel's intentional bf16 rounding of
    the conv operands (with BN scale folded into the weights)."""
    def rnd(a):
        return a if round_dtype is None else a.astype(round_dtype).astype(jnp.float32)

    s1, b1 = _fold_bn(*bn1_params)
    s2, b2 = _fold_bn(*bn2_params)
    w1f = w1 * s1[:, None, None, None]
    w2f = w2 * s2[:, None, None, None]
    dn = lax.conv_dimension_numbers(x_nchw.shape, w1.shape,
                                    ("NCHW", "OIHW", "NCHW"))
    y = lax.conv_general_dilated(rnd(x_nchw), rnd(w1f), (1, 1), ((1, 1), (1, 1)),
                                 dimension_numbers=dn,
                                 precision=lax.Precision.HIGHEST)
    y = jnp.maximum(y + b1[None, :, None, None], 0.0)
    y = lax.conv_general_dilated(rnd(y), rnd(w2f), (1, 1), ((1, 1), (1, 1)),
                                 dimension_numbers=dn,
                                 precision=lax.Precision.HIGHEST)
    return jnp.maximum(y + b2[None, :, None, None] + x_nchw, 0.0)


if __name__ == "__main__":
    # Small deterministic config: inplanes = planes = 4, stride = 1,
    # downsample = None  ->  residual is the raw input.
    N, C, H, W = 2, 4, 16, 16
    key = jax.random.PRNGKey(0)
    (kx, kw1, kw2, kg1, kb1, km1, kv1, kg2, kb2, km2, kv2) = jax.random.split(key, 11)

    x = jax.random.normal(kx, (N, C, H, W), jnp.float32)
    fan_in = C * 9
    w1 = jax.random.normal(kw1, (C, C, 3, 3), jnp.float32) * (2.0 / fan_in) ** 0.5
    w2 = jax.random.normal(kw2, (C, C, 3, 3), jnp.float32) * (2.0 / fan_in) ** 0.5

    # BatchNorm params (inference mode): gamma, beta, running_mean, running_var.
    bn1 = (1.0 + 0.1 * jax.random.normal(kg1, (C,), jnp.float32),
           0.05 * jax.random.normal(kb1, (C,), jnp.float32),
           0.1 * jax.random.normal(km1, (C,), jnp.float32),
           1.0 + jax.nn.softplus(jax.random.normal(kv1, (C,), jnp.float32)))
    bn2 = (1.0 + 0.1 * jax.random.normal(kg2, (C,), jnp.float32),
           0.05 * jax.random.normal(kb2, (C,), jnp.float32),
           0.1 * jax.random.normal(km2, (C,), jnp.float32),
           1.0 + jax.nn.softplus(jax.random.normal(kv2, (C,), jnp.float32)))

    out = jax.block_until_ready(basic_block_forward(x, w1, bn1, w2, bn2))
    assert out.shape == (N, C, H, W)

    # Also exercise the multi-row-block (R > 1) fallback path.
    out_tiled = jax.block_until_ready(
        basic_block_forward(x, w1, bn1, w2, bn2, row_tile=8))
    assert jnp.allclose(out, out_tiled, atol=1e-5, rtol=1e-5), \
        "whole-image vs row-tiled paths disagree"

    # Tight check: mirror of the kernel math (bf16-rounded conv operands,
    # f32 accumulation / bias / residual / ReLU).
    ref_mirror = jax.block_until_ready(
        _reference_forward(x, w1, bn1, w2, bn2, round_dtype=jnp.bfloat16))
    assert jnp.allclose(out, ref_mirror, atol=1e-4, rtol=1e-4), \
        "mismatch vs bf16-mirrored reference"

    # Loose check against exact f32 module semantics (bounds the intentional
    # bf16 rounding error; catches any structural mistake, which would be O(1)).
    ref_f32 = jax.block_until_ready(
        _reference_forward(x, w1, bn1, w2, bn2, round_dtype=None))
    assert jnp.allclose(out, ref_f32, atol=0.25, rtol=0.0), \
        "mismatch vs f32 module reference"

    print("KERNEL_OK")
</pallas_src>

<mosaic_0001>
module attributes {stable_mosaic.version = 11 : i64} {
  func.func @_basic_block_kernel(%arg0: i32, %arg1: i32, %arg2: memref<1x1x20x18x128xf32, #tpu.memory_space<vmem>>, %arg3: memref<9x128x128xbf16, #tpu.memory_space<vmem>>, %arg4: memref<1x128xf32, #tpu.memory_space<vmem>>, %arg5: memref<9x128x128xbf16, #tpu.memory_space<vmem>>, %arg6: memref<1x128xf32, #tpu.memory_space<vmem>>, %arg7: memref<1x1x16x16x128xf32, #tpu.memory_space<vmem>>, %arg8: memref<18x18x128xbf16, #tpu.memory_space<vmem>>) attributes {dimension_semantics = [#tpu.dimension_semantics<parallel>, #tpu.dimension_semantics<parallel>], iteration_bounds = array<i64: 2, 1>, scalar_prefetch = 0 : i64, scratch_operands = 1 : i64, tpu.core_type = #tpu.core_type<tc>, window_params = [{transform_indices = @transform_0, window_bounds = array<i64: 1, 1, 20, 18, 128>}, {pipeline_mode = #tpu.pipeline_mode<synchronous>, transform_indices = @transform_1, window_bounds = array<i64: 9, 128, 128>}, {pipeline_mode = #tpu.pipeline_mode<synchronous>, transform_indices = @transform_2, window_bounds = array<i64: 1, 128>}, {pipeline_mode = #tpu.pipeline_mode<synchronous>, transform_indices = @transform_3, window_bounds = array<i64: 9, 128, 128>}, {pipeline_mode = #tpu.pipeline_mode<synchronous>, transform_indices = @transform_4, window_bounds = array<i64: 1, 128>}, {transform_indices = @transform_5, window_bounds = array<i64: 1, 1, 16, 16, 128>}]} {
    %c0 = arith.constant 0 : index
    %c0_0 = arith.constant 0 : index
    %c0_1 = arith.constant 0 : index
    %c0_2 = arith.constant 0 : index
    %c0_3 = arith.constant 0 : index
    %0 = vector.load %arg2[%c0, %c0_0, %c0_1, %c0_2, %c0_3] : memref<1x1x20x18x128xf32, #tpu.memory_space<vmem>>, vector<1x1x20x18x128xf32>
    %1 = vector.shape_cast %0 : vector<1x1x20x18x128xf32> to vector<20x18x128xf32>
    %2 = arith.truncf %1 : vector<20x18x128xf32> to vector<20x18x128xbf16>
    %cst = arith.constant 0.000000e+00 : f32
    %3 = vector.broadcast %cst : f32 to vector<288x128xf32>
    %4 = vector.extract_strided_slice %2 {offsets = [0, 0, 0], sizes = [18, 16, 128], strides = [1, 1, 1]} : vector<20x18x128xbf16> to vector<18x16x128xbf16>
    %5 = vector.shape_cast %4 : vector<18x16x128xbf16> to vector<288x128xbf16>
    %c0_4 = arith.constant 0 : index
    %c0_5 = arith.constant 0 : index
    %c0_6 = arith.constant 0 : index
    %6 = vector.load %arg3[%c0_4, %c0_5, %c0_6] : memref<9x128x128xbf16, #tpu.memory_space<vmem>>, vector<1x128x128xbf16>
    %7 = vector.shape_cast %6 : vector<1x128x128xbf16> to vector<128x128xbf16>
    %cst_7 = arith.constant dense<0.000000e+00> : vector<288x128xf32>
    %8 = tpu.matmul %5, %7, %cst_7 {dimension_numbers = #tpu.dot_dimension_numbers<[1], [0], [0], [1], [0, 0, 1, 1], [], []>} : vector<288x128xbf16>, vector<128x128xbf16>, vector<288x128xf32> -> vector<288x128xf32>
    %9 = arith.addf %3, %8 : vector<288x128xf32>
    %10 = vector.extract_strided_slice %2 {offsets = [0, 1, 0], sizes = [18, 16, 128], strides = [1, 1, 1]} : vector<20x18x128xbf16> to vector<18x16x128xbf16>
    %11 = vector.shape_cast %10 : vector<18x16x128xbf16> to vector<288x128xbf16>
    %c1 = arith.constant 1 : index
    %c0_8 = arith.constant 0 : index
    %c0_9 = arith.constant 0 : index
    %12 = vector.load %arg3[%c1, %c0_8, %c0_9] : memref<9x128x128xbf16, #tpu.memory_space<vmem>>, vector<1x128x128xbf16>
    %13 = vector.shape_cast %12 : vector<1x128x128xbf16> to vector<128x128xbf16>
    %cst_10 = arith.constant dense<0.000000e+00> : vector<288x128xf32>
    %14 = tpu.matmul %11, %13, %cst_10 {dimension_numbers = #tpu.dot_dimension_numbers<[1], [0], [0], [1], [0, 0, 1, 1], [], []>} : vector<288x128xbf16>, vector<128x128xbf16>, vector<288x128xf32> -> vector<288x128xf32>
    %15 = arith.addf %9, %14 : vector<288x128xf32>
    %16 = vector.extract_strided_slice %2 {offsets = [0, 2, 0], sizes = [18, 16, 128], strides = [1, 1, 1]} : vector<20x18x128xbf16> to vector<18x16x128xbf16>
    %17 = vector.shape_cast %16 : vector<18x16x128xbf16> to vector<288x128xbf16>
    %c2 = arith.constant 2 : index
    %c0_11 = arith.constant 0 : index
    %c0_12 = arith.constant 0 : index
    %18 = vector.load %arg3[%c2, %c0_11, %c0_12] : memref<9x128x128xbf16, #tpu.memory_space<vmem>>, vector<1x128x128xbf16>
    %19 = vector.shape_cast %18 : vector<1x128x128xbf16> to vector<128x128xbf16>
    %cst_13 = arith.constant dense<0.000000e+00> : vector<288x128xf32>
    %20 = tpu.matmul %17, %19, %cst_13 {dimension_numbers = #tpu.dot_dimension_numbers<[1], [0], [0], [1], [0, 0, 1, 1], [], []>} : vector<288x128xbf16>, vector<128x128xbf16>, vector<288x128xf32> -> vector<288x128xf32>
    %21 = arith.addf %15, %20 : vector<288x128xf32>
    %22 = vector.extract_strided_slice %2 {offsets = [1, 0, 0], sizes = [18, 16, 128], strides = [1, 1, 1]} : vector<20x18x128xbf16> to vector<18x16x128xbf16>
    %23 = vector.shape_cast %22 : vector<18x16x128xbf16> to vector<288x128xbf16>
    %c3 = arith.constant 3 : index
    %c0_14 = arith.constant 0 : index
    %c0_15 = arith.constant 0 : index
    %24 = vector.load %arg3[%c3, %c0_14, %c0_15] : memref<9x128x128xbf16, #tpu.memory_space<vmem>>, vector<1x128x128xbf16>
    %25 = vector.shape_cast %24 : vector<1x128x128xbf16> to vector<128x128xbf16>
    %cst_16 = arith.constant dense<0.000000e+00> : vector<288x128xf32>
    %26 = tpu.matmul %23, %25, %cst_16 {dimension_numbers = #tpu.dot_dimension_numbers<[1], [0], [0], [1], [0, 0, 1, 1], [], []>} : vector<288x128xbf16>, vector<128x128xbf16>, vector<288x128xf32> -> vector<288x128xf32>
    %27 = arith.addf %21, %26 : vector<288x128xf32>
    %28 = vector.extract_strided_slice %2 {offsets = [1, 1, 0], sizes = [18, 16, 128], strides = [1, 1, 1]} : vector<20x18x128xbf16> to vector<18x16x128xbf16>
    %29 = vector.shape_cast %28 : vector<18x16x128xbf16> to vector<288x128xbf16>
    %c4 = arith.constant 4 : index
    %c0_17 = arith.constant 0 : index
    %c0_18 = arith.constant 0 : index
    %30 = vector.load %arg3[%c4, %c0_17, %c0_18] : memref<9x128x128xbf16, #tpu.memory_space<vmem>>, vector<1x128x128xbf16>
    %31 = vector.shape_cast %30 : vector<1x128x128xbf16> to vector<128x128xbf16>
    %cst_19 = arith.constant dense<0.000000e+00> : vector<288x128xf32>
    %32 = tpu.matmul %29, %31, %cst_19 {dimension_numbers = #tpu.dot_dimension_numbers<[1], [0], [0], [1], [0, 0, 1, 1], [], []>} : vector<288x128xbf16>, vector<128x128xbf16>, vector<288x128xf32> -> vector<288x128xf32>
    %33 = arith.addf %27, %32 : vector<288x128xf32>
    %34 = vector.extract_strided_slice %2 {offsets = [1, 2, 0], sizes = [18, 16, 128], strides = [1, 1, 1]} : vector<20x18x128xbf16> to vector<18x16x128xbf16>
    %35 = vector.shape_cast %34 : vector<18x16x128xbf16> to vector<288x128xbf16>
    %c5 = arith.constant 5 : index
    %c0_20 = arith.constant 0 : index
    %c0_21 = arith.constant 0 : index
    %36 = vector.load %arg3[%c5, %c0_20, %c0_21] : memref<9x128x128xbf16, #tpu.memory_space<vmem>>, vector<1x128x128xbf16>
    %37 = vector.shape_cast %36 : vector<1x128x128xbf16> to vector<128x128xbf16>
    %cst_22 = arith.constant dense<0.000000e+00> : vector<288x128xf32>
    %38 = tpu.matmul %35, %37, %cst_22 {dimension_numbers = #tpu.dot_dimension_numbers<[1], [0], [0], [1], [0, 0, 1, 1], [], []>} : vector<288x128xbf16>, vector<128x128xbf16>, vector<288x128xf32> -> vector<288x128xf32>
    %39 = arith.addf %33, %38 : vector<288x128xf32>
    %40 = vector.extract_strided_slice %2 {offsets = [2, 0, 0], sizes = [18, 16, 128], strides = [1, 1, 1]} : vector<20x18x128xbf16> to vector<18x16x128xbf16>
    %41 = vector.shape_cast %40 : vector<18x16x128xbf16> to vector<288x128xbf16>
    %c6 = arith.constant 6 : index
    %c0_23 = arith.constant 0 : index
    %c0_24 = arith.constant 0 : index
    %42 = vector.load %arg3[%c6, %c0_23, %c0_24] : memref<9x128x128xbf16, #tpu.memory_space<vmem>>, vector<1x128x128xbf16>
    %43 = vector.shape_cast %42 : vector<1x128x128xbf16> to vector<128x128xbf16>
    %cst_25 = arith.constant dense<0.000000e+00> : vector<288x128xf32>
    %44 = tpu.matmul %41, %43, %cst_25 {dimension_numbers = #tpu.dot_dimension_numbers<[1], [0], [0], [1], [0, 0, 1, 1], [], []>} : vector<288x128xbf16>, vector<128x128xbf16>, vector<288x128xf32> -> vector<288x128xf32>
    %45 = arith.addf %39, %44 : vector<288x128xf32>
    %46 = vector.extract_strided_slice %2 {offsets = [2, 1, 0], sizes = [18, 16, 128], strides = [1, 1, 1]} : vector<20x18x128xbf16> to vector<18x16x128xbf16>
    %47 = vector.shape_cast %46 : vector<18x16x128xbf16> to vector<288x128xbf16>
    %c7 = arith.constant 7 : index
    %c0_26 = arith.constant 0 : index
    %c0_27 = arith.constant 0 : index
    %48 = vector.load %arg3[%c7, %c0_26, %c0_27] : memref<9x128x128xbf16, #tpu.memory_space<vmem>>, vector<1x128x128xbf16>
    %49 = vector.shape_cast %48 : vector<1x128x128xbf16> to vector<128x128xbf16>
    %cst_28 = arith.constant dense<0.000000e+00> : vector<288x128xf32>
    %50 = tpu.matmul %47, %49, %cst_28 {dimension_numbers = #tpu.dot_dimension_numbers<[1], [0], [0], [1], [0, 0, 1, 1], [], []>} : vector<288x128xbf16>, vector<128x128xbf16>, vector<288x128xf32> -> vector<288x128xf32>
    %51 = arith.addf %45, %50 : vector<288x128xf32>
    %52 = vector.extract_strided_slice %2 {offsets = [2, 2, 0], sizes = [18, 16, 128], strides = [1, 1, 1]} : vector<20x18x128xbf16> to vector<18x16x128xbf16>
    %53 = vector.shape_cast %52 : vector<18x16x128xbf16> to vector<288x128xbf16>
    %c8 = arith.constant 8 : index
    %c0_29 = arith.constant 0 : index
    %c0_30 = arith.constant 0 : index
    %54 = vector.load %arg3[%c8, %c0_29, %c0_30] : memref<9x128x128xbf16, #tpu.memory_space<vmem>>, vector<1x128x128xbf16>
    %55 = vector.shape_cast %54 : vector<1x128x128xbf16> to vector<128x128xbf16>
    %cst_31 = arith.constant dense<0.000000e+00> : vector<288x128xf32>
    %56 = tpu.matmul %53, %55, %cst_31 {dimension_numbers = #tpu.dot_dimension_numbers<[1], [0], [0], [1], [0, 0, 1, 1], [], []>} : vector<288x128xbf16>, vector<128x128xbf16>, vector<288x128xf32> -> vector<288x128xf32>
    %57 = arith.addf %51, %56 : vector<288x128xf32>
    %c0_32 = arith.constant 0 : index
    %c0_33 = arith.constant 0 : index
    %58 = vector.load %arg4[%c0_32, %c0_33] : memref<1x128xf32, #tpu.memory_space<vmem>>, vector<1x128xf32>
    %59 = vector.broadcast %58 : vector<1x128xf32> to vector<288x128xf32>
    %60 = arith.addf %57, %59 : vector<288x128xf32>
    %cst_34 = arith.constant 0.000000e+00 : f32
    %61 = vector.broadcast %cst_34 : f32 to vector<288x128xf32>
    %62 = arith.maximumf %60, %61 : vector<288x128xf32>
    %63 = vector.shape_cast %62 : vector<288x128xf32> to vector<18x16x128xf32>
    %64 = arith.truncf %63 : vector<18x16x128xf32> to vector<18x16x128xbf16>
    %c0_35 = arith.constant 0 : index
    %c1_36 = arith.constant 1 : index
    %c0_37 = arith.constant 0 : index
    %65 = vector.load %arg8[%c0_35, %c1_36, %c0_37] : memref<18x18x128xbf16, #tpu.memory_space<vmem>>, vector<18x16x128xbf16>
    tpu.vector_store %arg8[%c0_35, %c1_36, %c0_37], %64 {strides = array<i32>} : memref<18x18x128xbf16, #tpu.memory_space<vmem>>, vector<18x16x128xbf16>,
    %cst_38 = arith.constant 0.000000e+00 : bf16
    %66 = vector.broadcast %cst_38 : bf16 to vector<18x1x128xbf16>
    %c0_39 = arith.constant 0 : index
    %c0_40 = arith.constant 0 : index
    %c0_41 = arith.constant 0 : index
    %67 = vector.load %arg8[%c0_39, %c0_40, %c0_41] : memref<18x18x128xbf16, #tpu.memory_space<vmem>>, vector<18x1x128xbf16>
    tpu.vector_store %arg8[%c0_39, %c0_40, %c0_41], %66 {strides = array<i32>} : memref<18x18x128xbf16, #tpu.memory_space<vmem>>, vector<18x1x128xbf16>,
    %c0_42 = arith.constant 0 : index
    %c17 = arith.constant 17 : index
    %c0_43 = arith.constant 0 : index
    %68 = vector.load %arg8[%c0_42, %c17, %c0_43] : memref<18x18x128xbf16, #tpu.memory_space<vmem>>, vector<18x1x128xbf16>
    tpu.vector_store %arg8[%c0_42, %c17, %c0_43], %66 {strides = array<i32>} : memref<18x18x128xbf16, #tpu.memory_space<vmem>>, vector<18x1x128xbf16>,
    %c0_i32 = arith.constant 0 : i32
    %69 = arith.cmpi eq, %arg1, %c0_i32 : i32
    %70 = arith.extui %69 : i1 to i32
    %c0_i32_44 = arith.constant 0 : i32
    %71 = arith.cmpi ne, %70, %c0_i32_44 : i32
    scf.if %71 {
      %cst_124 = arith.constant 0.000000e+00 : bf16
      %143 = vector.broadcast %cst_124 : bf16 to vector<1x18x128xbf16>
      %c0_125 = arith.constant 0 : index
      %c0_126 = arith.constant 0 : index
      %c0_127 = arith.constant 0 : index
      %144 = vector.load %arg8[%c0_125, %c0_126, %c0_127] : memref<18x18x128xbf16, #tpu.memory_space<vmem>>, vector<1x18x128xbf16>
      tpu.vector_store %arg8[%c0_125, %c0_126, %c0_127], %143 {strides = array<i32>} : memref<18x18x128xbf16, #tpu.memory_space<vmem>>, vector<1x18x128xbf16>,
    } else {
    }
    %c0_i32_45 = arith.constant 0 : i32
    %72 = arith.cmpi eq, %arg1, %c0_i32_45 : i32
    %73 = arith.extui %72 : i1 to i32
    %c0_i32_46 = arith.constant 0 : i32
    %74 = arith.cmpi ne, %73, %c0_i32_46 : i32
    scf.if %74 {
      %cst_124 = arith.constant 0.000000e+00 : bf16
      %143 = vector.broadcast %cst_124 : bf16 to vector<1x18x128xbf16>
      %c17_125 = arith.constant 17 : index
      %c0_126 = arith.constant 0 : index
      %c0_127 = arith.constant 0 : index
      %144 = vector.load %arg8[%c17_125, %c0_126, %c0_127] : memref<18x18x128xbf16, #tpu.memory_space<vmem>>, vector<1x18x128xbf16>
      tpu.vector_store %arg8[%c17_125, %c0_126, %c0_127], %143 {strides = array<i32>} : memref<18x18x128xbf16, #tpu.memory_space<vmem>>, vector<1x18x128xbf16>,
    } else {
    }
    %cst_47 = arith.constant 0.000000e+00 : f32
    %75 = vector.broadcast %cst_47 : f32 to vector<256x128xf32>
    %c0_48 = arith.constant 0 : index
    %c0_49 = arith.constant 0 : index
    %c0_50 = arith.constant 0 : index
    %76 = vector.load %arg8[%c0_48, %c0_49, %c0_50] : memref<18x18x128xbf16, #tpu.memory_space<vmem>>, vector<16x16x128xbf16>
    %77 = vector.shape_cast %76 : vector<16x16x128xbf16> to vector<256x128xbf16>
    %c0_51 = arith.constant 0 : index
    %c0_52 = arith.constant 0 : index
    %c0_53 = arith.constant 0 : index
    %78 = vector.load %arg5[%c0_51, %c0_52, %c0_53] : memref<9x128x128xbf16, #tpu.memory_space<vmem>>, vector<1x128x128xbf16>
    %79 = vector.shape_cast %78 : vector<1x128x128xbf16> to vector<128x128xbf16>
    %cst_54 = arith.constant dense<0.000000e+00> : vector<256x128xf32>
    %80 = tpu.matmul %77, %79, %cst_54 {dimension_numbers = #tpu.dot_dimension_numbers<[1], [0], [0], [1], [0, 0, 1, 1], [], []>} : vector<256x128xbf16>, vector<128x128xbf16>, vector<256x128xf32> -> vector<256x128xf32>
    %81 = arith.addf %75, %80 : vector<256x128xf32>
    %c0_55 = arith.constant 0 : index
    %c1_56 = arith.constant 1 : index
    %c0_57 = arith.constant 0 : index
    %82 = vector.load %arg8[%c0_55, %c1_56, %c0_57] : memref<18x18x128xbf16, #tpu.memory_space<vmem>>, vector<16x16x128xbf16>
    %83 = vector.shape_cast %82 : vector<16x16x128xbf16> to vector<256x128xbf16>
    %c1_58 = arith.constant 1 : index
    %c0_59 = arith.constant 0 : index
    %c0_60 = arith.constant 0 : index
    %84 = vector.load %arg5[%c1_58, %c0_59, %c0_60] : memref<9x128x128xbf16, #tpu.memory_space<vmem>>, vector<1x128x128xbf16>
    %85 = vector.shape_cast %84 : vector<1x128x128xbf16> to vector<128x128xbf16>
    %cst_61 = arith.constant dense<0.000000e+00> : vector<256x128xf32>
    %86 = tpu.matmul %83, %85, %cst_61 {dimension_numbers = #tpu.dot_dimension_numbers<[1], [0], [0], [1], [0, 0, 1, 1], [], []>} : vector<256x128xbf16>, vector<128x128xbf16>, vector<256x128xf32> -> vector<256x128xf32>
    %87 = arith.addf %81, %86 : vector<256x128xf32>
    %c0_62 = arith.constant 0 : index
    %c2_63 = arith.constant 2 : index
    %c0_64 = arith.constant 0 : index
    %88 = vector.load %arg8[%c0_62, %c2_63, %c0_64] : memref<18x18x128xbf16, #tpu.memory_space<vmem>>, vector<16x16x128xbf16>
    %89 = vector.shape_cast %88 : vector<16x16x128xbf16> to vector<256x128xbf16>
    %c2_65 = arith.constant 2 : index
    %c0_66 = arith.constant 0 : index
    %c0_67 = arith.constant 0 : index
    %90 = vector.load %arg5[%c2_65, %c0_66, %c0_67] : memref<9x128x128xbf16, #tpu.memory_space<vmem>>, vector<1x128x128xbf16>
    %91 = vector.shape_cast %90 : vector<1x128x128xbf16> to vector<128x128xbf16>
    %cst_68 = arith.constant dense<0.000000e+00> : vector<256x128xf32>
    %92 = tpu.matmul %89, %91, %cst_68 {dimension_numbers = #tpu.dot_dimension_numbers<[1], [0], [0], [1], [0, 0, 1, 1], [], []>} : vector<256x128xbf16>, vector<128x128xbf16>, vector<256x128xf32> -> vector<256x128xf32>
    %93 = arith.addf %87, %92 : vector<256x128xf32>
    %c1_69 = arith.constant 1 : index
    %c0_70 = arith.constant 0 : index
    %c0_71 = arith.constant 0 : index
    %94 = vector.load %arg8[%c1_69, %c0_70, %c0_71] : memref<18x18x128xbf16, #tpu.memory_space<vmem>>, vector<16x16x128xbf16>
    %95 = vector.shape_cast %94 : vector<16x16x128xbf16> to vector<256x128xbf16>
    %c3_72 = arith.constant 3 : index
    %c0_73 = arith.constant 0 : index
    %c0_74 = arith.constant 0 : index
    %96 = vector.load %arg5[%c3_72, %c0_73, %c0_74] : memref<9x128x128xbf16, #tpu.memory_space<vmem>>, vector<1x128x128xbf16>
    %97 = vector.shape_cast %96 : vector<1x128x128xbf16> to vector<128x128xbf16>
    %cst_75 = arith.constant dense<0.000000e+00> : vector<256x128xf32>
    %98 = tpu.matmul %95, %97, %cst_75 {dimension_numbers = #tpu.dot_dimension_numbers<[1], [0], [0], [1], [0, 0, 1, 1], [], []>} : vector<256x128xbf16>, vector<128x128xbf16>, vector<256x128xf32> -> vector<256x128xf32>
    %99 = arith.addf %93, %98 : vector<256x128xf32>
    %c1_76 = arith.constant 1 : index
    %c1_77 = arith.constant 1 : index
    %c0_78 = arith.constant 0 : index
    %100 = vector.load %arg8[%c1_76, %c1_77, %c0_78] : memref<18x18x128xbf16, #tpu.memory_space<vmem>>, vector<16x16x128xbf16>
    %101 = vector.shape_cast %100 : vector<16x16x128xbf16> to vector<256x128xbf16>
    %c4_79 = arith.constant 4 : index
    %c0_80 = arith.constant 0 : index
    %c0_81 = arith.constant 0 : index
    %102 = vector.load %arg5[%c4_79, %c0_80, %c0_81] : memref<9x128x128xbf16, #tpu.memory_space<vmem>>, vector<1x128x128xbf16>
    %103 = vector.shape_cast %102 : vector<1x128x128xbf16> to vector<128x128xbf16>
    %cst_82 = arith.constant dense<0.000000e+00> : vector<256x128xf32>
    %104 = tpu.matmul %101, %103, %cst_82 {dimension_numbers = #tpu.dot_dimension_numbers<[1], [0], [0], [1], [0, 0, 1, 1], [], []>} : vector<256x128xbf16>, vector<128x128xbf16>, vector<256x128xf32> -> vector<256x128xf32>
    %105 = arith.addf %99, %104 : vector<256x128xf32>
    %c1_83 = arith.constant 1 : index
    %c2_84 = arith.constant 2 : index
    %c0_85 = arith.constant 0 : index
    %106 = vector.load %arg8[%c1_83, %c2_84, %c0_85] : memref<18x18x128xbf16, #tpu.memory_space<vmem>>, vector<16x16x128xbf16>
    %107 = vector.shape_cast %106 : vector<16x16x128xbf16> to vector<256x128xbf16>
    %c5_86 = arith.constant 5 : index
    %c0_87 = arith.constant 0 : index
    %c0_88 = arith.constant 0 : index
    %108 = vector.load %arg5[%c5_86, %c0_87, %c0_88] : memref<9x128x128xbf16, #tpu.memory_space<vmem>>, vector<1x128x128xbf16>
    %109 = vector.shape_cast %108 : vector<1x128x128xbf16> to vector<128x128xbf16>
    %cst_89 = arith.constant dense<0.000000e+00> : vector<256x128xf32>
    %110 = tpu.matmul %107, %109, %cst_89 {dimension_numbers = #tpu.dot_dimension_numbers<[1], [0], [0], [1], [0, 0, 1, 1], [], []>} : vector<256x128xbf16>, vector<128x128xbf16>, vector<256x128xf32> -> vector<256x128xf32>
    %111 = arith.addf %105, %110 : vector<256x128xf32>
    %c2_90 = arith.constant 2 : index
    %c0_91 = arith.constant 0 : index
    %c0_92 = arith.constant 0 : index
    %112 = vector.load %arg8[%c2_90, %c0_91, %c0_92] : memref<18x18x128xbf16, #tpu.memory_space<vmem>>, vector<16x16x128xbf16>
    %113 = vector.shape_cast %112 : vector<16x16x128xbf16> to vector<256x128xbf16>
    %c6_93 = arith.constant 6 : index
    %c0_94 = arith.constant 0 : index
    %c0_95 = arith.constant 0 : index
    %114 = vector.load %arg5[%c6_93, %c0_94, %c0_95] : memref<9x128x128xbf16, #tpu.memory_space<vmem>>, vector<1x128x128xbf16>
    %115 = vector.shape_cast %114 : vector<1x128x128xbf16> to vector<128x128xbf16>
    %cst_96 = arith.constant dense<0.000000e+00> : vector<256x128xf32>
    %116 = tpu.matmul %113, %115, %cst_96 {dimension_numbers = #tpu.dot_dimension_numbers<[1], [0], [0], [1], [0, 0, 1, 1], [], []>} : vector<256x128xbf16>, vector<128x128xbf16>, vector<256x128xf32> -> vector<256x128xf32>
    %117 = arith.addf %111, %116 : vector<256x128xf32>
    %c2_97 = arith.constant 2 : index
    %c1_98 = arith.constant 1 : index
    %c0_99 = arith.constant 0 : index
    %118 = vector.load %arg8[%c2_97, %c1_98, %c0_99] : memref<18x18x128xbf16, #tpu.memory_space<vmem>>, vector<16x16x128xbf16>
    %119 = vector.shape_cast %118 : vector<16x16x128xbf16> to vector<256x128xbf16>
    %c7_100 = arith.constant 7 : index
    %c0_101 = arith.constant 0 : index
    %c0_102 = arith.constant 0 : index
    %120 = vector.load %arg5[%c7_100, %c0_101, %c0_102] : memref<9x128x128xbf16, #tpu.memory_space<vmem>>, vector<1x128x128xbf16>
    %121 = vector.shape_cast %120 : vector<1x128x128xbf16> to vector<128x128xbf16>
    %cst_103 = arith.constant dense<0.000000e+00> : vector<256x128xf32>
    %122 = tpu.matmul %119, %121, %cst_103 {dimension_numbers = #tpu.dot_dimension_numbers<[1], [0], [0], [1], [0, 0, 1, 1], [], []>} : vector<256x128xbf16>, vector<128x128xbf16>, vector<256x128xf32> -> vector<256x128xf32>
    %123 = arith.addf %117, %122 : vector<256x128xf32>
    %c2_104 = arith.constant 2 : index
    %c2_105 = arith.constant 2 : index
    %c0_106 = arith.constant 0 : index
    %124 = vector.load %arg8[%c2_104, %c2_105, %c0_106] : memref<18x18x128xbf16, #tpu.memory_space<vmem>>, vector<16x16x128xbf16>
    %125 = vector.shape_cast %124 : vector<16x16x128xbf16> to vector<256x128xbf16>
    %c8_107 = arith.constant 8 : index
    %c0_108 = arith.constant 0 : index
    %c0_109 = arith.constant 0 : index
    %126 = vector.load %arg5[%c8_107, %c0_108, %c0_109] : memref<9x128x128xbf16, #tpu.memory_space<vmem>>, vector<1x128x128xbf16>
    %127 = vector.shape_cast %126 : vector<1x128x128xbf16> to vector<128x128xbf16>
    %cst_110 = arith.constant dense<0.000000e+00> : vector<256x128xf32>
    %128 = tpu.matmul %125, %127, %cst_110 {dimension_numbers = #tpu.dot_dimension_numbers<[1], [0], [0], [1], [0, 0, 1, 1], [], []>} : vector<256x128xbf16>, vector<128x128xbf16>, vector<256x128xf32> -> vector<256x128xf32>
    %129 = arith.addf %123, %128 : vector<256x128xf32>
    %c0_111 = arith.constant 0 : index
    %c0_112 = arith.constant 0 : index
    %c2_113 = arith.constant 2 : index
    %c1_114 = arith.constant 1 : index
    %c0_115 = arith.constant 0 : index
    %130 = vector.load %arg2[%c0_111, %c0_112, %c2_113, %c1_114, %c0_115] : memref<1x1x20x18x128xf32, #tpu.memory_space<vmem>>, vector<1x1x16x16x128xf32>
    %131 = vector.shape_cast %130 : vector<1x1x16x16x128xf32> to vector<16x16x128xf32>
    %132 = vector.shape_cast %131 : vector<16x16x128xf32> to vector<256x128xf32>
    %c0_116 = arith.constant 0 : index
    %c0_117 = arith.constant 0 : index
    %133 = vector.load %arg6[%c0_116, %c0_117] : memref<1x128xf32, #tpu.memory_space<vmem>>, vector<1x128xf32>
    %134 = vector.broadcast %133 : vector<1x128xf32> to vector<256x128xf32>
    %135 = arith.addf %129, %134 : vector<256x128xf32>
    %136 = arith.addf %135, %132 : vector<256x128xf32>
    %cst_118 = arith.constant 0.000000e+00 : f32
    %137 = vector.broadcast %cst_118 : f32 to vector<256x128xf32>
    %138 = arith.maximumf %136, %137 : vector<256x128xf32>
    %139 = vector.shape_cast %138 : vector<256x128xf32> to vector<16x16x128xf32>
    %c0_119 = arith.constant 0 : index
    %c0_120 = arith.constant 0 : index
    %c0_121 = arith.constant 0 : index
    %c0_122 = arith.constant 0 : index
    %c0_123 = arith.constant 0 : index
    %140 = vector.load %arg7[%c0_119, %c0_120, %c0_121, %c0_122, %c0_123] : memref<1x1x16x16x128xf32, #tpu.memory_space<vmem>>, vector<1x1x16x16x128xf32>
    %141 = vector.shape_cast %140 : vector<1x1x16x16x128xf32> to vector<16x16x128xf32>
    %142 = vector.shape_cast %139 : vector<16x16x128xf32> to vector<1x1x16x16x128xf32>
    tpu.vector_store %arg7[%c0_119, %c0_120, %c0_121, %c0_122, %c0_123], %142 {strides = array<i32>} : memref<1x1x16x16x128xf32, #tpu.memory_space<vmem>>, vector<1x1x16x16x128xf32>,
    return
  }
  func.func @transform_0(%arg0: i32, %arg1: i32) -> (i32, i32, i32, i32, i32) {
    %c0_i32 = arith.constant 0 : i32
    %c0_i32_0 = arith.constant 0 : i32
    %c0_i32_1 = arith.constant 0 : i32
    %c0_i32_2 = arith.constant 0 : i32
    return %arg0, %arg1, %c0_i32, %c0_i32_0, %c0_i32_1 : i32, i32, i32, i32, i32
  }
  func.func @transform_1(%arg0: i32, %arg1: i32) -> (i32, i32, i32) {
    %c0_i32 = arith.constant 0 : i32
    %c0_i32_0 = arith.constant 0 : i32
    %c0_i32_1 = arith.constant 0 : i32
    %c0_i32_2 = arith.constant 0 : i32
    return %c0_i32, %c0_i32_0, %c0_i32_1 : i32, i32, i32
  }
  func.func @transform_2(%arg0: i32, %arg1: i32) -> (i32, i32) {
    %c0_i32 = arith.constant 0 : i32
    %c0_i32_0 = arith.constant 0 : i32
    %c0_i32_1 = arith.constant 0 : i32
    return %c0_i32, %c0_i32_0 : i32, i32
  }
  func.func @transform_3(%arg0: i32, %arg1: i32) -> (i32, i32, i32) {
    %c0_i32 = arith.constant 0 : i32
    %c0_i32_0 = arith.constant 0 : i32
    %c0_i32_1 = arith.constant 0 : i32
    %c0_i32_2 = arith.constant 0 : i32
    return %c0_i32, %c0_i32_0, %c0_i32_1 : i32, i32, i32
  }
  func.func @transform_4(%arg0: i32, %arg1: i32) -> (i32, i32) {
    %c0_i32 = arith.constant 0 : i32
    %c0_i32_0 = arith.constant 0 : i32
    %c0_i32_1 = arith.constant 0 : i32
    return %c0_i32, %c0_i32_0 : i32, i32
  }
  func.func @transform_5(%arg0: i32, %arg1: i32) -> (i32, i32, i32, i32, i32) {
    %c0_i32 = arith.constant 0 : i32
    %c0_i32_0 = arith.constant 0 : i32
    %c0_i32_1 = arith.constant 0 : i32
    %c0_i32_2 = arith.constant 0 : i32
    return %arg0, %arg1, %c0_i32, %c0_i32_0, %c0_i32_1 : i32, i32, i32, i32, i32
  }
}

</mosaic_0001>

<bundles_post_ra>
// kernel: basic_block_forward.1
= control target key start
LH: loop header
LB: loop body
LE: loop exit
PB: predicated region body
PF: predicated region fallthrough
CT: control target
= control target key end

     0   :  { %s11982_s18 = smov 0   ;;  %s11984_s19 = smov 0   ;;  %s14774_s0 = inlined_call_operand.vmem [shape: f32[2,1,20,18,128], index: 0, kind: input, shape index: {}]   ;;  %s14775_s1 = inlined_call_operand.vmem [shape: bf16[9,128,128], index: 1, kind: input, shape index: {}]   ;;  %s14776_s2 = inlined_call_operand.vmem [shape: f32[1,128], index: 2, kind: input, shape index: {}]   ;;  %s14777_s3 = inlined_call_operand.vmem [shape: bf16[9,128,128], index: 3, kind: input, shape index: {}]   ;;  %s14778_s4 = inlined_call_operand.vmem [shape: f32[1,128], index: 4, kind: input, shape index: {}]   ;;  %s14779_s5 = inlined_call_operand.vmem [shape: f32[2,1,16,16,128], index: 5, kind: output, shape index: {}]  }
   0x1   :  { %s11986_s20 = smov 0  }
   0x2 LB: > { %s27_s21 = sadd.s32 1, %s11945_s19  ;;  %p9047_p0 = scmp.ge.s32.totalorder %s11949_s20, 1  ;;  %s11949_s20 = sphi %s11986_s20, %s15_s20   ;;  %s11945_s19 = sphi %s11984_s19, %s15018_s19   ;;  %s11941_s18 = sphi %s11982_s18, %s15017_s18  }
   0x3   : > { %p29_p1 = scmp.ge.s32.totalorder %s27_s21, 2  ;;  %p207_p2 = scmp.lt.s32.totalorder %s11949_s20, 3 }
   0x5   : > { %s15020_s21 = smov (%p29_p1, %s27_s21), 0  ;;  %p208_p3 = pnand %p9047_p0, %p207_p2 }
   0x7   : > { %211 = sbr.rel (%p208_p3) target bundleno = 1715 (0x6b3), region = 40 }
   0xe   : > { %v11688_v0 = vld [vmem:[%s14775_s1 + $0x40] sm:$0xff]   ;;  %p243_p4 = scmp.lt.s32.totalorder %s11941_s18, 1  ;;  %v11689_v1 = vld [vmem:[%s14775_s1 + $0x48] sm:$0xff]   ;;  %v11690_v2 = vld [vmem:[%s14775_s1 + $0x50] sm:$0xff]   ;;  %vm378_vm0 = vsmask.f32 7424 }
   0xf   : > { %10202 = vmatprep.subr.bf16.mxu0 %v11688_v0  ;;  %11102 = vmatprep.subr.bf16.mxu1 %v11688_v0  ;;  %v11691_v3 = vld [vmem:[%s14775_s1 + $0x58] sm:$0xff]   ;;  %v11692_v14 = vld [vmem:[%s14775_s1 + $0x60] sm:$0xff]   ;;  %v11693_v22 = vld [vmem:[%s14775_s1 + $0x68] sm:$0xff]   ;;  %vm1116_vm1 = vcmask 1046528   ;;  %vm3360_vm2 = vsmask.f32 256 }
  0x10   : > { %s15022_s18 = smov (!%p243_p4, %s11941_s18), 1  ;;  %10203 = vmatpush3.bf16.msra.mxu0 %v11688_v0  ;;  %11110 = vmatpush3.bf16.msra.mxu1 %v11688_v0  ;;  %v11694_v28 = vld [vmem:[%s14775_s1 + $0x70] sm:$0xff]   ;;  %v11695_v38 = vld [vmem:[%s14775_s1 + $0x78] sm:$0xff]   ;;  %v11696_v48 = vld [vmem:[%s14775_s1] sm:$0xff]   ;;  %vm3723_vm3 = vcmask 1043456   ;;  %vm3730_vm5 = vcmask 1040384  }
  0x11   : > { %10204 = vmatprep.subr.bf16.mxu0 %v11689_v1  ;;  %s11662_s28 = smul.u32 480, %s15022_s18  ;;  %11103 = vmatprep.subr.bf16.mxu1 %v11689_v1  ;;  %v11697_v63 = vld [vmem:[%s14775_s1 + $0x8] sm:$0xff]   ;;  %vm3724_vm4 = vsmask.f32 7938  ;;  %vm3361_vm6 = vsmask.f32 4368  ;;  %vm12799_vm8 = vmand %vm3730_vm5, %vm3360_vm2 }
  0x12   : > { %vm12790_vm7 = vmand %vm3723_vm3, %vm3724_vm4  ;;  %vm4038_vm11 = vsmask.f32 3328  ;;  %vm4039_vm12 = vsmask.f32 7440  ;;  %vm5068_vm14 = vcmask 1042432   ;;  %vm5069_vm15 = vcmask 1046532  }
  0x13   : > { %s12015_s6 = scalar_lea.vmem %s14774_s0, %s11662_s28  ;;  %vm12805_vm9 = vmor %vm3360_vm2, %vm3361_vm6  ;;  %s9715_s17 = sshll.u32 %s15022_s18, 8 }
  0x14   : > { %10205 = vmatpush3.bf16.msra.mxu0 %v11689_v1  ;;  %11111 = vmatpush3.bf16.msra.mxu1 %v11689_v1  ;;  %v262_v4 = vld [vmem:[%s12015_s6] sm:$0xff]  ;;  %v263_v5 = vld [vmem:[%s12015_s6 + $0x8] sm:$0xff]  ;;  %v264_v6 = vld [vmem:[%s12015_s6 + $0x10] sm:$0x3]  ;;  %s14674_s24 = scalar_lea.vmem %s14779_s5, %s9715_s17 }
  0x15   : > { %10206 = vmatprep.subr.bf16.mxu0 %v11690_v2  ;;  %11104 = vmatprep.subr.bf16.mxu1 %v11690_v2  ;;  %v12023_v7 = vpack.c.bf16 %v263_v5, %v262_v4  ;;  %v12025_v8 = vpack.c.bf16 %v264_v6, %v264_v6  ;;  %v265_v9 = vld [vmem:[%s12015_s6 + $0x18] sm:$0xff]  ;;  %v266_v13 = vld [vmem:[%s12015_s6 + $0x20] sm:$0xff]  ;;  %v268_v17 = vld [vmem:[%s12015_s6 + $0x30] sm:$0xff] }
  0x16   : > { %v269_v18 = vld [vmem:[%s12015_s6 + $0x38] sm:$0xff]  ;;  %v267_v19 = vld [vmem:[%s12015_s6 + $0x28] sm:$0x3]  ;;  %v12038_v20 = vpack.c.bf16 %v266_v13, %v265_v9  ;;  %v270_v23 = vld [vmem:[%s12015_s6 + $0x40] sm:$0x3] }
  0x17   : > { %v380_v10 = vshrl.u32 %v12023_v7, 16  ;;  %v382_v11 = vshll.u32 %v12023_v7, 16  ;;  %v387_v12 = vshll.u32 %v12025_v8, 16  ;;  %v12044_v24 = vpack.c.bf16 %v269_v18, %v268_v17  ;;  %v271_v30 = vld [vmem:[%s12015_s6 + $0x48] sm:$0xff]  ;;  %v272_v32 = vld [vmem:[%s12015_s6 + $0x50] sm:$0xff]  ;;  %v274_v33 = vld [vmem:[%s12015_s6 + $0x60] sm:$0xff] }
  0x18   : > { %10207 = vmatpush3.bf16.msra.mxu0 %v11690_v2  ;;  %11112 = vmatpush3.bf16.msra.mxu1 %v11690_v2  ;;  %v12047_v26 = vpack.c.bf16 %v267_v19, %v267_v19  ;;  %v394_v27 = vshll.u32 %v12038_v20, 16  ;;  %v12053_v29 = vpack.c.bf16 %v270_v23, %v270_v23  ;;  %v275_v34 = vld [vmem:[%s12015_s6 + $0x68] sm:$0xff]  ;;  %v392_v35 = vshrl.u32 %v12038_v20, 16  ;;  %v273_v40 = vld [vmem:[%s12015_s6 + $0x58] sm:$0x3]  ;;  %v278_v53 = vld [vmem:[%s12015_s6 + $0x80] sm:$0xff] }
  0x19   : > { %10208 = vmatprep.subr.bf16.mxu0 %v11691_v3  ;;  %11105 = vmatprep.subr.bf16.mxu1 %v11691_v3  ;;  %v384_v15 = vrot.slane %v382_v11, 1  ;;  %v389_v16 = vrot.slane %v387_v12, 1  ;;  %v406_v31 = vshll.u32 %v12044_v24, 16  ;;  %v12067_v41 = vpack.c.bf16 %v272_v32, %v271_v30  ;;  %v276_v45 = vld [vmem:[%s12015_s6 + $0x70] sm:$0x3]  ;;  %v277_v52 = vld [vmem:[%s12015_s6 + $0x78] sm:$0xff]  ;;  %vm12840_vm10 = vmand %vm3730_vm5, %vm3724_vm4 }
  0x1a   : > { %v396_v36 = vrot.slane %v394_v27, 1  ;;  %v399_v37 = vshll.u32 %v12047_v26, 16  ;;  %v411_v39 = vshll.u32 %v12053_v29, 16  ;;  %v404_v42 = vshrl.u32 %v12044_v24, 16  ;;  %v280_v57 = vld [vmem:[%s12015_s6 + $0x90] sm:$0xff]  ;;  %v281_v59 = vld [vmem:[%s12015_s6 + $0x98] sm:$0xff]  ;;  %vm13027_vm13 = vmor %vm4038_vm11, %vm4039_vm12 }
  0x1b   : > { %v385_v21 = vor.u32 %v384_v15, %v380_v10  ;;  %v408_v43 = vrot.slane %v406_v31, 1  ;;  %v12070_v44 = vpack.c.bf16 %v275_v34, %v274_v33  ;;  %v12076_v49 = vpack.c.bf16 %v273_v40, %v273_v40  ;;  %v279_v2 = vld [vmem:[%s12015_s6 + $0x88] sm:$0x3]  ;;  %v282_v11 = vld [vmem:[%s12015_s6 + $0xa0] sm:$0x3]  ;;  %v284_v23 = vld [vmem:[%s12015_s6 + $0xb0] sm:$0xff] }
  0x1c   : > { %10209 = vmatpush3.bf16.msra.mxu0 %v11691_v3  ;;  %11113 = vmatpush3.bf16.msra.mxu1 %v11691_v3  ;;  %v397_v46 = vor.u32 %v396_v36, %v392_v35  ;;  %v401_v47 = vrot.slane %v399_v37, 1  ;;  %v413_v50 = vrot.slane %v411_v39, 1  ;;  %v418_v51 = vshll.u32 %v12067_v41, 16  ;;  %v11699_v30 = vld [vmem:[%s14775_s1 + $0x18] sm:$0xff]  }
  0x1d   : > { %10210 = vmatprep.subr.bf16.mxu0 %v11692_v14  ;;  %11106 = vmatprep.subr.bf16.mxu1 %v11692_v14  ;;  %v390_v25 = vsel %vm378_vm0, %v385_v21, %v389_v16  ;;  %v409_v54 = vor.u32 %v408_v43, %v404_v42  ;;  %v12081_v55 = vpack.c.bf16 %v276_v45, %v276_v45  ;;  %v430_v56 = vshll.u32 %v12070_v44, 16  ;;  %v11698_v16 = vld [vmem:[%s14775_s1 + $0x10] sm:$0xff]   ;;  %v285_v33 = vld [vmem:[%s12015_s6 + $0xb8] sm:$0x3]  ;;  %v11700_v43 = vld [vmem:[%s14775_s1 + $0x20] sm:$0xff]  }
  0x1e   : > { %10218 = vmatprep.mubr.bf16.mxu0 %v390_v25  ;;  %v416_v58 = vshrl.u32 %v12067_v41, 16  ;;  %v12088_v60 = vsel %vm378_vm0, %v397_v46, %v401_v47  ;;  %v423_v61 = vshll.u32 %v12076_v49, 16  ;;  %v1117_v62 = vrot.slane %v12023_v7, 1 }
  0x1f   : > { %v420_v0 = vrot.slane %v418_v51, 1  ;;  %v428_v1 = vshrl.u32 %v12070_v44, 16  ;;  %v12097_v3 = vpack.c.bf16 %v278_v53, %v277_v52  ;;  %v1118_v4 = vrot.slane %v12025_v8, 1  ;;  %v11701_v52 = vld [vmem:[%s14775_s1 + $0x28] sm:$0xff]  }
  0x20   : > { %10211 = vmatpush3.bf16.msra.mxu0 %v11692_v14  ;;  %11114 = vmatpush3.bf16.msra.mxu1 %v11692_v14  ;;  %v12101_v5 = vsel %vm378_vm0, %v409_v54, %v413_v50  ;;  %v432_v6 = vrot.slane %v430_v56, 1  ;;  %v435_v9 = vshll.u32 %v12081_v55, 16  ;;  %v12104_v10 = vpack.c.bf16 %v281_v59, %v280_v57  ;;  %v11702_v57 = vld [vmem:[%s14775_s1 + $0x30] sm:$0xff]  }
  0x21   : > { %10212 = vmatprep.subr.bf16.mxu0 %v11693_v22  ;;  %11107 = vmatprep.subr.bf16.mxu1 %v11693_v22  ;;  %v12108_v12 = vsel %vm1116_vm1, %v1117_v62, %v1118_v4  ;;  %v12111_v13 = vpack.c.bf16 %v279_v2, %v279_v2  ;;  %v421_v8 = vor.u32 %v420_v0, %v416_v58  ;;  %v425_v14 = vrot.slane %v423_v61, 1  ;;  %v11703_v58 = vld [vmem:[%s14775_s1 + $0x38] sm:$0xff]   ;;  %v11704_v61 = vld [vmem:[%s14775_s1 + $0x80] sm:$0xff]   ;;  %v11705_v62 = vld [vmem:[%s14775_s1 + $0x88] sm:$0xff]  }
  0x22   : > { %v442_v15 = vshll.u32 %v12097_v3, 16  ;;  %v433_v17 = vor.u32 %v432_v6, %v428_v1  ;;  %v437_v18 = vrot.slane %v435_v9, 1  ;;  %v12118_v19 = vpack.c.bf16 %v282_v11, %v282_v11  ;;  %v11708_v0 = vld [vmem:[%s14775_s1 + $0xa0] sm:$0xff]   ;;  %v11709_v1 = vld [vmem:[%s14775_s1 + $0xa8] sm:$0xff]   ;;  %v11710_v6 = vld [vmem:[%s14775_s1 + $0xb0] sm:$0xff]  }
  0x23   : > { %v454_v21 = vshll.u32 %v12104_v10, 16  ;;  %v440_v25 = vshrl.u32 %v12097_v3, 16  ;;  %v447_v27 = vshll.u32 %v12111_v13, 16  ;;  %v452_v32 = vshrl.u32 %v12104_v10, 16  ;;  %v286_v2 = vld [vmem:[%s12015_s6 + $0xc0] sm:$0xff]  ;;  %v287_v4 = vld [vmem:[%s12015_s6 + $0xc8] sm:$0xff] }
  0x24   : > { %10213 = vmatpush3.bf16.msra.mxu0 %v11693_v22  ;;  %11115 = vmatpush3.bf16.msra.mxu1 %v11693_v22  ;;  %v283_v22 = vld [vmem:[%s12015_s6 + $0xa8] sm:$0xff]  ;;  %v444_v31 = vrot.slane %v442_v15, 1  ;;  %v12136_v35 = vsel %vm378_vm0, %v433_v17, %v437_v18  ;;  %v459_v37 = vshll.u32 %v12118_v19, 16  ;;  %v12141_v40 = vpack.c.bf16 %v285_v33, %v285_v33  ;;  %v11711_v9 = vld [vmem:[%s14775_s1 + $0xb8] sm:$0xff]   ;;  %v292_v15 = vld [vmem:[%s12015_s6 + $0xf0] sm:$0xff] }
  0x25   : > { %10214 = vmatprep.subr.bf16.mxu0 %v11694_v28  ;;  %11108 = vmatprep.subr.bf16.mxu1 %v11694_v28  ;;  %v12133_v34 = vpack.c.bf16 %v284_v23, %v283_v22  ;;  %v456_v36 = vrot.slane %v454_v21, 1  ;;  %v449_v39 = vrot.slane %v447_v27, 1  ;;  %v12203_v11 = vpack.c.bf16 %v287_v4, %v286_v2  ;;  %v11712_v17 = vld [vmem:[%s14775_s1 + $0xc0] sm:$0xff]   ;;  %v295_v22 = vld [vmem:[%s12015_s6 + $0x108] sm:$0xff]  ;;  %v296_v23 = vld [vmem:[%s12015_s6 + $0x110] sm:$0xff] }
  0x26   : > { %v461_v46 = vrot.slane %v459_v37, 1  ;;  %v471_v51 = vshll.u32 %v12141_v40, 16  ;;  %v299_v27 = vld [vmem:[%s12015_s6 + $0x128] sm:$0xff]  ;;  %v302_v33 = vld [vmem:[%s12015_s6 + $0x140] sm:$0xff]  ;;  %v305_v37 = vld [vmem:[%s12015_s6 + $0x158] sm:$0xff] }
  0x27   : > { %v466_v42 = vshll.u32 %v12133_v34, 16  ;;  %v457_v45 = vor.u32 %v456_v36, %v452_v32  ;;  %v301_v32 = vld [vmem:[%s12015_s6 + $0x138] sm:$0xff]  ;;  %v304_v36 = vld [vmem:[%s12015_s6 + $0x150] sm:$0xff] }
  0x28   : > { %10215 = vmatpush3.bf16.msra.mxu0 %v11694_v28  ;;  %11116 = vmatpush3.bf16.msra.mxu1 %v11694_v28  ;;  %v12126_v28 = vsel %vm378_vm0, %v421_v8, %v425_v14  ;;  %v473_v56 = vrot.slane %v471_v51, 1  ;;  %v289_v8 = vld [vmem:[%s12015_s6 + $0xd8] sm:$0xff]  ;;  %v290_v14 = vld [vmem:[%s12015_s6 + $0xe0] sm:$0xff] }
  0x29   : > { %10216 = vmatprep.subr.bf16.mxu0 %v11695_v38  ;;  %11109 = vmatprep.subr.bf16.mxu1 %v11695_v38  ;;  %v468_v50 = vrot.slane %v466_v42, 1  ;;  %v12156_v53 = vsel %vm378_vm0, %v457_v45, %v461_v46  ;;  %v12214_v18 = vpack.c.bf16 %v290_v14, %v289_v8  ;;  %v307_v42 = vld [vmem:[%s12015_s6 + $0x168] sm:$0xff]  ;;  %v310_v45 = vld [vmem:[%s12015_s6 + $0x180] sm:$0xff]  ;;  %v1136_v8 = vrot.slane %v12118_v19, 1 }
  0x2a   : > { %v311_v46 = vld [vmem:[%s12015_s6 + $0x188] sm:$0xff]  ;;  %v11716_v14 = vld [vmem:[%s14775_s1 + $0xe0] sm:$0xff]  }
  0x2b   : > { %v12247_v51 = vpack.c.bf16 %v311_v46, %v310_v45  ;;  %v11717_v19 = vld [vmem:[%s14775_s1 + $0xe8] sm:$0xff]   ;;  %v11719_v45 = vld [vmem:[%s14775_s1 + $0xf8] sm:$0xff]   ;;  %v1144_v46 = vrot.slane %v12214_v18, 1 }
  0x2c   : > { %10217 = vmatpush3.bf16.msra.mxu0 %v11695_v38  ;;  %11117 = vmatpush3.bf16.msra.mxu1 %v11695_v38  ;;  %v445_v38 = vor.u32 %v444_v31, %v440_v25  ;;  %v298_v25 = vld [vmem:[%s12015_s6 + $0x120] sm:$0xff] }
  0x2d   : > { %10254 = vmatprep.subr.bf16.mxu0 %v11696_v48  ;;  %v12226_v31 = vpack.c.bf16 %v299_v27, %v298_v25  ;;  %v1141_v25 = vrot.slane %v12203_v11, 1 }
  0x2e   : > { %v12148_v47 = vsel %vm378_vm0, %v445_v38, %v449_v39  ;;  %v12234_v38 = vpack.c.bf16 %v302_v33, %v301_v32  ;;  %v12236_v39 = vpack.c.bf16 %v305_v37, %v304_v36  ;;  %v291_v32 = vld [vmem:[%s12015_s6 + $0xe8] sm:$0x3]  ;;  %v11718_v33 = vld [vmem:[%s14775_s1 + $0xf0] sm:$0xff]   ;;  %v294_v36 = vld [vmem:[%s12015_s6 + $0x100] sm:$0x3] }
  0x2f   : > { %10219 = vmatmul.mubr.bf16.vlgmr.msra.gmra.mrb[0].mxu0 %v12088_v60 }
  0x30   : > { %10255 = vmatpush3.bf16.msra.mxu0 %v11696_v48  ;;  %10222 = vmatprep.mubr.bf16.mxu0 %v12101_v5  ;;  %v464_v48 = vshrl.u32 %v12133_v34, 16 }
  0x31   : > { %10256 = vmatprep.subr.bf16.mxu0 %v11697_v63 }
  0x32   : > { %v469_v54 = vor.u32 %v468_v50, %v464_v48  ;;  %v1120_v48 = vrot.slane %v12038_v20, 1 }
  0x34   : > { %10257 = vmatpush3.bf16.msra.mxu0 %v11697_v63  ;;  %v12167_v59 = vsel %vm378_vm0, %v469_v54, %v473_v56  ;;  %v11707_v63 = vld [vmem:[%s14775_s1 + $0x98] sm:$0xff]   ;;  %v314_v54 = vld [vmem:[%s12015_s6 + $0x1a0] sm:$0xff]  ;;  %v1121_v56 = vrot.slane %v12047_v26, 1  ;;  %v11713_v26 = vld [vmem:[%s14775_s1 + $0xc8] sm:$0xff]  }
  0x35   : > { %10258 = vmatprep.subr.bf16.mxu0 %v11698_v16 }
  0x37   : > { %10223 = vmatmul.mubr.bf16.gmra.mrb[4].mxu0 %v12126_v28 }
  0x38   : > { %10259 = vmatpush3.bf16.msra.mxu0 %v11698_v16  ;;  %10226 = vmatprep.mubr.bf16.mxu0 %v12136_v35  ;;  %v293_v16 = vld [vmem:[%s12015_s6 + $0xf8] sm:$0xff] }
  0x39   : > { %10260 = vmatprep.subr.bf16.mxu0 %v11699_v30  ;;  %v12216_v21 = vpack.c.bf16 %v293_v16, %v292_v15  ;;  %v288_v15 = vld [vmem:[%s12015_s6 + $0xd0] sm:$0x3] }
  0x3c   : > { %10261 = vmatpush3.bf16.msra.mxu0 %v11699_v30  ;;  %v12224_v30 = vpack.c.bf16 %v296_v23, %v295_v22  ;;  %v1138_v22 = vrot.slane %v12133_v34, 1  ;;  %v1139_v23 = vrot.slane %v12141_v40, 1 }
  0x3d   : > { %10262 = vmatprep.subr.bf16.mxu0 %v11700_v43 }
  0x3e   : > { %v12317_v37 = vsel %vm1116_vm1, %v1138_v22, %v1139_v23 }
  0x3f   : > { %10227 = vmatmul.mubr.bf16.gmra.mrb[8].mxu0 %v12148_v47 }
  0x40   : > { %10263 = vmatpush3.bf16.msra.mxu0 %v11700_v43  ;;  %10230 = vmatprep.mubr.bf16.mxu0 %v12156_v53  ;;  %v308_v43 = vld [vmem:[%s12015_s6 + $0x170] sm:$0xff] }
  0x41   : > { %10264 = vmatprep.subr.bf16.mxu0 %v11701_v52  ;;  %v12245_v50 = vpack.c.bf16 %v308_v43, %v307_v42  ;;  %v341_v42 = vpack.c.bf16 %v291_v32, %v291_v32  ;;  %v343_v43 = vpack.c.bf16 %v294_v36, %v294_v36  ;;  %v1156_v36 = vrot.slane %v12234_v38, 1 }
  0x44   : > { %10265 = vmatpush3.bf16.msra.mxu0 %v11701_v52  ;;  %v313_v52 = vld [vmem:[%s12015_s6 + $0x198] sm:$0xff] }
  0x45   : > { %10266 = vmatprep.subr.bf16.mxu0 %v11702_v57 }
  0x47   : > { %10231 = vmatmul.mubr.bf16.gmra.mrb[12].mxu0 %v12167_v59 }
  0x48   : > { %10267 = vmatpush3.bf16.msra.mxu0 %v11702_v57  ;;  %10270 = vmatprep.mubr.bf16.mxu0 %v12023_v7  ;;  %v11706_v7 = vld [vmem:[%s14775_s1 + $0x90] sm:$0xff]   ;;  %v12254_v57 = vpack.c.bf16 %v314_v54, %v313_v52  ;;  %v1147_v52 = vrot.slane %v12216_v21, 1  ;;  %v1148_v54 = vrot.slane %v343_v43, 1 }
  0x49   : > { %10268 = vmatprep.subr.bf16.mxu0 %v11703_v58 }
  0x4c   : > { %10269 = vmatpush3.bf16.msra.mxu0 %v11703_v58  ;;  %v1123_v58 = vrot.slane %v12044_v24, 1 }
  0x4d   : > { %10306 = vmatprep.subr.bf16.mxu0 %v11704_v61 }
  0x4f   : > { %10271 = vmatmul.mubr.bf16.vlgmr.msra.gmra.mrb[0].mxu0 %v12038_v20 }
  0x50   : > { %10307 = vmatpush3.bf16.msra.mxu0 %v11704_v61  ;;  %10274 = vmatprep.mubr.bf16.mxu0 %v12044_v24  ;;  %v1124_v61 = vrot.slane %v12053_v29, 1  ;;  %v1127_v29 = vrot.slane %v12076_v49, 1  ;;  %v11715_v49 = vld [vmem:[%s14775_s1 + $0xd8] sm:$0xff]  }
  0x51   : > { %10308 = vmatprep.subr.bf16.mxu0 %v11705_v62 }
  0x54   : > { %10309 = vmatpush3.bf16.msra.mxu0 %v11705_v62  ;;  %v12261_v62 = vsel %vm1116_vm1, %v1120_v48, %v1121_v56  ;;  %v1145_v48 = vrot.slane %v341_v42, 1  ;;  %v297_v56 = vld [vmem:[%s12015_s6 + $0x118] sm:$0x3] }
  0x55   : > { %10310 = vmatprep.subr.bf16.mxu0 %v11706_v7 }
  0x57   : > { %10275 = vmatmul.mubr.bf16.gmra.mrb[4].mxu0 %v12067_v41 }
  0x58   : > { %10278 = vmatprep.mubr.bf16.mxu0 %v12070_v44  ;;  %10311 = vmatpush3.bf16.msra.mxu0 %v11706_v7  ;;  %v12264_v7 = vsel %vm1116_vm1, %v1123_v58, %v1124_v61  ;;  %v12333_v58 = vld [vmem:[%s14775_s1 + $0x100] sm:$0xff]   ;;  %v300_v61 = vld [vmem:[%s12015_s6 + $0x130] sm:$0x3] }
  0x59   : > { %10312 = vmatprep.subr.bf16.mxu0 %v11707_v63 }
  0x5c   : > { %10313 = vmatpush3.bf16.msra.mxu0 %v11707_v63  ;;  %v1126_v63 = vrot.slane %v12067_v41, 1 }
  0x5d   : > { %10314 = vmatprep.subr.bf16.mxu0 %v11708_v0 }
  0x5e   : > { %v12279_v2 = vsel %vm1116_vm1, %v1126_v63, %v1127_v29  ;;  %v12339_v63 = vpack.c.bf16 %v297_v56, %v297_v56  ;;  %v12342_v29 = vsel %vm1116_vm1, %v1147_v52, %v1148_v54  ;;  %v500_v54 = vshrl.u32 %v12216_v21, 16 }
  0x5f   : > { %10279 = vmatmul.mubr.bf16.gmra.mrb[8].mxu0 %v12097_v3  ;;  %v502_v56 = vshll.u32 %v12216_v21, 16 }
  0x60   : > { %10282 = vmatprep.mubr.bf16.mxu0 %v12104_v10  ;;  %10315 = vmatpush3.bf16.msra.mxu0 %v11708_v0  ;;  %v1130_v0 = vrot.slane %v12081_v55, 1  ;;  %v1132_v55 = vrot.slane %v12097_v3, 1 }
  0x61   : > { %10316 = vmatprep.subr.bf16.mxu0 %v11709_v1 }
  0x64   : > { %10317 = vmatpush3.bf16.msra.mxu0 %v11709_v1  ;;  %v11714_v1 = vld [vmem:[%s14775_s1 + $0xd0] sm:$0xff]  }
  0x65   : > { %10318 = vmatprep.subr.bf16.mxu0 %v11710_v6 }
  0x67   : > { %10283 = vmatmul.mubr.bf16.gmra.mrb[12].mxu0 %v12133_v34 }
  0x68   : > { %10286 = vmatprep.mubr.bf16.mxu0 %v12203_v11  ;;  %10319 = vmatpush3.bf16.msra.mxu0 %v11710_v6  ;;  %v1133_v6 = vrot.slane %v12111_v13, 1  ;;  %v339_v13 = vpack.c.bf16 %v288_v15, %v288_v15  ;;  %v306_v15 = vld [vmem:[%s12015_s6 + $0x160] sm:$0x3] }
  0x69   : > { %10320 = vmatprep.subr.bf16.mxu0 %v11711_v9 }
  0x6a   : > { %v12298_v16 = vsel %vm1116_vm1, %v1132_v55, %v1133_v6  ;;  %v1142_v27 = vrot.slane %v339_v13, 1  ;;  %v478_v55 = vshll.u32 %v12203_v11, 16  ;;  %v483_v6 = vshll.u32 %v339_v13, 16 }
  0x6c   : > { %10321 = vmatpush3.bf16.msra.mxu0 %v11711_v9  ;;  %v1135_v9 = vrot.slane %v12104_v10, 1  ;;  %v12320_v40 = vsel %vm1116_vm1, %v1141_v25, %v1142_v27  ;;  %v485_v22 = vrot.slane %v483_v6, 1 }
  0x6d   : > { %10358 = vmatprep.subr.bf16.mxu0 %v11712_v17 }
  0x6f   : > { %10287 = vmatmul.mubr.bf16.gmra.mrb[16].mxu0 %v12214_v18 }
  0x70   : > { %10290 = vmatprep.mubr.bf16.mxu0 %v12216_v21 }
  0x77   : > { %10291 = vmatmul.mubr.bf16.gmra.mrb[20].mxu0 %v12224_v30 }
  0x78   : > { %10294 = vmatprep.mubr.bf16.mxu0 %v12226_v31 }
  0x7f   : > { %10295 = vmatmul.mubr.bf16.gmra.mrb[24].mxu0 %v12234_v38 }
  0x80   : > { %10298 = vmatprep.mubr.bf16.mxu0 %v12236_v39 }
  0x87   : > { %10299 = vmatmul.mubr.bf16.gmra.mrb[28].mxu0 %v12245_v50 }
  0x88   : > { %10302 = vmatprep.mubr.bf16.mxu0 %v12247_v51 }
  0x8f   : > { %10303 = vmatmul.mubr.bf16.gmra.mrb[32].mxu0 %v12254_v57 }
  0x90   : > { %10322 = vmatprep.mubr.bf16.mxu0 %v12108_v12  ;;  %v1129_v12 = vrot.slane %v12070_v44, 1 }
  0x92   : > { %v12282_v4 = vsel %vm1116_vm1, %v1129_v12, %v1130_v0  ;;  %v12344_v12 = vpack.c.bf16 %v300_v61, %v300_v61  ;;  %v1150_v0 = vrot.slane %v12224_v30, 1  ;;  %v507_v61 = vshll.u32 %v343_v43, 16 }
  0x97   : > { %10323 = vmatmul.mubr.bf16.vlgmr.msra.gmra.mrb[0].mxu0 %v12261_v62 }
  0x98   : > { %10359 = vmatpush3.bf16.msra.mxu0 %v11712_v17  ;;  %10326 = vmatprep.mubr.bf16.mxu0 %v12264_v7  ;;  %v12301_v17 = vsel %vm1116_vm1, %v1135_v9, %v1136_v8  ;;  %v1153_v9 = vrot.slane %v12226_v31, 1  ;;  %v1154_v8 = vrot.slane %v12344_v12, 1 }
  0x99   : > { %10360 = vmatprep.subr.bf16.mxu0 %v11713_v26 }
  0x9a   : > { %v12363_v32 = vsel %vm1116_vm1, %v1153_v9, %v1154_v8  ;;  %v312_v9 = vld [vmem:[%s12015_s6 + $0x190] sm:$0x3]  ;;  %v509_v8 = vrot.slane %v507_v61, 1  ;;  %v526_v61 = vshll.u32 %v12226_v31, 16 }
  0x9b   : > { %14844 = vst [vmem:[#allocation4_spill] sm:$0xff] %v12363_v32  ;;  %v12391_v43 = vpack.c.bf16 %v312_v9, %v312_v9 }
  0x9c   : > { %10361 = vmatpush3.bf16.msra.mxu0 %v11713_v26  ;;  %v12337_v26 = vsel %vm1116_vm1, %v1144_v46, %v1145_v48  ;;  %v490_v46 = vshll.u32 %v12214_v18, 16  ;;  %v495_v48 = vshll.u32 %v341_v42, 16  ;;  %v504_v42 = vrot.slane %v502_v56, 1 }
  0x9d   : > { %10362 = vmatprep.subr.bf16.mxu0 %v11714_v1  ;;  %v524_v56 = vshrl.u32 %v12226_v31, 16 }
  0x9e   : > { %v497_v6 = vrot.slane %v495_v48, 1  ;;  %v514_v48 = vshll.u32 %v12224_v30, 16 }
  0x9f   : > { %10327 = vmatmul.mubr.bf16.gmra.mrb[4].mxu0 %v12279_v2 }
  0xa0   : > { %10330 = vmatprep.mubr.bf16.mxu0 %v12282_v4  ;;  %10363 = vmatpush3.bf16.msra.mxu0 %v11714_v1  ;;  %v1151_v1 = vrot.slane %v12339_v63, 1 }
  0xa1   : > { %10364 = vmatprep.subr.bf16.mxu0 %v11715_v49 }
  0xa2   : > { %v12358_v23 = vsel %vm1116_vm1, %v1150_v0, %v1151_v1  ;;  %v1159_v0 = vrot.slane %v12236_v39, 1 }
  0xa3   : > { %14843 = vst [vmem:[#allocation3_spill] sm:$0xff] %v12358_v23 }
  0xa4   : > { %10365 = vmatpush3.bf16.msra.mxu0 %v11715_v49  ;;  %v476_v49 = vshrl.u32 %v12203_v11, 16 }
  0xa5   : > { %10366 = vmatprep.subr.bf16.mxu0 %v11716_v14 }
  0xa7   : > { %10331 = vmatmul.mubr.bf16.gmra.mrb[8].mxu0 %v12298_v16 }
  0xa8   : > { %10334 = vmatprep.mubr.bf16.mxu0 %v12301_v17  ;;  %10367 = vmatpush3.bf16.msra.mxu0 %v11716_v14  ;;  %v303_v14 = vld [vmem:[%s12015_s6 + $0x148] sm:$0x3] }
  0xa9   : > { %10368 = vmatprep.subr.bf16.mxu0 %v11717_v19  ;;  %v12360_v25 = vpack.c.bf16 %v303_v14, %v303_v14 }
  0xab   : > { %v1157_v52 = vrot.slane %v12360_v25, 1 }
  0xac   : > { %10369 = vmatpush3.bf16.msra.mxu0 %v11717_v19  ;;  %v480_v19 = vrot.slane %v478_v55, 1  ;;  %v492_v55 = vrot.slane %v490_v46, 1 }
  0xad   : > { %10370 = vmatprep.subr.bf16.mxu0 %v11718_v33 }
  0xae   : > { %v481_v27 = vor.u32 %v480_v19, %v476_v49  ;;  %v309_v49 = vld [vmem:[%s12015_s6 + $0x178] sm:$0x3] }
  0xaf   : > { %10335 = vmatmul.mubr.bf16.gmra.mrb[12].mxu0 %v12317_v37  ;;  %v12386_v19 = vpack.c.bf16 %v309_v49, %v309_v49  ;;  %v1166_v49 = vrot.slane %v12391_v43, 1 }
  0xb0   : > { %10338 = vmatprep.mubr.bf16.mxu0 %v12320_v40  ;;  %10371 = vmatpush3.bf16.msra.mxu0 %v11718_v33  ;;  %v12365_v33 = vpack.c.bf16 %v306_v15, %v306_v15  ;;  %v12368_v13 = vsel %vm378_vm0, %v481_v27, %v485_v22  ;;  %v12384_v15 = vsel %vm1116_vm1, %v1156_v36, %v1157_v52  ;;  %v1162_v36 = vrot.slane %v12245_v50, 1 }
  0xb1   : > { %10372 = vmatprep.subr.bf16.mxu0 %v11719_v45  ;;  %10234 = vmatprep.mubr.bf16.mxu1 %v12368_v13  ;;  %14845 = vst [vmem:[#allocation5_spill] sm:$0xff] %v12384_v15  ;;  %v505_v22 = vor.u32 %v504_v42, %v500_v54  ;;  %v519_v52 = vshll.u32 %v12339_v63, 16  ;;  %v1163_v54 = vrot.slane %v12386_v19, 1  ;;  %v528_v63 = vrot.slane %v526_v61, 1 }
  0xb2   : > { %v1160_v1 = vrot.slane %v12365_v33, 1  ;;  %v555_v61 = vshll.u32 %v12365_v33, 16  ;;  %v560_v33 = vshrl.u32 %v12245_v50, 16 }
  0xb3   : > { %v12397_v46 = vsel %vm378_vm0, %v505_v22, %v509_v8  ;;  %v521_v9 = vrot.slane %v519_v52, 1  ;;  %v543_v52 = vshll.u32 %v12360_v25, 16 }
  0xb4   : > { %10373 = vmatpush3.bf16.msra.mxu0 %v11719_v45  ;;  %v488_v45 = vshrl.u32 %v12214_v18, 16  ;;  %v12389_v27 = vsel %vm1116_vm1, %v1159_v0, %v1160_v1  ;;  %v531_v0 = vshll.u32 %v12344_v12, 16  ;;  %v1165_v1 = vrot.slane %v12247_v51, 1 }
  0xb5   : > { %10410 = vmatprep.subr.bf16.mxu0 %v12333_v58  ;;  %14846 = vst [vmem:[#allocation6_spill] sm:$0xff] %v12389_v27 }
  0xb6   : > { %v493_v14 = vor.u32 %v492_v55, %v488_v45  ;;  %v512_v45 = vshrl.u32 %v12224_v30, 16  ;;  %v315_v55 = vld [vmem:[%s12015_s6 + $0x1a8] sm:$0x3]  ;;  %v533_v42 = vrot.slane %v531_v0, 1 }
  0xb7   : > { %10339 = vmatmul.mubr.bf16.gmra.mrb[16].mxu0 %v12337_v26  ;;  %v357_v22 = vpack.c.bf16 %v315_v55, %v315_v55  ;;  %v557_v55 = vrot.slane %v555_v61, 1 }
  0xb8   : > { %10342 = vmatprep.mubr.bf16.mxu0 %v12342_v29 }
  0xbf   : > { %10343 = vmatmul.mubr.bf16.gmra.mrb[20].mxu0 %v12358_v23 }
  0xc0   : > { %10346 = vmatprep.mubr.bf16.mxu0 %v12363_v32  ;;  %v12394_v32 = vsel %vm378_vm0, %v493_v14, %v497_v6  ;;  %v516_v6 = vrot.slane %v514_v48, 1  ;;  %v12415_v14 = vsel %vm1116_vm1, %v1162_v36, %v1163_v54  ;;  %v536_v36 = vshrl.u32 %v12234_v38, 16 }
  0xc1   : > { %10235 = vmatmul.mubr.bf16.vlgmr.msra.gmra.mrb[0].mxu1 %v12394_v32  ;;  %v538_v48 = vshll.u32 %v12234_v38, 16  ;;  %v1169_v54 = vrot.slane %v357_v22, 1 }
  0xc2   : > { %10238 = vmatprep.mubr.bf16.mxu1 %v12397_v46  ;;  %v517_v8 = vor.u32 %v516_v6, %v512_v45  ;;  %v1168_v45 = vrot.slane %v12254_v57, 1 }
  0xc3   : > { %v540_v0 = vrot.slane %v538_v48, 1  ;;  %v574_v48 = vshll.u32 %v12247_v51, 16 }
  0xc4   : > { %v12421_v12 = vsel %vm378_vm0, %v517_v8, %v521_v9  ;;  %v12438_v9 = vsel %vm1116_vm1, %v1168_v45, %v1169_v54  ;;  %v562_v8 = vshll.u32 %v12245_v50, 16  ;;  %v572_v45 = vshrl.u32 %v12247_v51, 16 }
  0xc5   : > { %v541_v6 = vor.u32 %v540_v0, %v536_v36  ;;  %v567_v36 = vshll.u32 %v12386_v19, 16  ;;  %v11721_v19 = vld [vmem:[%s14775_s1 + $0x108] sm:$0xff]  }
  0xc6   : > { %v564_v54 = vrot.slane %v562_v8, 1 }
  0xc7   : > { %10347 = vmatmul.mubr.bf16.gmra.mrb[24].mxu0 %v12384_v15  ;;  %v12418_v15 = vsel %vm1116_vm1, %v1165_v1, %v1166_v49  ;;  %v545_v1 = vrot.slane %v543_v52, 1  ;;  %v579_v52 = vshll.u32 %v12391_v43, 16  ;;  %v584_v43 = vshrl.u32 %v12254_v57, 16 }
  0xc8   : > { %10350 = vmatprep.mubr.bf16.mxu0 %v12389_v27  ;;  %v529_v27 = vor.u32 %v528_v63, %v524_v56  ;;  %v550_v56 = vshll.u32 %v12236_v39, 16  ;;  %v565_v0 = vor.u32 %v564_v54, %v560_v33  ;;  %v11727_v54 = vld [vmem:[%s14775_s1 + $0x138] sm:$0xff]  }
  0xc9   : > { %10239 = vmatmul.mubr.bf16.gmra.mrb[4].mxu1 %v12421_v12  ;;  %v12441_v63 = vsel %vm378_vm0, %v541_v6, %v545_v1  ;;  %v581_v61 = vrot.slane %v579_v52, 1  ;;  %v591_v6 = vshll.u32 %v357_v22, 16  ;;  %v11723_v22 = vld [vmem:[%s14775_s1 + $0x118] sm:$0xff]   ;;  %v11726_v52 = vld [vmem:[%s14775_s1 + $0x130] sm:$0xff]  }
  0xca   : > { %v12424_v23 = vsel %vm378_vm0, %v529_v27, %v533_v42  ;;  %v548_v27 = vshrl.u32 %v12236_v39, 16  ;;  %v552_v49 = vrot.slane %v550_v56, 1  ;;  %v576_v56 = vrot.slane %v574_v48, 1  ;;  %v11725_v48 = vld [vmem:[%s14775_s1 + $0x128] sm:$0xff]  }
  0xcb   : > { %10242 = vmatprep.mubr.bf16.mxu1 %v12424_v23  ;;  %v593_v8 = vrot.slane %v591_v6, 1  ;;  %v11734_v6 = vld [vmem:[%s14775_s1 + $0x170] sm:$0xff]  }
  0xcc   : > { %v553_v25 = vor.u32 %v552_v49, %v548_v27  ;;  %v569_v27 = vrot.slane %v567_v36, 1  ;;  %v577_v1 = vor.u32 %v576_v56, %v572_v45  ;;  %v316_v56 = vld [vmem:[%s12015_s6 + $0x1b0] sm:$0xff] }
  0xce   : > { %v12444_v42 = vsel %vm378_vm0, %v553_v25, %v557_v55  ;;  %v12460_v49 = vsel %vm378_vm0, %v565_v0, %v569_v27  ;;  %v586_v55 = vshll.u32 %v12254_v57, 16  ;;  %v11722_v25 = vld [vmem:[%s14775_s1 + $0x110] sm:$0xff]   ;;  %v11728_v27 = vld [vmem:[%s14775_s1 + $0x140] sm:$0xff]  }
  0xcf   : > { %10351 = vmatmul.mubr.bf16.gmra.mrb[28].mxu0 %v12415_v14 }
  0xd0   : > { %10354 = vmatprep.mubr.bf16.mxu0 %v12418_v15  ;;  %v588_v33 = vrot.slane %v586_v55, 1  ;;  %v11733_v55 = vld [vmem:[%s14775_s1 + $0x168] sm:$0xff]  }
  0xd1   : > { %10243 = vmatmul.mubr.bf16.gmra.mrb[8].mxu1 %v12441_v63 }
  0xd2   : > { %10246 = vmatprep.mubr.bf16.mxu1 %v12444_v42  ;;  %v589_v36 = vor.u32 %v588_v33, %v584_v43  ;;  %v11732_v43 = vld [vmem:[%s14775_s1 + $0x160] sm:$0xff]  }
  0xd3   : > { %v11736_v33 = vld [vmem:[%s14775_s1 + $0x180] sm:$0xff]  }
  0xd4   : > { %v12479_v45 = vsel %vm378_vm0, %v589_v36, %v593_v8  ;;  %v318_v8 = vld [vmem:[%s12015_s6 + $0x1c0] sm:$0x3] }
  0xd5   : > { %v359_v36 = vpack.c.bf16 %v318_v8, %v318_v8  ;;  %v14849_v8 = vld [vmem:[#allocation5_spill] sm:$0xff] }
  0xd7   : > { %10355 = vmatmul.mubr.bf16.gmra.mrb[32].mxu0 %v12438_v9 }
  0xd8   : > { %10374 = vmatprep.mubr.bf16.mxu0 %v12038_v20  ;;  %v12463_v20 = vsel %vm378_vm0, %v577_v1, %v581_v61  ;;  %v317_v61 = vld [vmem:[%s12015_s6 + $0x1b8] sm:$0xff]  ;;  %v11729_v1 = vld [vmem:[%s14775_s1 + $0x148] sm:$0xff]  }
  0xd9   : > { %10247 = vmatmul.mubr.bf16.gmra.mrb[12].mxu1 %v12460_v49  ;;  %v12513_v0 = vpack.c.bf16 %v317_v61, %v316_v56  ;;  %v11737_v61 = vld [vmem:[%s14775_s1 + $0x188] sm:$0xff]  }
  0xda   : > { %10250 = vmatprep.mubr.bf16.mxu1 %v12463_v20 }
  0xdf   : > { %10375 = vmatmul.mubr.bf16.vlgmr.msra.gmra.mrb[0].mxu0 %v12044_v24 }
  0xe0   : > { %10411 = vmatpush3.bf16.msra.mxu0 %v12333_v58  ;;  %10378 = vmatprep.mubr.bf16.mxu0 %v12067_v41  ;;  %v11724_v58 = vld [vmem:[%s14775_s1 + $0x120] sm:$0xff]  }
  0xe1   : > { %10412 = vmatprep.subr.bf16.mxu0 %v11721_v19  ;;  %10251 = vmatmul.mubr.bf16.gmra.mrb[16].mxu1 %v12479_v45 }
  0xe4   : > { %10413 = vmatpush3.bf16.msra.mxu0 %v11721_v19  ;;  %v11730_v19 = vld [vmem:[%s14775_s1 + $0x150] sm:$0xff]  }
  0xe5   : > { %10414 = vmatprep.subr.bf16.mxu0 %v11722_v25 }
  0xe7   : > { %10379 = vmatmul.mubr.bf16.gmra.mrb[4].mxu0 %v12070_v44 }
  0xe8   : > { %10382 = vmatprep.mubr.bf16.mxu0 %v12097_v3  ;;  %10415 = vmatpush3.bf16.msra.mxu0 %v11722_v25  ;;  %v11735_v25 = vld [vmem:[%s14775_s1 + $0x178] sm:$0xff]  }
  0xe9   : > { %10416 = vmatprep.subr.bf16.mxu0 %v11723_v22 }
  0xec   : > { %10417 = vmatpush3.bf16.msra.mxu0 %v11723_v22  ;;  %v1748_v22 = vshll.u32 %v12513_v0, 16 }
  0xed   : > { %10418 = vmatprep.subr.bf16.mxu0 %v11724_v58 }
  0xef   : > { %10383 = vmatmul.mubr.bf16.gmra.mrb[8].mxu0 %v12104_v10 }
  0xf0   : > { %10386 = vmatprep.mubr.bf16.mxu0 %v12133_v34  ;;  %10419 = vmatpush3.bf16.msra.mxu0 %v11724_v58  ;;  %v1746_v58 = vshrl.u32 %v12513_v0, 16 }
  0xf1   : > { %10420 = vmatprep.subr.bf16.mxu0 %v11725_v48 }
  0xf4   : > { %10421 = vmatpush3.bf16.msra.mxu0 %v11725_v48  ;;  %v1750_v48 = vrot.slane %v1748_v22, 1  ;;  %v14850_v22 = vld [vmem:[#allocation6_spill] sm:$0xff] }
  0xf5   : > { %10422 = vmatprep.subr.bf16.mxu0 %v11726_v52 }
  0xf7   : > { %10387 = vmatmul.mubr.bf16.gmra.mrb[12].mxu0 %v12203_v11 }
  0xf8   : > { %10390 = vmatprep.mubr.bf16.mxu0 %v12214_v18  ;;  %10423 = vmatpush3.bf16.msra.mxu0 %v11726_v52  ;;  %v1753_v52 = vshll.u32 %v359_v36, 16 }
  0xf9   : > { %10424 = vmatprep.subr.bf16.mxu0 %v11727_v54 }
  0xfc   : > { %10425 = vmatpush3.bf16.msra.mxu0 %v11727_v54  ;;  %v1751_v54 = vor.u32 %v1750_v48, %v1746_v58  ;;  %v2038_v58 = vrot.slane %v12513_v0, 1  ;;  %v2039_v48 = vrot.slane %v359_v36, 1  ;;  %v11746_v36 = vld [vmem:[%s14775_s1 + $0x1d0] sm:$0xff]  }
  0xfd   : > { %10462 = vmatprep.subr.bf16.mxu0 %v11728_v27 }
  0xff   : > { %10391 = vmatmul.mubr.bf16.gmra.mrb[16].mxu0 %v12216_v21 }
 0x100   : > { %10394 = vmatprep.mubr.bf16.mxu0 %v12224_v30 }
 0x107   : > { %10395 = vmatmul.mubr.bf16.gmra.mrb[20].mxu0 %v12226_v31 }
 0x108   : > { %10398 = vmatprep.mubr.bf16.mxu0 %v12234_v38 }
 0x10f   : > { %10399 = vmatmul.mubr.bf16.gmra.mrb[24].mxu0 %v12236_v39 }
 0x110   : > { %10402 = vmatprep.mubr.bf16.mxu0 %v12245_v50 }
 0x117   : > { %10403 = vmatmul.mubr.bf16.gmra.mrb[28].mxu0 %v12247_v51 }
 0x118   : > { %10406 = vmatprep.mubr.bf16.mxu0 %v12254_v57 }
 0x11f   : > { %10407 = vmatmul.mubr.bf16.gmra.mrb[32].mxu0 %v12513_v0 }
 0x120   : > { %10426 = vmatprep.mubr.bf16.mxu0 %v12088_v60  ;;  %v11731_v60 = vld [vmem:[%s14775_s1 + $0x158] sm:$0xff]  }
 0x127   : > { %10427 = vmatmul.mubr.bf16.vlgmr.msra.gmra.mrb[0].mxu0 %v12101_v5 }
 0x128   : > { %10463 = vmatpush3.bf16.msra.mxu0 %v11728_v27  ;;  %10430 = vmatprep.mubr.bf16.mxu0 %v12126_v28  ;;  %v1755_v27 = vrot.slane %v1753_v52, 1  ;;  %v12607_v52 = vsel %vm1116_vm1, %v2038_v58, %v2039_v48 }
 0x129   : > { %10464 = vmatprep.subr.bf16.mxu0 %v11729_v1 }
 0x12a   : > { %v12561_v56 = vsel %vm378_vm0, %v1751_v54, %v1755_v27  ;;  %v11745_v54 = vld [vmem:[%s14775_s1 + $0x1c8] sm:$0xff]   ;;  %v11768_v27 = vld [vmem:[%s14777_s3] sm:$0xff]  }
 0x12c   : > { %10465 = vmatpush3.bf16.msra.mxu0 %v11729_v1  ;;  %v11738_v1 = vld [vmem:[%s14775_s1 + $0x190] sm:$0xff]  }
 0x12d   : > { %10466 = vmatprep.subr.bf16.mxu0 %v11730_v19 }
 0x12f   : > { %10431 = vmatmul.mubr.bf16.gmra.mrb[4].mxu0 %v12136_v35 }
 0x130   : > { %10434 = vmatprep.mubr.bf16.mxu0 %v12148_v47  ;;  %10467 = vmatpush3.bf16.msra.mxu0 %v11730_v19  ;;  %v11740_v19 = vld [vmem:[%s14775_s1 + $0x1a0] sm:$0xff]  }
 0x131   : > { %10468 = vmatprep.subr.bf16.mxu0 %v11731_v60 }
 0x134   : > { %10469 = vmatpush3.bf16.msra.mxu0 %v11731_v60  ;;  %v11741_v60 = vld [vmem:[%s14775_s1 + $0x1a8] sm:$0xff]  }
 0x135   : > { %10470 = vmatprep.subr.bf16.mxu0 %v11732_v43 }
 0x137   : > { %10435 = vmatmul.mubr.bf16.gmra.mrb[8].mxu0 %v12156_v53 }
 0x138   : > { %10438 = vmatprep.mubr.bf16.mxu0 %v12167_v59  ;;  %10471 = vmatpush3.bf16.msra.mxu0 %v11732_v43  ;;  %v11742_v43 = vld [vmem:[%s14775_s1 + $0x1b0] sm:$0xff]  }
 0x139   : > { %10472 = vmatprep.subr.bf16.mxu0 %v11733_v55 }
 0x13c   : > { %10473 = vmatpush3.bf16.msra.mxu0 %v11733_v55  ;;  %v11743_v55 = vld [vmem:[%s14775_s1 + $0x1b8] sm:$0xff]  }
 0x13d   : > { %10474 = vmatprep.subr.bf16.mxu0 %v11734_v6 }
 0x13f   : > { %10439 = vmatmul.mubr.bf16.gmra.mrb[12].mxu0 %v12368_v13 }
 0x140   : > { %10442 = vmatprep.mubr.bf16.mxu0 %v12394_v32  ;;  %10475 = vmatpush3.bf16.msra.mxu0 %v11734_v6  ;;  %v11744_v6 = vld [vmem:[%s14775_s1 + $0x1c0] sm:$0xff]  }
 0x141   : > { %10476 = vmatprep.subr.bf16.mxu0 %v11735_v25 }
 0x144   : > { %10477 = vmatpush3.bf16.msra.mxu0 %v11735_v25  ;;  %v14847_v25 = vld [vmem:[#allocation3_spill] sm:$0xff] }
 0x145   : > { %10514 = vmatprep.subr.bf16.mxu0 %v11736_v33 }
 0x147   : > { %10443 = vmatmul.mubr.bf16.gmra.mrb[16].mxu0 %v12397_v46 }
 0x148   : > { %10446 = vmatprep.mubr.bf16.mxu0 %v12421_v12 }
 0x14f   : > { %10447 = vmatmul.mubr.bf16.gmra.mrb[20].mxu0 %v12424_v23 }
 0x150   : > { %10450 = vmatprep.mubr.bf16.mxu0 %v12441_v63 }
 0x157   : > { %10451 = vmatmul.mubr.bf16.gmra.mrb[24].mxu0 %v12444_v42 }
 0x158   : > { %10454 = vmatprep.mubr.bf16.mxu0 %v12460_v49 }
 0x15f   : > { %10455 = vmatmul.mubr.bf16.gmra.mrb[28].mxu0 %v12463_v20 }
 0x160   : > { %10458 = vmatprep.mubr.bf16.mxu0 %v12479_v45 }
 0x167   : > { %10459 = vmatmul.mubr.bf16.gmra.mrb[32].mxu0 %v12561_v56 }
 0x168   : > { %10478 = vmatprep.mubr.bf16.mxu0 %v12261_v62  ;;  %v11739_v62 = vld [vmem:[%s14775_s1 + $0x198] sm:$0xff]  }
 0x16f   : > { %10479 = vmatmul.mubr.bf16.vlgmr.msra.gmra.mrb[0].mxu0 %v12264_v7 }
 0x170   : > { %10515 = vmatpush3.bf16.msra.mxu0 %v11736_v33  ;;  %10482 = vmatprep.mubr.bf16.mxu0 %v12279_v2  ;;  %v14848_v33 = vld [vmem:[#allocation4_spill] sm:$0xff] }
 0x171   : > { %10516 = vmatprep.subr.bf16.mxu0 %v11737_v61 }
 0x174   : > { %10517 = vmatpush3.bf16.msra.mxu0 %v11737_v61 }
 0x175   : > { %10518 = vmatprep.subr.bf16.mxu0 %v11738_v1 }
 0x177   : > { %10483 = vmatmul.mubr.bf16.gmra.mrb[4].mxu0 %v12282_v4 }
 0x178   : > { %10486 = vmatprep.mubr.bf16.mxu0 %v12298_v16  ;;  %10519 = vmatpush3.bf16.msra.mxu0 %v11738_v1 }
 0x179   : > { %10520 = vmatprep.subr.bf16.mxu0 %v11739_v62 }
 0x17c   : > { %10521 = vmatpush3.bf16.msra.mxu0 %v11739_v62 }
 0x17d   : > { %10522 = vmatprep.subr.bf16.mxu0 %v11740_v19 }
 0x17f   : > { %10487 = vmatmul.mubr.bf16.gmra.mrb[8].mxu0 %v12301_v17 }
 0x180   : > { %10490 = vmatprep.mubr.bf16.mxu0 %v12317_v37  ;;  %10523 = vmatpush3.bf16.msra.mxu0 %v11740_v19 }
 0x181   : > { %10524 = vmatprep.subr.bf16.mxu0 %v11741_v60 }
 0x184   : > { %10525 = vmatpush3.bf16.msra.mxu0 %v11741_v60 }
 0x185   : > { %10526 = vmatprep.subr.bf16.mxu0 %v11742_v43 }
 0x187   : > { %10491 = vmatmul.mubr.bf16.gmra.mrb[12].mxu0 %v12320_v40 }
 0x188   : > { %10494 = vmatprep.mubr.bf16.mxu0 %v12337_v26  ;;  %10527 = vmatpush3.bf16.msra.mxu0 %v11742_v43 }
 0x189   : > { %10528 = vmatprep.subr.bf16.mxu0 %v11743_v55 }
 0x18c   : > { %10529 = vmatpush3.bf16.msra.mxu0 %v11743_v55  ;;  %v12779_v55 = vld [vmem:[%s14776_s2] ss:$0 sm:$0xff] }
 0x18d   : > { %10566 = vmatprep.subr.bf16.mxu0 %v11744_v6 }
 0x18f   : > { %10495 = vmatmul.mubr.bf16.gmra.mrb[16].mxu0 %v12342_v29 }
 0x190   : > { %10498 = vmatprep.mubr.bf16.mxu0 %v14847_v25 }
 0x197   : > { %10499 = vmatmul.mubr.bf16.gmra.mrb[20].mxu0 %v14848_v33 }
 0x198   : > { %10502 = vmatprep.mubr.bf16.mxu0 %v14849_v8 }
 0x19f   : > { %10503 = vmatmul.mubr.bf16.gmra.mrb[24].mxu0 %v14850_v22 }
 0x1a0   : > { %10506 = vmatprep.mubr.bf16.mxu0 %v12415_v14 }
 0x1a7   : > { %10507 = vmatmul.mubr.bf16.gmra.mrb[28].mxu0 %v12418_v15 }
 0x1a8   : > { %10510 = vmatprep.mubr.bf16.mxu0 %v12438_v9 }
 0x1af   : > { %10511 = vmatmul.mubr.bf16.gmra.mrb[32].mxu0 %v12607_v52 }
 0x1b0   : > { %10530 = vmatprep.mubr.bf16.mxu0 %v12044_v24  ;;  %v11747_v24 = vld [vmem:[%s14775_s1 + $0x1d8] sm:$0xff]  }
 0x1b7   : > { %10531 = vmatmul.mubr.bf16.vlgmr.msra.gmra.mrb[0].mxu0 %v12067_v41  ;;  %v11748_v41 = vld [vmem:[%s14775_s1 + $0x1e0] sm:$0xff]  }
 0x1b8   : > { %10567 = vmatpush3.bf16.msra.mxu0 %v11744_v6  ;;  %10534 = vmatprep.mubr.bf16.mxu0 %v12070_v44  ;;  %v11749_v44 = vld [vmem:[%s14775_s1 + $0x1e8] sm:$0xff]  }
 0x1b9   : > { %10568 = vmatprep.subr.bf16.mxu0 %v11745_v54 }
 0x1bc   : > { %10569 = vmatpush3.bf16.msra.mxu0 %v11745_v54 }
 0x1bd   : > { %10570 = vmatprep.subr.bf16.mxu0 %v11746_v36 }
 0x1bf   : > { %10535 = vmatmul.mubr.bf16.gmra.mrb[4].mxu0 %v12097_v3  ;;  %v11750_v3 = vld [vmem:[%s14775_s1 + $0x1f0] sm:$0xff]  }
 0x1c0   : > { %10538 = vmatprep.mubr.bf16.mxu0 %v12104_v10  ;;  %10571 = vmatpush3.bf16.msra.mxu0 %v11746_v36  ;;  %v11751_v10 = vld [vmem:[%s14775_s1 + $0x1f8] sm:$0xff]  }
 0x1c1   : > { %10572 = vmatprep.subr.bf16.mxu0 %v11747_v24 }
 0x1c4   : > { %10573 = vmatpush3.bf16.msra.mxu0 %v11747_v24 }
 0x1c5   : > { %10574 = vmatprep.subr.bf16.mxu0 %v11748_v41 }
 0x1c7   : > { %10539 = vmatmul.mubr.bf16.gmra.mrb[8].mxu0 %v12133_v34  ;;  %v11752_v34 = vld [vmem:[%s14775_s1 + $0x200] sm:$0xff]  }
 0x1c8   : > { %10542 = vmatprep.mubr.bf16.mxu0 %v12203_v11  ;;  %10575 = vmatpush3.bf16.msra.mxu0 %v11748_v41  ;;  %v319_v11 = vld [vmem:[%s12015_s6 + $0x1c8] sm:$0xff] }
 0x1c9   : > { %10576 = vmatprep.subr.bf16.mxu0 %v11749_v44 }
 0x1cc   : > { %10577 = vmatpush3.bf16.msra.mxu0 %v11749_v44 }
 0x1cd   : > { %10578 = vmatprep.subr.bf16.mxu0 %v11750_v3 }
 0x1cf   : > { %10543 = vmatmul.mubr.bf16.gmra.mrb[12].mxu0 %v12214_v18  ;;  %v320_v18 = vld [vmem:[%s12015_s6 + $0x1d0] sm:$0xff] }
 0x1d0   : > { %10546 = vmatprep.mubr.bf16.mxu0 %v12216_v21  ;;  %10579 = vmatpush3.bf16.msra.mxu0 %v11750_v3  ;;  %v12653_v21 = vpack.c.bf16 %v320_v18, %v319_v11 }
 0x1d1   : > { %10580 = vmatprep.subr.bf16.mxu0 %v11751_v10 }
 0x1d4   : > { %10581 = vmatpush3.bf16.msra.mxu0 %v11751_v10 }
 0x1d5   : > { %10618 = vmatprep.subr.bf16.mxu0 %v11752_v34 }
 0x1d7   : > { %10547 = vmatmul.mubr.bf16.gmra.mrb[16].mxu0 %v12224_v30  ;;  %v11753_v30 = vld [vmem:[%s14775_s1 + $0x208] sm:$0xff]  }
 0x1d8   : > { %10550 = vmatprep.mubr.bf16.mxu0 %v12226_v31  ;;  %v11754_v31 = vld [vmem:[%s14775_s1 + $0x210] sm:$0xff]  }
 0x1df   : > { %10551 = vmatmul.mubr.bf16.gmra.mrb[20].mxu0 %v12234_v38 }
 0x1e0   : > { %10554 = vmatprep.mubr.bf16.mxu0 %v12236_v39  ;;  %v2601_v39 = vshll.u32 %v12653_v21, 16 }
 0x1e7   : > { %10555 = vmatmul.mubr.bf16.gmra.mrb[24].mxu0 %v12245_v50  ;;  %v2599_v50 = vshrl.u32 %v12653_v21, 16 }
 0x1e8   : > { %10558 = vmatprep.mubr.bf16.mxu0 %v12247_v51  ;;  %v2603_v51 = vrot.slane %v2601_v39, 1 }
 0x1ef   : > { %10559 = vmatmul.mubr.bf16.gmra.mrb[28].mxu0 %v12254_v57 }
 0x1f0   : > { %10562 = vmatprep.mubr.bf16.mxu0 %v12513_v0 }
 0x1f7   : > { %10563 = vmatmul.mubr.bf16.gmra.mrb[32].mxu0 %v12653_v21 }
 0x1f8   : > { %10582 = vmatprep.mubr.bf16.mxu0 %v12101_v5  ;;  %v11755_v5 = vld [vmem:[%s14775_s1 + $0x218] sm:$0xff]  }
 0x1ff   : > { %10583 = vmatmul.mubr.bf16.vlgmr.msra.gmra.mrb[0].mxu0 %v12126_v28  ;;  %v11756_v28 = vld [vmem:[%s14775_s1 + $0x220] sm:$0xff]  }
 0x200   : > { %10619 = vmatpush3.bf16.msra.mxu0 %v11752_v34  ;;  %10586 = vmatprep.mubr.bf16.mxu0 %v12136_v35  ;;  %v11757_v35 = vld [vmem:[%s14775_s1 + $0x228] sm:$0xff]  }
 0x201   : > { %10620 = vmatprep.subr.bf16.mxu0 %v11753_v30 }
 0x204   : > { %10621 = vmatpush3.bf16.msra.mxu0 %v11753_v30 }
 0x205   : > { %10622 = vmatprep.subr.bf16.mxu0 %v11754_v31 }
 0x207   : > { %10587 = vmatmul.mubr.bf16.gmra.mrb[4].mxu0 %v12148_v47  ;;  %v11758_v47 = vld [vmem:[%s14775_s1 + $0x230] sm:$0xff]  }
 0x208   : > { %10590 = vmatprep.mubr.bf16.mxu0 %v12156_v53  ;;  %10623 = vmatpush3.bf16.msra.mxu0 %v11754_v31  ;;  %v11759_v53 = vld [vmem:[%s14775_s1 + $0x238] sm:$0xff]  }
 0x209   : > { %10624 = vmatprep.subr.bf16.mxu0 %v11755_v5 }
 0x20c   : > { %10625 = vmatpush3.bf16.msra.mxu0 %v11755_v5 }
 0x20d   : > { %10626 = vmatprep.subr.bf16.mxu0 %v11756_v28 }
 0x20f   : > { %10591 = vmatmul.mubr.bf16.gmra.mrb[8].mxu0 %v12167_v59  ;;  %v321_v59 = vld [vmem:[%s12015_s6 + $0x1d8] sm:$0x3] }
 0x210   : > { %10594 = vmatprep.mubr.bf16.mxu0 %v12368_v13  ;;  %10627 = vmatpush3.bf16.msra.mxu0 %v11756_v28  ;;  %v361_v38 = vpack.c.bf16 %v321_v59, %v321_v59 }
 0x211   : > { %10628 = vmatprep.subr.bf16.mxu0 %v11757_v35 }
 0x212   : > { %v2606_v57 = vshll.u32 %v361_v38, 16 }
 0x214   : > { %10629 = vmatpush3.bf16.msra.mxu0 %v11757_v35  ;;  %v3735_v35 = vld [vmem:[#allocation2 + $0xc] sm:$0xf] }
 0x215   : > { %10630 = vmatprep.subr.bf16.mxu0 %v11758_v47 }
 0x217   : > { %10595 = vmatmul.mubr.bf16.gmra.mrb[12].mxu0 %v12394_v32  ;;  %v2608_v32 = vrot.slane %v2606_v57, 1 }
 0x218   : > { %10598 = vmatprep.mubr.bf16.mxu0 %v12397_v46  ;;  %10631 = vmatpush3.bf16.msra.mxu0 %v11758_v47  ;;  %v11765_v46 = vld [vmem:[%s14777_s3 + $0x68] sm:$0xff]  }
 0x219   : > { %10632 = vmatprep.subr.bf16.mxu0 %v11759_v53 }
 0x21c   : > { %10633 = vmatpush3.bf16.msra.mxu0 %v11759_v53 }
 0x21f   : > { %10599 = vmatmul.mubr.bf16.gmra.mrb[16].mxu0 %v12421_v12 }
 0x220   : > { %10602 = vmatprep.mubr.bf16.mxu0 %v12424_v23  ;;  %v2604_v23 = vor.u32 %v2603_v51, %v2599_v50 }
 0x222   : > { %v2609_v13 = vsel %vm378_vm0, %v2604_v23, %v2608_v32  ;;  %vm13424_vm0 = vmor %vm5068_vm14, %vm5069_vm15 }
 0x227   : > { %10603 = vmatmul.mubr.bf16.gmra.mrb[20].mxu0 %v12441_v63 }
 0x228   : > { %10606 = vmatprep.mubr.bf16.mxu0 %v12444_v42 }
 0x22f   : > { %10607 = vmatmul.mubr.bf16.gmra.mrb[24].mxu0 %v12460_v49 }
 0x230   : > { %10610 = vmatprep.mubr.bf16.mxu0 %v12463_v20  ;;  %v11767_v20 = vld [vmem:[%s14777_s3 + $0x78] sm:$0xff]  }
 0x237   : > { %10611 = vmatmul.mubr.bf16.gmra.mrb[28].mxu0 %v12479_v45 }
 0x238   : > { %10614 = vmatprep.mubr.bf16.mxu0 %v12561_v56 }
 0x23f   : > { %10615 = vmatmul.mubr.bf16.gmra.mrb[32].mxu0 %v2609_v13 }
 0x240   : > { %10634 = vmatprep.mubr.bf16.mxu0 %v12264_v7  ;;  %v2891_v7 = vrot.slane %v12653_v21, 1 }
 0x247   : > { %10635 = vmatmul.mubr.bf16.vlgmr.msra.gmra.mrb[0].mxu0 %v12279_v2  ;;  %v2892_v2 = vrot.slane %v361_v38, 1 }
 0x248   : > { %10638 = vmatprep.mubr.bf16.mxu0 %v12282_v4 }
 0x249   : > { %v2893_v4 = vsel %vm1116_vm1, %v2891_v7, %v2892_v2 }
 0x24f   : > { %10639 = vmatmul.mubr.bf16.gmra.mrb[4].mxu0 %v12298_v16  ;;  %v11760_v16 = vld [vmem:[%s14777_s3 + $0x40] sm:$0xff]  }
 0x250   : > { %10642 = vmatprep.mubr.bf16.mxu0 %v12301_v17  ;;  %10670 = vmatprep.subr.bf16.mxu1 %v11760_v16  ;;  %v11761_v17 = vld [vmem:[%s14777_s3 + $0x48] sm:$0xff]  }
 0x251   : > { %10671 = vmatpush3.bf16.msra.mxu1 %v11760_v16  ;;  %v3726_v16 = vld [vmem:[#allocation2] sm:$0xf] }
 0x252   : > { %10672 = vmatprep.subr.bf16.mxu1 %v11761_v17 }
 0x255   : > { %10673 = vmatpush3.bf16.msra.mxu1 %v11761_v17 }
 0x257   : > { %10643 = vmatmul.mubr.bf16.gmra.mrb[8].mxu0 %v12317_v37  ;;  %v11762_v37 = vld [vmem:[%s14777_s3 + $0x50] sm:$0xff]  }
 0x258   : > { %10646 = vmatprep.mubr.bf16.mxu0 %v12320_v40  ;;  %10674 = vmatprep.subr.bf16.mxu1 %v11762_v37  ;;  %v11763_v40 = vld [vmem:[%s14777_s3 + $0x58] sm:$0xff]  }
 0x259   : > { %10675 = vmatpush3.bf16.msra.mxu1 %v11762_v37 }
 0x25a   : > { %10676 = vmatprep.subr.bf16.mxu1 %v11763_v40 }
 0x25d   : > { %10677 = vmatpush3.bf16.msra.mxu1 %v11763_v40 }
 0x25f   : > { %10647 = vmatmul.mubr.bf16.gmra.mrb[12].mxu0 %v12337_v26  ;;  %v11764_v26 = vld [vmem:[%s14777_s3 + $0x60] sm:$0xff]  }
 0x260   : > { %10650 = vmatprep.mubr.bf16.mxu0 %v12342_v29  ;;  %10678 = vmatprep.subr.bf16.mxu1 %v11764_v26  ;;  %v12732_v29 = vpop.f32.mrb[0].mxu1 }
 0x261   : > { %10679 = vmatpush3.bf16.msra.mxu1 %v11764_v26 }
 0x262   : > { %10680 = vmatprep.subr.bf16.mxu1 %v11765_v46 }
 0x265   : > { %10681 = vmatpush3.bf16.msra.mxu1 %v11765_v46 }
 0x267   : > { %10651 = vmatmul.mubr.bf16.gmra.mrb[16].mxu0 %v14847_v25 }
 0x268   : > { %10654 = vmatprep.mubr.bf16.mxu0 %v14848_v33 }
 0x26f   : > { %10655 = vmatmul.mubr.bf16.gmra.mrb[20].mxu0 %v14849_v8 }
 0x270   : > { %10658 = vmatprep.mubr.bf16.mxu0 %v14850_v22 }
 0x277   : > { %10659 = vmatmul.mubr.bf16.gmra.mrb[24].mxu0 %v12415_v14 }
 0x278   : > { %10662 = vmatprep.mubr.bf16.mxu0 %v12418_v15  ;;  %v12734_v15 = vpop.f32.mrb[1].mxu1 }
 0x279   : > { %v12739_v14 = vpop.f32.mrb[2].mxu1 }
 0x27a   : > { %v12741_v12 = vpop.f32.mrb[3].mxu1 }
 0x27b   : > { %v12746_v63 = vpop.f32.mrb[4].mxu1 }
 0x27c   : > { %v12748_v42 = vpop.f32.mrb[5].mxu1 }
 0x27d   : > { %v12750_v49 = vpop.f32.mrb[6].mxu1 }
 0x27e   : > { %v12755_v45 = vpop.f32.mrb[7].mxu1 }
 0x27f   : > { %10663 = vmatmul.mubr.bf16.gmra.mrb[28].mxu0 %v12438_v9  ;;  %v11766_v9 = vld [vmem:[%s14777_s3 + $0x70] sm:$0xff]   ;;  %v12757_v0 = vpop.f32.mrb[8].mxu1 }
 0x280   : > { %10666 = vmatprep.mubr.bf16.mxu0 %v12607_v52  ;;  %10682 = vmatprep.subr.bf16.mxu1 %v11766_v9  ;;  %v12762_v56 = vpop.f32.mrb[9].mxu1 }
 0x281   : > { %10683 = vmatpush3.bf16.msra.mxu1 %v11766_v9  ;;  %v12764_v61 = vpop.f32.mrb[10].mxu1 }
 0x282   : > { %10684 = vmatprep.subr.bf16.mxu1 %v11767_v20  ;;  %v12766_v1 = vpop.f32.mrb[11].mxu1 }
 0x283   : > { %v12768_v62 = vpop.f32.mrb[12].mxu1 }
 0x284   : > { %v12770_v19 = vpop.f32.mrb[13].mxu1 }
 0x285   : > { %10685 = vmatpush3.bf16.msra.mxu1 %v11767_v20  ;;  %v12772_v60 = vpop.f32.mrb[14].mxu1  ;;  %v3739_v20 = vld [vmem:[#allocation2 + $0x14] sm:$0x1] }
 0x286   : > { %10718 = vmatprep.subr.bf16.mxu1 %v11768_v27  ;;  %v12774_v43 = vpop.f32.mrb[15].mxu1 }
 0x287   : > { %10667 = vmatmul.mubr.bf16.gmra.mrb[32].mxu0 %v2893_v4  ;;  %v12781_v6 = vpop.f32.mrb[16].mxu1 }
 0x288   : > { %v12795_v13 = vpop.f32.mrb[17].mxu1 }
 0x31a   : > { %v10636_v25 = vpop.f32.mrb[0].mxu0 }
 0x31b   : > { %v3182_v33 = vadd.f32 %v10636_v25, %v12779_v55  ;;  %v2994_v8 = vpop.f32.mrb[1].mxu0 }
 0x31c   : > { %v3180_v22 = vadd.f32 %v12779_v55, %v2994_v8  ;;  %v10637_v58 = vpop.f32.mrb[2].mxu0 }
 0x31d   : > { %v3218_v48 = vmax.f32 %v3182_v33, 0.0  ;;  %v3183_v52 = vadd.f32 %v10637_v58, %v12779_v55  ;;  %v2997_v54 = vpop.f32.mrb[3].mxu0  ;;  %v12809_v33 = vpop.f32.mrb[18].mxu1 }
 0x31e   : > { %v3216_v36 = vmax.f32 %v3180_v22, 0.0  ;;  %v3181_v24 = vadd.f32 %v12779_v55, %v2997_v54  ;;  %v12813_v54 = vpop.f32.mrb[19].mxu1 }
 0x31f   : > { %v9718_v41 = vpack.c.bf16 %v3218_v48, %v3218_v48  ;;  %v3219_v44 = vmax.f32 %v3183_v52, 0.0  ;;  %v3732_v48 = vld [vmem:[#allocation2 + $0x8] sm:$0x1] }
 0x320   : > { %v9716_v3 = vpack.c.bf16 %v3216_v36, %v3216_v36  ;;  %v3217_v10 = vmax.f32 %v3181_v24, 0.0 }
 0x321   : > { %v3381_v34 = vshrl.u32 %v9718_v41, 16  ;;  %v9719_v11 = vpack.c.bf16 %v3219_v44, %v3219_v44  ;;  %v3384_v18 = vshll.u32 %v9718_v41, 16 }
 0x322   : > { %v3364_v21 = vshrl.u32 %v9716_v3, 16  ;;  %v3367_v30 = vshll.u32 %v9716_v3, 16  ;;  %v9717_v31 = vpack.c.bf16 %v3217_v10, %v3217_v10  ;;  %v10640_v5 = vpop.f32.mrb[4].mxu0 }
 0x323   : > { %v3383_v28 = vrot.slane %v3381_v34, 7  ;;  %v3389_v47 = vshrl.u32 %v9719_v11, 16  ;;  %v3392_v53 = vshll.u32 %v9719_v11, 16  ;;  %v3186_v59 = vadd.f32 %v10640_v5, %v12779_v55  ;;  %v3010_v38 = vpop.f32.mrb[5].mxu0 }
 0x324   : > { %v3366_v50 = vrot.slane %v3364_v21, 7  ;;  %v3372_v51 = vshrl.u32 %v9717_v31, 16  ;;  %v3375_v57 = vshll.u32 %v9717_v31, 16  ;;  %v3184_v23 = vadd.f32 %v12779_v55, %v3010_v38  ;;  %v10641_v32 = vpop.f32.mrb[6].mxu0  ;;  %v3749_v38 = vld [vmem:[#allocation2 + $0x24] sm:$0xf] }
 0x325   : > { %v3386_v7 = vor.u32 %v3384_v18, %v3383_v28  ;;  %v3387_v2 = vrot.slane %v3383_v28, 4  ;;  %v3391_v17 = vrot.slane %v3389_v47, 7  ;;  %v3222_v37 = vmax.f32 %v3186_v59, 0.0  ;;  %v3013_v40 = vpop.f32.mrb[7].mxu0 }
 0x326   : > { %v3369_v26 = vor.u32 %v3367_v30, %v3366_v50  ;;  %v3370_v46 = vrot.slane %v3366_v50, 4  ;;  %v3374_v27 = vrot.slane %v3372_v51, 7  ;;  %v3220_v25 = vmax.f32 %v3184_v23, 0.0 }
 0x327   : > { %v3736_v8 = vsel %vm12790_vm7, %v3386_v7, %v3735_v35  ;;  %v3394_v22 = vor.u32 %v3392_v53, %v3391_v17  ;;  %v3396_v58 = vrot.slane %v3391_v17, 4  ;;  %v9722_v52 = vpack.c.bf16 %v3222_v37, %v3222_v37 }
 0x328   : > { %3737 = vst [vmem:[#allocation2 + $0xc] sm:$0xf] %v3736_v8  ;;  %v3727_v36 = vsel %vm12790_vm7, %v3369_v26, %v3726_v16  ;;  %v3377_v24 = vor.u32 %v3375_v57, %v3374_v27  ;;  %v3379_v41 = vrot.slane %v3374_v27, 4  ;;  %v9720_v44 = vpack.c.bf16 %v3220_v25, %v3220_v25 }
 0x329   : > { %3728 = vst [vmem:[#allocation2] sm:$0xf] %v3727_v36  ;;  %v3395_v3 = vsel %vm12805_vm9, %v3387_v2, %v3394_v22  ;;  %v3740_v10 = vsel %vm12799_vm8, %v3396_v58, %v3739_v20  ;;  %v3415_v34 = vshrl.u32 %v9722_v52, 16  ;;  %v3418_v21 = vshll.u32 %v9722_v52, 16 }
 0x32a   : > { %3738 = vst [vmem:[#allocation2 + $0x10] sm:$0xf] %v3395_v3  ;;  %3741 = vst [vmem:[#allocation2 + $0x14] sm:$0x1] %v3740_v10  ;;  %v3378_v11 = vsel %vm12805_vm9, %v3370_v46, %v3377_v24  ;;  %v3733_v18 = vsel %vm12799_vm8, %v3379_v41, %v3732_v48  ;;  %v3398_v30 = vshrl.u32 %v9720_v44, 16  ;;  %v10644_v31 = vpop.f32.mrb[8].mxu0  ;;  %v3187_v28 = vadd.f32 %v10641_v32, %v12779_v55 }
 0x32b   : > { %3729 = vst [vmem:[#allocation2 + $0x4] sm:$0xf] %v3378_v11  ;;  %3734 = vst [vmem:[#allocation2 + $0x8] sm:$0x1] %v3733_v18  ;;  %v12825_v5 = vrot.slane %v3415_v34, 7  ;;  %v3185_v35 = vadd.f32 %v12779_v55, %v3013_v40  ;;  %v3190_v47 = vadd.f32 %v10644_v31, %v12779_v55  ;;  %v3026_v53 = vpop.f32.mrb[9].mxu0 }
 0x32c   : > { %v11951_v59 = vmov 0   ;;  %v12831_v50 = vrot.slane %v3398_v30, 7  ;;  %v3401_v51 = vshll.u32 %v9720_v44, 16  ;;  %v3188_v57 = vadd.f32 %v12779_v55, %v3026_v53  ;;  %v10645_v23 = vpop.f32.mrb[10].mxu0  ;;  %v3742_v32 = vld [vmem:[#allocation2 + $0x18] sm:$0xf] }
 0x32d   : > { %3968 = vst [vmem:[#allocation2 + $0x4] sm:$0xf] %v11951_v59  ;;  %v3420_v7 = vor.u32 %v3418_v21, %v12825_v5  ;;  %v3421_v2 = vrot.slane %v12825_v5, 4  ;;  %v3223_v16 = vmax.f32 %v3187_v28, 0.0  ;;  %v3221_v17 = vmax.f32 %v3185_v35, 0.0  ;;  %v3029_v37 = vpop.f32.mrb[11].mxu0 }
 0x32e   : > { %v3403_v40 = vor.u32 %v3401_v51, %v12831_v50  ;;  %v3404_v26 = vrot.slane %v12831_v50, 4  ;;  %v3226_v46 = vmax.f32 %v3190_v47, 0.0  ;;  %v3224_v20 = vmax.f32 %v3188_v57, 0.0  ;;  %v3753_v31 = vld [vmem:[#allocation2 + $0x2c] sm:$0x1] }
 0x32f   : > { %v3857_v27 = vld [vmem:[#allocation2 + $0xc] sm:$0x1]  ;;  %v3750_v8 = vsel %vm12790_vm7, %v3420_v7, %v3749_v38  ;;  %v9723_v22 = vpack.c.bf16 %v3223_v16, %v3223_v16  ;;  %v9721_v58 = vpack.c.bf16 %v3221_v17, %v3221_v17  ;;  %v3191_v48 = vadd.f32 %v10645_v23, %v12779_v55  ;;  %v3746_v23 = vld [vmem:[#allocation2 + $0x20] sm:$0x1] }
 0x330   : > { %v3858_v52 = vsel %vm12799_vm8, 0, %v3857_v27  ;;  %v3854_v36 = vld [vmem:[#allocation2] sm:$0x1]  ;;  %3751 = vst [vmem:[#allocation2 + $0x24] sm:$0xf] %v3750_v8  ;;  %v3743_v24 = vsel %vm12790_vm7, %v3403_v40, %v3742_v32  ;;  %v9726_v41 = vpack.c.bf16 %v3226_v46, %v3226_v46  ;;  %v9724_v44 = vpack.c.bf16 %v3224_v20, %v3224_v20 }
 0x331   : > { %3859 = vst [vmem:[#allocation2 + $0xc] sm:$0x1] %v3858_v52  ;;  %v3855_v3 = vsel %vm12799_vm8, 0, %v3854_v36  ;;  %v3912_v10 = vld [vmem:[#allocation2 + $0x14] sm:$0x1]  ;;  %v3423_v34 = vshrl.u32 %v9723_v22, 16  ;;  %v3189_v17 = vadd.f32 %v12779_v55, %v3029_v37 }
 0x332   : > { %3744 = vst [vmem:[#allocation2 + $0x18] sm:$0xf] %v3743_v24  ;;  %v3426_v11 = vshll.u32 %v9723_v22, 16  ;;  %v3406_v18 = vshrl.u32 %v9721_v58, 16  ;;  %3856 = vst [vmem:[#allocation2] sm:$0x1] %v3855_v3 }
 0x333   : > { %v3913_v21 = vsel %vm12840_vm10, 0, %v3912_v10  ;;  %v3909_v30 = vld [vmem:[#allocation2 + $0x8] sm:$0x1]  ;;  %v3409_v28 = vshll.u32 %v9721_v58, 16  ;;  %v3449_v35 = vshrl.u32 %v9726_v41, 16  ;;  %v3452_v47 = vshll.u32 %v9726_v41, 16 }
 0x334   : > { %3967 = vst [vmem:[#allocation2] sm:$0xf] %v11951_v59  ;;  %3914 = vst [vmem:[#allocation2 + $0x14] sm:$0x1] %v3913_v21  ;;  %v3910_v53 = vsel %vm12840_vm10, 0, %v3909_v30  ;;  %v3425_v38 = vrot.slane %v3423_v34, 7 }
 0x335   : > { %v3408_v50 = vrot.slane %v3406_v18, 7  ;;  %v3432_v51 = vshrl.u32 %v9724_v44, 16  ;;  %v10648_v57 = vpop.f32.mrb[12].mxu0  ;;  %3911 = vst [vmem:[#allocation2 + $0x8] sm:$0x1] %v3910_v53  ;;  %v12858_v7 = vrot.slane %v3449_v35, 7 }
 0x336   : > { %v3435_v32 = vshll.u32 %v9724_v44, 16  ;;  %v3227_v16 = vmax.f32 %v3191_v48, 0.0  ;;  %v3042_v40 = vpop.f32.mrb[13].mxu0  ;;  %3969 = vst [vmem:[#allocation2 + $0x8] sm:$0x1] %v11951_v59  ;;  %v3428_v46 = vor.u32 %v3426_v11, %v3425_v38  ;;  %v3430_v20 = vrot.slane %v3425_v38, 4 }
 0x337   : > { %v3411_v27 = vor.u32 %v3409_v28, %v3408_v50  ;;  %v3413_v8 = vrot.slane %v3408_v50, 4  ;;  %v3763_v22 = vld [vmem:[#allocation2 + $0x3c] sm:$0xf]  ;;  %v10649_v58 = vpop.f32.mrb[14].mxu0  ;;  %v3454_v52 = vor.u32 %v3452_v47, %v12858_v7  ;;  %v3455_v36 = vrot.slane %v12858_v7, 4 }
 0x338   : > { %v12864_v24 = vrot.slane %v3432_v51, 7  ;;  %v9727_v41 = vpack.c.bf16 %v3227_v16, %v3227_v16  ;;  %v3045_v44 = vpop.f32.mrb[15].mxu0  ;;  %v3863_v48 = vld [vmem:[#allocation2 + $0x24] sm:$0x1]  ;;  %v3429_v37 = vsel %vm12805_vm9, %v3421_v2, %v3428_v46  ;;  %v3754_v3 = vsel %vm12799_vm8, %v3430_v20, %v3753_v31  ;;  %v3756_v11 = vld [vmem:[#allocation2 + $0x30] sm:$0xf] }
 0x339   : > { %v3412_v10 = vsel %vm12805_vm9, %v3404_v26, %v3411_v27  ;;  %v3747_v34 = vsel %vm12799_vm8, %v3413_v8, %v3746_v23  ;;  %v3864_v18 = vsel %vm12799_vm8, 0, %v3863_v48  ;;  %v3860_v21 = vld [vmem:[#allocation2 + $0x18] sm:$0x1]  ;;  %3752 = vst [vmem:[#allocation2 + $0x28] sm:$0xf] %v3429_v37  ;;  %v3764_v5 = vsel %vm12790_vm7, %v3454_v52, %v3763_v22 }
 0x33a   : > { %3755 = vst [vmem:[#allocation2 + $0x2c] sm:$0x1] %v3754_v3  ;;  %3745 = vst [vmem:[#allocation2 + $0x1c] sm:$0xf] %v3412_v10  ;;  %v3437_v2 = vor.u32 %v3435_v32, %v12864_v24  ;;  %v3438_v30 = vrot.slane %v12864_v24, 4  ;;  %v3861_v26 = vsel %vm12799_vm8, 0, %v3860_v21  ;;  %v3194_v53 = vadd.f32 %v10648_v57, %v12779_v55 }
 0x33b   : > { %3748 = vst [vmem:[#allocation2 + $0x20] sm:$0x1] %v3747_v34  ;;  %3865 = vst [vmem:[#allocation2 + $0x24] sm:$0x1] %v3864_v18  ;;  %v3457_v31 = vshrl.u32 %v9727_v41, 16  ;;  %v3460_v28 = vshll.u32 %v9727_v41, 16  ;;  %v3192_v38 = vadd.f32 %v12779_v55, %v3042_v40  ;;  %v3195_v50 = vadd.f32 %v10649_v58, %v12779_v55 }
 0x33c   : > { %3765 = vst [vmem:[#allocation2 + $0x3c] sm:$0xf] %v3764_v5  ;;  %v3225_v35 = vmax.f32 %v3189_v17, 0.0  ;;  %3862 = vst [vmem:[#allocation2 + $0x18] sm:$0x1] %v3861_v26  ;;  %v3757_v47 = vsel %vm12790_vm7, %v3437_v2, %v3756_v11  ;;  %v10652_v51 = vpop.f32.mrb[16].mxu0  ;;  %v3193_v32 = vadd.f32 %v12779_v55, %v3045_v44 }
 0x33d   : > { %3758 = vst [vmem:[#allocation2 + $0x30] sm:$0xf] %v3757_v47  ;;  %v3459_v23 = vrot.slane %v3457_v31, 7  ;;  %v11118_v16 = vadd.f32 %v10652_v51, %v12732_v29  ;;  %v3058_v46 = vpop.f32.mrb[17].mxu0  ;;  %v3767_v17 = vld [vmem:[#allocation2 + $0x44] sm:$0x1] }
 0x33e   : > { %v9725_v7 = vpack.c.bf16 %v3225_v35, %v3225_v35  ;;  %v3230_v20 = vmax.f32 %v3194_v53, 0.0  ;;  %v3228_v27 = vmax.f32 %v3192_v38, 0.0  ;;  %v3231_v8 = vmax.f32 %v3195_v50, 0.0  ;;  %v12892_v57 = vpop.f32.mrb[18].mxu0  ;;  %v3760_v48 = vld [vmem:[#allocation2 + $0x38] sm:$0x1] }
 0x33f   : > { %v11119_v22 = vadd.f32 %v3058_v46, %v12734_v15  ;;  %v3462_v40 = vor.u32 %v3460_v28, %v3459_v23  ;;  %v3464_v52 = vrot.slane %v3459_v23, 4  ;;  %v12894_v41 = vpop.f32.mrb[19].mxu0  ;;  %v3229_v29 = vmax.f32 %v3193_v32, 0.0 }
 0x340   : > { %v3440_v58 = vshrl.u32 %v9725_v7, 16  ;;  %v3443_v24 = vshll.u32 %v9725_v7, 16  ;;  %v9730_v37 = vpack.c.bf16 %v3230_v20, %v3230_v20  ;;  %v9728_v44 = vpack.c.bf16 %v3228_v27, %v3228_v27 }
 0x341   : > { %v9731_v3 = vpack.c.bf16 %v3231_v8, %v3231_v8  ;;  %v3918_v10 = vld [vmem:[#allocation2 + $0x2c] sm:$0x1]  ;;  %v3463_v11 = vsel %vm12805_vm9, %v3455_v36, %v3462_v40  ;;  %v3768_v15 = vsel %vm12799_vm8, %v3464_v52, %v3767_v17  ;;  %v3198_v21 = vadd.f32 %v11118_v16, %v12779_v55  ;;  %v3777_v17 = vld [vmem:[#allocation2 + $0x54] sm:$0xf]  ;;  %v3770_v52 = vld [vmem:[#allocation2 + $0x48] sm:$0xf] }
 0x342   : > { %v3915_v34 = vld [vmem:[#allocation2 + $0x20] sm:$0x1]  ;;  %v3442_v18 = vrot.slane %v3440_v58, 7  ;;  %v3919_v5 = vsel %vm12840_vm10, 0, %v3918_v10  ;;  %3766 = vst [vmem:[#allocation2 + $0x40] sm:$0xf] %v3463_v11 }
 0x343   : > { %v3916_v2 = vsel %vm12840_vm10, 0, %v3915_v34  ;;  %v3869_v26 = vld [vmem:[#allocation2 + $0x3c] sm:$0x1]  ;;  %3769 = vst [vmem:[#allocation2 + $0x44] sm:$0x1] %v3768_v15  ;;  %v3483_v31 = vshrl.u32 %v9730_v37, 16 }
 0x344   : > { %v3486_v28 = vshll.u32 %v9730_v37, 16  ;;  %3920 = vst [vmem:[#allocation2 + $0x2c] sm:$0x1] %v3919_v5  ;;  %3917 = vst [vmem:[#allocation2 + $0x20] sm:$0x1] %v3916_v2  ;;  %v3870_v36 = vsel %vm12799_vm8, 0, %v3869_v26  ;;  %v3445_v35 = vor.u32 %v3443_v24, %v3442_v18  ;;  %v9729_v24 = vpack.c.bf16 %v3229_v29, %v3229_v29 }
 0x345   : > { %v3447_v47 = vrot.slane %v3442_v18, 4  ;;  %v3466_v53 = vshrl.u32 %v9728_v44, 16  ;;  %3871 = vst [vmem:[#allocation2 + $0x3c] sm:$0x1] %v3870_v36  ;;  %v3866_v38 = vld [vmem:[#allocation2 + $0x30] sm:$0x1] }
 0x346   : > { %v3485_v50 = vrot.slane %v3483_v31, 7  ;;  %v3469_v51 = vshll.u32 %v9728_v44, 16  ;;  %v3491_v23 = vshrl.u32 %v9731_v3, 16  ;;  %v3494_v7 = vshll.u32 %v9731_v3, 16  ;;  %v10656_v27 = vpop.f32.mrb[20].mxu0 }
 0x347   : > { %v3867_v32 = vsel %vm12799_vm8, 0, %v3866_v38  ;;  %v3446_v16 = vsel %vm12805_vm9, %v3438_v30, %v3445_v35  ;;  %v3761_v46 = vsel %vm12799_vm8, %v3447_v47, %v3760_v48  ;;  %v3468_v20 = vrot.slane %v3466_v53, 7  ;;  %v3074_v37 = vpop.f32.mrb[21].mxu0  ;;  %v3781_v10 = vld [vmem:[#allocation2 + $0x5c] sm:$0x1] }
 0x348   : > { %3868 = vst [vmem:[#allocation2 + $0x30] sm:$0x1] %v3867_v32  ;;  %3759 = vst [vmem:[#allocation2 + $0x34] sm:$0xf] %v3446_v16  ;;  %v3488_v8 = vor.u32 %v3486_v28, %v3485_v50  ;;  %v3489_v40 = vrot.slane %v3485_v50, 4  ;;  %v3493_v58 = vrot.slane %v3491_v23, 7  ;;  %v3196_v30 = vadd.f32 %v11119_v22, %v12779_v55 }
 0x349   : > { %3762 = vst [vmem:[#allocation2 + $0x38] sm:$0x1] %v3761_v46  ;;  %v3471_v44 = vor.u32 %v3469_v51, %v3468_v20  ;;  %v3472_v3 = vrot.slane %v3468_v20, 4  ;;  %v3234_v34 = vmax.f32 %v3198_v21, 0.0  ;;  %v10657_v11 = vpop.f32.mrb[22].mxu0  ;;  %v3474_v5 = vshrl.u32 %v9729_v24, 16 }
 0x34a   : > { %v3778_v48 = vsel %vm12790_vm7, %v3488_v8, %v3777_v17  ;;  %v3496_v15 = vor.u32 %v3494_v7, %v3493_v58  ;;  %v3498_v18 = vrot.slane %v3493_v58, 4  ;;  %v12916_v2 = vpop.f32.mrb[23].mxu0  ;;  %v3924_v26 = vld [vmem:[#allocation2 + $0x44] sm:$0x1]  ;;  %v3477_v31 = vshll.u32 %v9729_v24, 16 }
 0x34b   : > { %3779 = vst [vmem:[#allocation2 + $0x54] sm:$0xf] %v3778_v48  ;;  %v3771_v29 = vsel %vm12790_vm7, %v3471_v44, %v3770_v52  ;;  %v9734_v28 = vpack.c.bf16 %v3234_v34, %v3234_v34  ;;  %v3232_v36 = vmax.f32 %v3196_v30, 0.0  ;;  %v3925_v22 = vsel %vm12840_vm10, 0, %v3924_v26  ;;  %v3774_v53 = vld [vmem:[#allocation2 + $0x50] sm:$0x1] }
 0x34c   : > { %3772 = vst [vmem:[#allocation2 + $0x48] sm:$0xf] %v3771_v29  ;;  %v3497_v21 = vsel %vm12805_vm9, %v3489_v40, %v3496_v15  ;;  %v3782_v35 = vsel %vm12799_vm8, %v3498_v18, %v3781_v10  ;;  %v3476_v47 = vrot.slane %v3474_v5, 7  ;;  %3926 = vst [vmem:[#allocation2 + $0x44] sm:$0x1] %v3925_v22  ;;  %v11120_v23 = vadd.f32 %v12892_v57, %v12739_v14  ;;  %v12931_v17 = vpop.f32.mrb[24].mxu0 }
 0x34d   : > { %3780 = vst [vmem:[#allocation2 + $0x58] sm:$0xf] %v3497_v21  ;;  %3783 = vst [vmem:[#allocation2 + $0x5c] sm:$0x1] %v3782_v35  ;;  %v3517_v38 = vshrl.u32 %v9734_v28, 16  ;;  %v3520_v50 = vshll.u32 %v9734_v28, 16  ;;  %v9732_v51 = vpack.c.bf16 %v3232_v36, %v3232_v36  ;;  %v11121_v16 = vadd.f32 %v12894_v41, %v12741_v12 }
 0x34e   : > { %v3479_v7 = vor.u32 %v3477_v31, %v3476_v47  ;;  %v3481_v32 = vrot.slane %v3476_v47, 4  ;;  %v11122_v46 = vadd.f32 %v10656_v27, %v12746_v63  ;;  %v3199_v58 = vadd.f32 %v11120_v23, %v12779_v55  ;;  %v12936_v24 = vpop.f32.mrb[25].mxu0  ;;  %v3791_v63 = vld [vmem:[#allocation2 + $0x6c] sm:$0xf]  ;;  %v3784_v41 = vld [vmem:[#allocation2 + $0x60] sm:$0xf] }
 0x34f   : > { %v12933_v8 = vrot.slane %v3517_v38, 7  ;;  %v3500_v40 = vshrl.u32 %v9732_v51, 16  ;;  %v3503_v52 = vshll.u32 %v9732_v51, 16  ;;  %v3197_v27 = vadd.f32 %v11121_v16, %v12779_v55  ;;  %v12945_v44 = vpop.f32.mrb[26].mxu0  ;;  %v12970_v51 = vld [vmem:[#allocation2] sm:$0xf] }
 0x350   : > { %v3921_v20 = vld [vmem:[#allocation2 + $0x38] sm:$0x1]  ;;  %v3480_v57 = vsel %vm12805_vm9, %v3472_v3, %v3479_v7  ;;  %v3775_v12 = vsel %vm12799_vm8, %v3481_v32, %v3774_v53  ;;  %v3235_v48 = vmax.f32 %v3199_v58, 0.0  ;;  %v12951_v3 = vpop.f32.mrb[27].mxu0  ;;  %v3202_v5 = vadd.f32 %v11122_v46, %v12779_v55 }
 0x351   : > { %v3922_v14 = vsel %vm12840_vm10, 0, %v3921_v20  ;;  %3773 = vst [vmem:[#allocation2 + $0x4c] sm:$0xf] %v3480_v57  ;;  %3776 = vst [vmem:[#allocation2 + $0x50] sm:$0x1] %v3775_v12  ;;  %v3522_v10 = vor.u32 %v3520_v50, %v12933_v8  ;;  %v3523_v34 = vrot.slane %v12933_v8, 4  ;;  %v11123_v26 = vadd.f32 %v3074_v37, %v12748_v42 }
 0x352   : > { %3923 = vst [vmem:[#allocation2 + $0x38] sm:$0x1] %v3922_v14  ;;  %v12949_v30 = vrot.slane %v3500_v40, 7  ;;  %v3875_v15 = vld [vmem:[#allocation2 + $0x54] sm:$0x1]  ;;  %v3233_v18 = vmax.f32 %v3197_v27, 0.0  ;;  %v11124_v29 = vadd.f32 %v10657_v11, %v12750_v49  ;;  %v9735_v42 = vpack.c.bf16 %v3235_v48, %v3235_v48 }
 0x353   : > { %v3876_v31 = vsel %vm12799_vm8, 0, %v3875_v15  ;;  %v3872_v28 = vld [vmem:[#allocation2 + $0x48] sm:$0x1]  ;;  %v3792_v36 = vsel %vm12790_vm7, %v3522_v10, %v3791_v63  ;;  %v3238_v49 = vmax.f32 %v3202_v5, 0.0  ;;  %v3200_v38 = vadd.f32 %v11123_v26, %v12779_v55  ;;  %v12972_v46 = vpop.f32.mrb[28].mxu0 }
 0x354   : > { %v3505_v22 = vor.u32 %v3503_v52, %v12949_v30  ;;  %v3506_v21 = vrot.slane %v12949_v30, 4  ;;  %3877 = vst [vmem:[#allocation2 + $0x54] sm:$0x1] %v3876_v31  ;;  %v3873_v35 = vsel %vm12799_vm8, 0, %v3872_v28  ;;  %v3930_v47 = vld [vmem:[#allocation2 + $0x5c] sm:$0x1]  ;;  %v9733_v37 = vpack.c.bf16 %v3233_v18, %v3233_v18 }
 0x355   : > { %3793 = vst [vmem:[#allocation2 + $0x6c] sm:$0xf] %v3792_v36  ;;  %3874 = vst [vmem:[#allocation2 + $0x48] sm:$0x1] %v3873_v35  ;;  %v3931_v11 = vsel %vm12840_vm10, 0, %v3930_v47  ;;  %v3203_v50 = vadd.f32 %v11124_v29, %v12779_v55  ;;  %v3525_v23 = vshrl.u32 %v9735_v42, 16  ;;  %v9738_v40 = vpack.c.bf16 %v3238_v49, %v3238_v49 }
 0x356   : > { %v3785_v53 = vsel %vm12790_vm7, %v3505_v22, %v3784_v41  ;;  %3932 = vst [vmem:[#allocation2 + $0x5c] sm:$0x1] %v3931_v11  ;;  %v3528_v7 = vshll.u32 %v9735_v42, 16  ;;  %v3508_v32 = vshrl.u32 %v9733_v37, 16  ;;  %v3511_v16 = vshll.u32 %v9733_v37, 16  ;;  %v12976_v57 = vpop.f32.mrb[29].mxu0 }
 0x357   : > { %3786 = vst [vmem:[#allocation2 + $0x60] sm:$0xf] %v3785_v53  ;;  %v3795_v20 = vld [vmem:[#allocation2 + $0x74] sm:$0x1]  ;;  %v3236_v52 = vmax.f32 %v3200_v38, 0.0  ;;  %v3239_v58 = vmax.f32 %v3203_v50, 0.0  ;;  %v11125_v14 = vadd.f32 %v12916_v2, %v12755_v45 }
 0x358   : > { %v3927_v12 = vld [vmem:[#allocation2 + $0x50] sm:$0x1]  ;;  %v3527_v63 = vrot.slane %v3525_v23, 7  ;;  %v3510_v41 = vrot.slane %v3508_v32, 7  ;;  %v4042_v27 = vshrl.u32 %v12970_v51, 16  ;;  %v4045_v10 = vshll.u32 %v12970_v51, 16 }
 0x359   : > { %v3928_v30 = vsel %vm12840_vm10, 0, %v3927_v12  ;;  %v3788_v48 = vld [vmem:[#allocation2 + $0x68] sm:$0x1]  ;;  %v3551_v15 = vshrl.u32 %v9738_v40, 16  ;;  %v3554_v18 = vshll.u32 %v9738_v40, 16  ;;  %v9736_v5 = vpack.c.bf16 %v3236_v52, %v3236_v52  ;;  %v12982_v26 = vpop.f32.mrb[30].mxu0 }
 0x35a   : > { %3929 = vst [vmem:[#allocation2 + $0x50] sm:$0x1] %v3928_v30  ;;  %v3530_v45 = vor.u32 %v3528_v7, %v3527_v63  ;;  %v3532_v2 = vrot.slane %v3527_v63, 4  ;;  %v3513_v29 = vor.u32 %v3511_v16, %v3510_v41  ;;  %v3515_v31 = vrot.slane %v3510_v41, 4  ;;  %v3805_v28 = vld [vmem:[#allocation2 + $0x84] sm:$0xf] }
 0x35b   : > { %v12984_v36 = vpop.f32.mrb[31].mxu0  ;;  %v3553_v35 = vrot.slane %v3551_v15, 7  ;;  %v3534_v47 = vshrl.u32 %v9736_v5, 16  ;;  %v3537_v42 = vshll.u32 %v9736_v5, 16  ;;  %v9739_v37 = vpack.c.bf16 %v3239_v58, %v3239_v58  ;;  %v3798_v50 = vld [vmem:[#allocation2 + $0x78] sm:$0xf] }
 0x35c   : > { %v3881_v22 = vld [vmem:[#allocation2 + $0x6c] sm:$0x1]  ;;  %v3531_v11 = vsel %vm12805_vm9, %v3523_v34, %v3530_v45  ;;  %v3796_v53 = vsel %vm12799_vm8, %v3532_v2, %v3795_v20  ;;  %v3514_v38 = vsel %vm12805_vm9, %v3506_v21, %v3513_v29  ;;  %v3975_v51 = vld [vmem:[#allocation2 + $0x4] sm:$0xf]  ;;  %v3789_v7 = vsel %vm12799_vm8, %v3515_v31, %v3788_v48  ;;  %v4022_v58 = vld [vmem:[#allocation2 + $0x8] sm:$0x1] }
 0x35d   : > { %v3882_v49 = vsel %vm12799_vm8, 0, %v3881_v22  ;;  %3794 = vst [vmem:[#allocation2 + $0x70] sm:$0xf] %v3531_v11  ;;  %3797 = vst [vmem:[#allocation2 + $0x74] sm:$0x1] %v3796_v53  ;;  %v3556_v8 = vor.u32 %v3554_v18, %v3553_v35  ;;  %v3557_v32 = vrot.slane %v3553_v35, 4  ;;  %v3201_v52 = vadd.f32 %v11125_v14, %v12779_v55 }
 0x35e   : > { %3883 = vst [vmem:[#allocation2 + $0x6c] sm:$0x1] %v3882_v49  ;;  %v3878_v23 = vld [vmem:[#allocation2 + $0x60] sm:$0x1]  ;;  %3787 = vst [vmem:[#allocation2 + $0x64] sm:$0xf] %v3514_v38 }
 0x35f   : > { %v12998_v16 = vrot.slane %v3534_v47, 7  ;;  %v3976_v34 = vld [vmem:[#allocation2 + $0xc] sm:$0xf]  ;;  %v3879_v20 = vsel %vm12799_vm8, 0, %v3878_v23  ;;  %3790 = vst [vmem:[#allocation2 + $0x68] sm:$0x1] %v3789_v7  ;;  %v3806_v63 = vsel %vm12790_vm7, %v3556_v8, %v3805_v28 }
 0x360   : > { %v3559_v21 = vshrl.u32 %v9739_v37, 16  ;;  %v3562_v40 = vshll.u32 %v9739_v37, 16  ;;  %v13003_v12 = vpop.f32.mrb[32].mxu0  ;;  %3880 = vst [vmem:[#allocation2 + $0x60] sm:$0x1] %v3879_v20  ;;  %v4044_v48 = vrot.slane %v4042_v27, 4 }
 0x361   : > { %v3539_v41 = vor.u32 %v3537_v42, %v12998_v16  ;;  %v3540_v30 = vrot.slane %v12998_v16, 4  ;;  %v13009_v15 = vpop.f32.mrb[33].mxu0  ;;  %3807 = vst [vmem:[#allocation2 + $0x84] sm:$0xf] %v3806_v63  ;;  %v3237_v5 = vmax.f32 %v3201_v52, 0.0  ;;  %v4047_v45 = vrot.slane %v4045_v10, 5 }
 0x362   : > { %v3561_v18 = vrot.slane %v3559_v21, 7  ;;  %v4051_v2 = vshll.u32 %v3975_v51, 16  ;;  %v13011_v14 = vpop.f32.mrb[34].mxu0  ;;  %v3809_v31 = vld [vmem:[#allocation2 + $0x8c] sm:$0x1]  ;;  %v4055_v22 = vshrl.u32 %v3975_v51, 16  ;;  %v11128_v16 = vadd.f32 %v12945_v44, %v12764_v61 }
 0x363   : > { %v3799_v29 = vsel %vm12790_vm7, %v3539_v41, %v3798_v50  ;;  %v4061_v28 = vshll.u32 %v4022_v58, 16  ;;  %v4066_v35 = vshrl.u32 %v3976_v34, 16  ;;  %v13015_v47 = vpop.f32.mrb[35].mxu0  ;;  %v9737_v37 = vpack.c.bf16 %v3237_v5, %v3237_v5  ;;  %v3977_v11 = vld [vmem:[#allocation2 + $0x10] sm:$0xf] }
 0x364   : > { %3800 = vst [vmem:[#allocation2 + $0x78] sm:$0xf] %v3799_v29  ;;  %v3564_v27 = vor.u32 %v3562_v40, %v3561_v18  ;;  %v3566_v42 = vrot.slane %v3561_v18, 4  ;;  %v4048_v49 = vor.u32 %v4047_v45, %v4044_v48  ;;  %v4053_v53 = vrot.slane %v4051_v2, 5  ;;  %v3936_v7 = vld [vmem:[#allocation2 + $0x74] sm:$0x1] }
 0x365   : > { %v4057_v10 = vrot.slane %v4055_v22, 4  ;;  %v4063_v38 = vrot.slane %v4061_v28, 5  ;;  %v4068_v23 = vrot.slane %v4066_v35, 4  ;;  %v3542_v8 = vshrl.u32 %v9737_v37, 16  ;;  %v4023_v21 = vld [vmem:[#allocation2 + $0x14] sm:$0x1] }
 0x366   : > { %v3565_v50 = vsel %vm12805_vm9, %v3557_v32, %v3564_v27  ;;  %v3810_v51 = vsel %vm12799_vm8, %v3566_v42, %v3809_v31  ;;  %v3545_v20 = vshll.u32 %v9737_v37, 16  ;;  %v3937_v40 = vsel %vm12840_vm10, 0, %v3936_v7  ;;  %v3933_v52 = vld [vmem:[#allocation2 + $0x68] sm:$0x1]  ;;  %v3802_v18 = vld [vmem:[#allocation2 + $0x80] sm:$0x1] }
 0x367   : > { %3808 = vst [vmem:[#allocation2 + $0x88] sm:$0xf] %v3565_v50  ;;  %3811 = vst [vmem:[#allocation2 + $0x8c] sm:$0x1] %v3810_v51  ;;  %v4049_v58 = vrot.slane %v4048_v49, 4  ;;  %v4058_v63 = vor.u32 %v4057_v10, %v4053_v53  ;;  %v4069_v41 = vshll.u32 %v3976_v34, 16  ;;  %v3207_v61 = vadd.f32 %v11128_v16, %v12779_v55 }
 0x368   : > { %3938 = vst [vmem:[#allocation2 + $0x74] sm:$0x1] %v3937_v40  ;;  %v3934_v48 = vsel %vm12840_vm10, 0, %v3933_v52  ;;  %v3544_v32 = vrot.slane %v3542_v8, 7  ;;  %v4075_v45 = vshll.u32 %v3977_v11, 16  ;;  %v4079_v2 = vshrl.u32 %v3977_v11, 16 }
 0x369   : > { %3935 = vst [vmem:[#allocation2 + $0x68] sm:$0x1] %v3934_v48  ;;  %v3887_v29 = vld [vmem:[#allocation2 + $0x84] sm:$0x1]  ;;  %v4054_v31 = vsel %vm13027_vm13, %v4049_v58, %v4053_v53  ;;  %v4059_v34 = vrot.slane %v4058_v63, 4  ;;  %v4071_v22 = vrot.slane %v4069_v41, 5  ;;  %v11126_v40 = vadd.f32 %v12931_v17, %v12757_v0 }
 0x36a   : > { %v4085_v28 = vshll.u32 %v4023_v21, 16  ;;  %v3888_v35 = vsel %vm12799_vm8, 0, %v3887_v29  ;;  %v3547_v27 = vor.u32 %v3545_v20, %v3544_v32  ;;  %v3549_v42 = vrot.slane %v3544_v32, 4  ;;  %v3978_v51 = vld [vmem:[#allocation2 + $0x18] sm:$0xf] }
 0x36b   : > { %v4077_v37 = vrot.slane %v4075_v45, 5  ;;  %3889 = vst [vmem:[#allocation2 + $0x84] sm:$0x1] %v3888_v35  ;;  %v3884_v49 = vld [vmem:[#allocation2 + $0x78] sm:$0x1]  ;;  %v4064_v10 = vsel %vm13027_vm13, %v4059_v34, %v4063_v38  ;;  %v4072_v11 = vor.u32 %v4071_v22, %v4068_v23  ;;  %v4081_v7 = vrot.slane %v4079_v2, 4 }
 0x36c   : > { %v4087_v50 = vrot.slane %v4085_v28, 5  ;;  %v3885_v53 = vsel %vm12799_vm8, 0, %v3884_v49  ;;  %v3548_v8 = vsel %vm12805_vm9, %v3540_v30, %v3547_v27  ;;  %v3803_v20 = vsel %vm12799_vm8, %v3549_v42, %v3802_v18  ;;  %v3979_v63 = vld [vmem:[#allocation2 + $0x1c] sm:$0xf]  ;;  %v11769_v35 = vld [vmem:[%s14777_s3 + $0x8] sm:$0xff]  }
 0x36d   : > { %v9304_v21 = vcombine.low %v4054_v31, %v4064_v10  ;;  %3886 = vst [vmem:[#allocation2 + $0x78] sm:$0x1] %v3885_v53  ;;  %3801 = vst [vmem:[#allocation2 + $0x7c] sm:$0xf] %v3548_v8  ;;  %v4073_v38 = vrot.slane %v4072_v11, 4  ;;  %v4082_v23 = vor.u32 %v4081_v7, %v4077_v37  ;;  %v11127_v52 = vadd.f32 %v12936_v24, %v12762_v56  ;;  %v11880_v53 = vld [vmem:[%s14777_s3] sm:$0xff]  }
 0x36e   : > { %3804 = vst [vmem:[#allocation2 + $0x80] sm:$0x1] %v3803_v20  ;;  %v3942_v58 = vld [vmem:[#allocation2 + $0x8c] sm:$0x1]  ;;  %v11129_v30 = vadd.f32 %v12951_v3, %v12766_v1  ;;  %v4090_v41 = vshrl.u32 %v3978_v51, 16  ;;  %v4093_v48 = vshll.u32 %v3978_v51, 16  ;;  %v3206_v56 = vadd.f32 %v11126_v40, %v12779_v55 }
 0x36f   : > { %10686 = vmatprep.mubr.bf16.mxu1 %v9304_v21  ;;  %v3943_v32 = vsel %vm12840_vm10, 0, %v3942_v58  ;;  %v4078_v0 = vsel %vm13027_vm13, %v4073_v38, %v4077_v37  ;;  %v4083_v17 = vrot.slane %v4082_v23, 4  ;;  %v3204_v24 = vadd.f32 %v11127_v52, %v12779_v55  ;;  %v4024_v1 = vld [vmem:[#allocation2 + $0x20] sm:$0x1]  ;;  %v11770_v38 = vld [vmem:[%s14777_s3 + $0x10] sm:$0xff]  }
 0x370   : > { %3944 = vst [vmem:[#allocation2 + $0x8c] sm:$0x1] %v3943_v32  ;;  %v3205_v44 = vadd.f32 %v11129_v30, %v12779_v55  ;;  %v4092_v3 = vrot.slane %v4090_v41, 4  ;;  %v3242_v45 = vmax.f32 %v3206_v56, 0.0  ;;  %v4095_v2 = vrot.slane %v4093_v48, 5 }
 0x371   : > { %v4088_v18 = vsel %vm13027_vm13, %v4083_v17, %v4087_v50  ;;  %v4099_v29 = vshll.u32 %v3979_v63, 16  ;;  %v3240_v34 = vmax.f32 %v3204_v24, 0.0  ;;  %v3243_v22 = vmax.f32 %v3207_v61, 0.0  ;;  %v3819_v23 = vld [vmem:[#allocation2 + $0x9c] sm:$0xf] }
 0x372   : > { %v9305_v31 = vcombine.low %v4078_v0, %v4088_v18  ;;  %v3241_v28 = vmax.f32 %v3205_v44, 0.0  ;;  %v9742_v27 = vpack.c.bf16 %v3242_v45, %v3242_v45  ;;  %v4096_v42 = vor.u32 %v4095_v2, %v4092_v3  ;;  %v3980_v30 = vld [vmem:[#allocation2 + $0x24] sm:$0xf]  ;;  %v3812_v41 = vld [vmem:[#allocation2 + $0x90] sm:$0xf] }
 0x373   : > { %v13066_v37 = vrot.slane %v4099_v29, 5  ;;  %v4103_v55 = vshrl.u32 %v3979_v63, 16  ;;  %v9740_v10 = vpack.c.bf16 %v3240_v34, %v3240_v34  ;;  %v9743_v11 = vpack.c.bf16 %v3243_v22, %v3243_v22  ;;  %v3823_v48 = vld [vmem:[#allocation2 + $0xa4] sm:$0x1]  ;;  %v3816_v61 = vld [vmem:[#allocation2 + $0x98] sm:$0x1] }
 0x374   : > { %10687 = vmatmul.mubr.bf16.vlgmr.msra.gmra.mrb[20].mxu1 %v9305_v31  ;;  %v9741_v7 = vpack.c.bf16 %v3241_v28, %v3241_v28  ;;  %v4109_v50 = vshll.u32 %v4024_v1, 16  ;;  %v3585_v8 = vshrl.u32 %v9742_v27, 16  ;;  %v3588_v20 = vshll.u32 %v9742_v27, 16  ;;  %v3981_v2 = vld [vmem:[#allocation2 + $0x28] sm:$0xf]  ;;  %v11771_v31 = vld [vmem:[%s14777_s3 + $0x18] sm:$0xff]  }
 0x375   : > { %v3939_v49 = vld [vmem:[#allocation2 + $0x80] sm:$0x1]  ;;  %10719 = vmatpush3.bf16.msra.mxu1 %v11880_v53  ;;  %v13073_v21 = vrot.slane %v4096_v42, 4  ;;  %v3568_v40 = vshrl.u32 %v9740_v10, 16  ;;  %v3571_v52 = vshll.u32 %v9740_v10, 16  ;;  %v3593_v58 = vshrl.u32 %v9743_v11, 16 }
 0x376   : > { %v3940_v51 = vsel %vm12840_vm10, 0, %v3939_v49  ;;  %v3596_v16 = vshll.u32 %v9743_v11, 16  ;;  %10720 = vmatprep.subr.bf16.mxu1 %v11769_v35  ;;  %v3587_v63 = vrot.slane %v3585_v8, 7  ;;  %v3576_v32 = vshrl.u32 %v9741_v7, 16  ;;  %v4025_v11 = vld [vmem:[#allocation2 + $0x2c] sm:$0x1] }
 0x377   : > { %3941 = vst [vmem:[#allocation2 + $0x80] sm:$0x1] %v3940_v51  ;;  %v3579_v0 = vshll.u32 %v9741_v7, 16  ;;  %v4102_v17 = vsel %vm13027_vm13, %v13073_v21, %v13066_v37  ;;  %v3570_v56 = vrot.slane %v3568_v40, 7  ;;  %v3595_v24 = vrot.slane %v3593_v58, 7  ;;  %v11772_v58 = vld [vmem:[%s14777_s3 + $0x20] sm:$0xff]  }
 0x378   : > { %v4105_v44 = vrot.slane %v4103_v55, 4  ;;  %v4111_v1 = vrot.slane %v4109_v50, 5  ;;  %v3590_v3 = vor.u32 %v3588_v20, %v3587_v63  ;;  %v3591_v18 = vrot.slane %v3587_v63, 4 }
 0x379   : > { %v3578_v45 = vrot.slane %v3576_v32, 7  ;;  %v4114_v29 = vshrl.u32 %v3980_v30, 16  ;;  %10721 = vmatpush3.bf16.msra.mxu1 %v11769_v35  ;;  %v3573_v34 = vor.u32 %v3571_v52, %v3570_v56  ;;  %v3574_v22 = vrot.slane %v3570_v56, 4  ;;  %v13114_v56 = vld [vmem:[%s14776_s2] ss:$0 sm:$0xff] }
 0x37a   : > { %v3598_v28 = vor.u32 %v3596_v16, %v3595_v24  ;;  %v3600_v27 = vrot.slane %v3595_v24, 4  ;;  %10722 = vmatprep.subr.bf16.mxu1 %v11770_v38  ;;  %v3820_v42 = vsel %vm12790_vm7, %v3590_v3, %v3819_v23  ;;  %v4106_v10 = vor.u32 %v4105_v44, %v13066_v37  ;;  %v11773_v44 = vld [vmem:[%s14777_s3 + $0x28] sm:$0xff]  }
 0x37b   : > { %v3581_v55 = vor.u32 %v3579_v0, %v3578_v45  ;;  %v3583_v49 = vrot.slane %v3578_v45, 4  ;;  %3821 = vst [vmem:[#allocation2 + $0x9c] sm:$0xf] %v3820_v42  ;;  %v3813_v35 = vsel %vm12790_vm7, %v3573_v34, %v3812_v41  ;;  %v4116_v51 = vrot.slane %v4114_v29, 4  ;;  %v13109_v41 = vld [vmem:[#allocation2 + $0x30] sm:$0xf] }
 0x37c   : > { %v3599_v7 = vsel %vm12805_vm9, %v3591_v18, %v3598_v28  ;;  %v3824_v50 = vsel %vm12799_vm8, %v3600_v27, %v3823_v48  ;;  %3814 = vst [vmem:[#allocation2 + $0x90] sm:$0xf] %v3813_v35  ;;  %v4107_v8 = vrot.slane %v4106_v10, 4  ;;  %v4117_v20 = vshll.u32 %v3980_v30, 16 }
 0x37d   : > { %3822 = vst [vmem:[#allocation2 + $0xa0] sm:$0xf] %v3599_v7  ;;  %3825 = vst [vmem:[#allocation2 + $0xa4] sm:$0x1] %v3824_v50  ;;  %v3582_v53 = vsel %vm12805_vm9, %v3574_v22, %v3581_v55  ;;  %v3817_v37 = vsel %vm12799_vm8, %v3583_v49, %v3816_v61  ;;  %10723 = vmatpush3.bf16.msra.mxu1 %v11770_v38  ;;  %v4123_v21 = vshll.u32 %v3981_v2, 16  ;;  %v4127_v23 = vshrl.u32 %v3981_v2, 16 }
 0x37e   : > { %3815 = vst [vmem:[#allocation2 + $0x94] sm:$0xf] %v3582_v53  ;;  %3818 = vst [vmem:[#allocation2 + $0x98] sm:$0x1] %v3817_v37  ;;  %v4133_v40 = vshll.u32 %v4025_v11, 16  ;;  %v11130_v52 = vadd.f32 %v12972_v46, %v12768_v62  ;;  %10724 = vmatprep.subr.bf16.mxu1 %v11771_v31  ;;  %v4112_v16 = vsel %vm13027_vm13, %v4107_v8, %v4111_v1  ;;  %v4119_v63 = vrot.slane %v4117_v20, 5 }
 0x37f   : > { %v11131_v38 = vadd.f32 %v12976_v57, %v12770_v19  ;;  %v11132_v30 = vadd.f32 %v12982_v26, %v12772_v60  ;;  %v9306_v48 = vcombine.low %v4102_v17, %v4112_v16  ;;  %v4125_v32 = vrot.slane %v4123_v21, 5  ;;  %v13143_v53 = vld [vmem:[#allocation2 + $0x34] sm:$0xf] }
 0x380   : > { %v4129_v62 = vrot.slane %v4127_v23, 4  ;;  %v4135_v46 = vrot.slane %v4133_v40, 5  ;;  %v4120_v0 = vor.u32 %v4119_v63, %v4116_v51  ;;  %v3210_v24 = vadd.f32 %v13114_v56, %v11130_v52  ;;  %v11774_v37 = vld [vmem:[%s14777_s3 + $0x30] sm:$0xff]  }
 0x381   : > { %v3208_v61 = vadd.f32 %v13114_v56, %v11131_v38  ;;  %v3211_v19 = vadd.f32 %v13114_v56, %v11132_v30  ;;  %10725 = vmatpush3.bf16.msra.mxu1 %v11771_v31  ;;  %10690 = vmatprep.mubr.bf16.mxu1 %v9306_v48  ;;  %v11133_v57 = vadd.f32 %v12984_v36, %v12774_v43  ;;  %v4138_v26 = vshrl.u32 %v13109_v41, 16  ;;  %v3833_v8 = vld [vmem:[#allocation2 + $0xb4] sm:$0xf] }
 0x382   : > { %v4130_v60 = vor.u32 %v4129_v62, %v4125_v32  ;;  %v4141_v17 = vshll.u32 %v13109_v41, 16  ;;  %10726 = vmatprep.subr.bf16.mxu1 %v11772_v58  ;;  %v3893_v1 = vld [vmem:[#allocation2 + $0x9c] sm:$0x1]  ;;  %v4121_v3 = vrot.slane %v4120_v0, 4  ;;  %v3246_v18 = vmax.f32 %v3210_v24, 0.0 }
 0x383   : > { %v3244_v45 = vmax.f32 %v3208_v61, 0.0  ;;  %v3247_v2 = vmax.f32 %v3211_v19, 0.0  ;;  %v3894_v29 = vsel %vm12799_vm8, 0, %v3893_v1  ;;  %v3890_v31 = vld [vmem:[#allocation2 + $0x90] sm:$0x1]  ;;  %v3209_v36 = vadd.f32 %v13114_v56, %v11133_v57 }
 0x384   : > { %v3948_v34 = vld [vmem:[#allocation2 + $0xa4] sm:$0x1]  ;;  %v4131_v43 = vrot.slane %v4130_v60, 4  ;;  %v13131_v22 = vadd.f32 %v13003_v12, %v12781_v6  ;;  %3895 = vst [vmem:[#allocation2 + $0x9c] sm:$0x1] %v3894_v29  ;;  %v3891_v28 = vsel %vm12799_vm8, 0, %v3890_v31  ;;  %v4126_v55 = vsel %vm13027_vm13, %v4121_v3, %v4125_v32 }
 0x385   : > { %v3949_v27 = vsel %vm12840_vm10, 0, %v3948_v34  ;;  %v3945_v42 = vld [vmem:[#allocation2 + $0x98] sm:$0x1]  ;;  %v9746_v49 = vpack.c.bf16 %v3246_v18, %v3246_v18  ;;  %10727 = vmatpush3.bf16.msra.mxu1 %v11772_v58  ;;  %3892 = vst [vmem:[#allocation2 + $0x90] sm:$0x1] %v3891_v28  ;;  %v9744_v12 = vpack.c.bf16 %v3244_v45, %v3244_v45  ;;  %v9747_v11 = vpack.c.bf16 %v3247_v2, %v3247_v2 }
 0x386   : > { %3950 = vst [vmem:[#allocation2 + $0xa4] sm:$0x1] %v3949_v27  ;;  %v3946_v10 = vsel %vm12840_vm10, 0, %v3945_v42  ;;  %v4136_v6 = vsel %vm13027_vm13, %v4131_v43, %v4135_v46  ;;  %10728 = vmatprep.subr.bf16.mxu1 %v11773_v44  ;;  %v3245_v51 = vmax.f32 %v3209_v36, 0.0  ;;  %v3826_v58 = vld [vmem:[#allocation2 + $0xa8] sm:$0xf] }
 0x387   : > { %3947 = vst [vmem:[#allocation2 + $0x98] sm:$0x1] %v3946_v10  ;;  %v9307_v35 = vcombine.low %v4126_v55, %v4136_v6  ;;  %v3619_v7 = vshrl.u32 %v9746_v49, 16  ;;  %v3622_v50 = vshll.u32 %v9746_v49, 16  ;;  %v3602_v20 = vshrl.u32 %v9744_v12, 16  ;;  %v11775_v60 = vld [vmem:[%s14777_s3 + $0x38] sm:$0xff]  }
 0x388   : > { %v3605_v21 = vshll.u32 %v9744_v12, 16  ;;  %v3627_v23 = vshrl.u32 %v9747_v11, 16  ;;  %v3630_v40 = vshll.u32 %v9747_v11, 16  ;;  %v9745_v16 = vpack.c.bf16 %v3245_v51, %v3245_v51  ;;  %v3837_v24 = vld [vmem:[#allocation2 + $0xbc] sm:$0x1]  ;;  %v13168_v6 = vld [vmem:[%s14777_s3 + $0x80] sm:$0xff]  }
 0x389   : > { %10691 = vmatmul.mubr.bf16.gmra.mrb[24].mxu1 %v9307_v35  ;;  %v3621_v52 = vrot.slane %v3619_v7, 7  ;;  %v4140_v63 = vrot.slane %v4138_v26, 4  ;;  %v4143_v38 = vrot.slane %v4141_v17, 5  ;;  %v3604_v30 = vrot.slane %v3602_v20, 7  ;;  %v4026_v3 = vld [vmem:[#allocation2 + $0x38] sm:$0x1] }
 0x38a   : > { %v3629_v48 = vrot.slane %v3627_v23, 7  ;;  %v4147_v32 = vshll.u32 %v13143_v53, 16  ;;  %v4151_v62 = vshrl.u32 %v13143_v53, 16  ;;  %10729 = vmatpush3.bf16.msra.mxu1 %v11773_v44  ;;  %v3610_v61 = vshrl.u32 %v9745_v16, 16  ;;  %v13155_v29 = vld [vmem:[#allocation2 + $0x3c] sm:$0xf] }
 0x38b   : > { %v3624_v46 = vor.u32 %v3622_v50, %v3621_v52  ;;  %v3625_v0 = vrot.slane %v3621_v52, 4  ;;  %v3613_v19 = vshll.u32 %v9745_v16, 16  ;;  %10730 = vmatprep.subr.bf16.mxu1 %v11774_v37  ;;  %v3607_v57 = vor.u32 %v3605_v21, %v3604_v30  ;;  %v13157_v31 = vld [vmem:[#allocation2 + $0x40] sm:$0xf]  ;;  %v3830_v28 = vld [vmem:[#allocation2 + $0xb0] sm:$0x1] }
 0x38c   : > { %v3608_v26 = vrot.slane %v3604_v30, 4  ;;  %v3632_v17 = vor.u32 %v3630_v40, %v3629_v48  ;;  %v3634_v1 = vrot.slane %v3629_v48, 4  ;;  %v3612_v45 = vrot.slane %v3610_v61, 7  ;;  %v4027_v11 = vld [vmem:[#allocation2 + $0x44] sm:$0x1] }
 0x38d   : > { %v3834_v18 = vsel %vm12790_vm7, %v3624_v46, %v3833_v8  ;;  %v4144_v44 = vor.u32 %v4143_v38, %v4140_v63  ;;  %v4149_v2 = vrot.slane %v4147_v32, 5  ;;  %v3827_v34 = vsel %vm12790_vm7, %v3607_v57, %v3826_v58  ;;  %v13191_v46 = vld [vmem:[#allocation2 + $0x48] sm:$0xf] }
 0x38e   : > { %3835 = vst [vmem:[#allocation2 + $0xb4] sm:$0xf] %v3834_v18  ;;  %v3633_v43 = vsel %vm12805_vm9, %v3625_v0, %v3632_v17  ;;  %v3838_v36 = vsel %vm12799_vm8, %v3634_v1, %v3837_v24  ;;  %v4153_v27 = vrot.slane %v4151_v62, 4  ;;  %10731 = vmatpush3.bf16.msra.mxu1 %v11774_v37  ;;  %3828 = vst [vmem:[#allocation2 + $0xa8] sm:$0xf] %v3827_v34  ;;  %v3617_v55 = vrot.slane %v3612_v45, 4 }
 0x38f   : > { %3836 = vst [vmem:[#allocation2 + $0xb8] sm:$0xf] %v3633_v43  ;;  %3839 = vst [vmem:[#allocation2 + $0xbc] sm:$0x1] %v3838_v36  ;;  %v3615_v42 = vor.u32 %v3613_v19, %v3612_v45  ;;  %v4145_v49 = vrot.slane %v4144_v44, 4  ;;  %v4157_v10 = vshll.u32 %v4026_v3, 16  ;;  %10732 = vmatprep.subr.bf16.mxu1 %v11775_v60  ;;  %v3214_v63 = vadd.f32 %v13114_v56, %v13131_v22 }
 0x390   : > { %v4154_v12 = vor.u32 %v4153_v27, %v4149_v2  ;;  %v4162_v35 = vshrl.u32 %v13155_v29, 16  ;;  %v4165_v7 = vshll.u32 %v13155_v29, 16  ;;  %v4171_v50 = vshll.u32 %v13157_v31, 16 }
 0x391   : > { %v3616_v51 = vsel %vm12805_vm9, %v3608_v26, %v3615_v42  ;;  %v3831_v37 = vsel %vm12799_vm8, %v3617_v55, %v3830_v28  ;;  %v4150_v8 = vsel %vm13027_vm13, %v4145_v49, %v4149_v2  ;;  %v4159_v20 = vrot.slane %v4157_v10, 5 }
 0x392   : > { %3829 = vst [vmem:[#allocation2 + $0xac] sm:$0xf] %v3616_v51  ;;  %3832 = vst [vmem:[#allocation2 + $0xb0] sm:$0x1] %v3831_v37  ;;  %v4155_v21 = vrot.slane %v4154_v12, 4  ;;  %v4164_v23 = vrot.slane %v4162_v35, 4  ;;  %10733 = vmatpush3.bf16.msra.mxu1 %v11775_v60  ;;  %v11135_v38 = vadd.f32 %v13009_v15, %v12795_v13  ;;  %v11136_v32 = vadd.f32 %v13011_v14, %v12809_v33 }
 0x393   : > { %v4167_v40 = vrot.slane %v4165_v7, 5  ;;  %v4173_v52 = vrot.slane %v4171_v50, 5  ;;  %v4175_v58 = vshrl.u32 %v13157_v31, 16  ;;  %v4181_v16 = vshll.u32 %v4027_v11, 16  ;;  %10766 = vmatprep.subr.bf16.mxu1 %v13168_v6  ;;  %v13209_v12 = vld [vmem:[#allocation2 + $0x4c] sm:$0xf] }
 0x394   : > { %v4160_v30 = vsel %vm13027_vm13, %v4155_v21, %v4159_v20  ;;  %v11137_v62 = vadd.f32 %v13015_v47, %v12813_v54  ;;  %v3250_v19 = vmax.f32 %v3214_v63, 0.0  ;;  %v3212_v26 = vadd.f32 %v13114_v56, %v11135_v38  ;;  %v3847_v7 = vld [vmem:[#allocation2 + $0xcc] sm:$0xf]  ;;  %v3840_v21 = vld [vmem:[#allocation2 + $0xc0] sm:$0xf] }
 0x395   : > { %v4168_v48 = vor.u32 %v4167_v40, %v4164_v23  ;;  %v3899_v0 = vld [vmem:[#allocation2 + $0xb4] sm:$0x1]  ;;  %v9308_v24 = vcombine.low %v4150_v8, %v4160_v30  ;;  %v4177_v22 = vrot.slane %v4175_v58, 4  ;;  %v4183_v61 = vrot.slane %v4181_v16, 5  ;;  %v3896_v15 = vld [vmem:[#allocation2 + $0xa8] sm:$0x1] }
 0x396   : > { %v3900_v13 = vsel %vm12799_vm8, 0, %v3899_v0  ;;  %v3954_v60 = vld [vmem:[#allocation2 + $0xbc] sm:$0x1]  ;;  %v3215_v33 = vadd.f32 %v13114_v56, %v11136_v32  ;;  %v3897_v54 = vsel %vm12799_vm8, 0, %v3896_v15  ;;  %v9750_v17 = vpack.c.bf16 %v3250_v19, %v3250_v19  ;;  %v3851_v16 = vld [vmem:[#allocation2 + $0xd4] sm:$0x1] }
 0x397   : > { %v4169_v57 = vrot.slane %v4168_v48, 4  ;;  %3901 = vst [vmem:[#allocation2 + $0xb4] sm:$0x1] %v3900_v13  ;;  %v3955_v14 = vsel %vm12840_vm10, 0, %v3954_v60  ;;  %10694 = vmatprep.mubr.bf16.mxu1 %v9308_v24  ;;  %v4178_v47 = vor.u32 %v4177_v22, %v4173_v52  ;;  %3898 = vst [vmem:[#allocation2 + $0xa8] sm:$0x1] %v3897_v54  ;;  %v3213_v45 = vadd.f32 %v13114_v56, %v11137_v62 }
 0x398   : > { %3956 = vst [vmem:[#allocation2 + $0xbc] sm:$0x1] %v3955_v14  ;;  %v3248_v3 = vmax.f32 %v3212_v26, 0.0  ;;  %v3251_v18 = vmax.f32 %v3215_v33, 0.0  ;;  %v3653_v34 = vshrl.u32 %v9750_v17, 16  ;;  %v3656_v43 = vshll.u32 %v9750_v17, 16 }
 0x399   : > { %v4174_v1 = vsel %vm13027_vm13, %v4169_v57, %v4173_v52  ;;  %v3951_v44 = vld [vmem:[#allocation2 + $0xb0] sm:$0x1]  ;;  %v4179_v2 = vrot.slane %v4178_v47, 4  ;;  %v4186_v36 = vshrl.u32 %v13191_v46, 16  ;;  %v3249_v55 = vmax.f32 %v3213_v45, 0.0 }
 0x39a   : > { %v3952_v28 = vsel %vm12840_vm10, 0, %v3951_v44  ;;  %v9748_v27 = vpack.c.bf16 %v3248_v3, %v3248_v3  ;;  %v9751_v42 = vpack.c.bf16 %v3251_v18, %v3251_v18  ;;  %v3655_v10 = vrot.slane %v3653_v34, 7  ;;  %v13215_v62 = vld [vmem:[#allocation2 + $0x50] sm:$0x1]  ;;  %v13218_v24 = vld [vmem:[#allocation2 + $0x58] sm:$0xf] }
 0x39b   : > { %3953 = vst [vmem:[#allocation2 + $0xb0] sm:$0x1] %v3952_v28  ;;  %v4184_v49 = vsel %vm13027_vm13, %v4179_v2, %v4183_v61  ;;  %v4188_v56 = vrot.slane %v4186_v36, 4  ;;  %v4189_v11 = vshll.u32 %v13191_v46, 16  ;;  %v9749_v40 = vpack.c.bf16 %v3249_v55, %v3249_v55  ;;  %v13220_v15 = vld [vmem:[#allocation2 + $0x54] sm:$0xf] }
 0x39c   : > { %v9309_v35 = vcombine.low %v4174_v1, %v4184_v49  ;;  %v3636_v50 = vshrl.u32 %v9748_v27, 16  ;;  %v3639_v51 = vshll.u32 %v9748_v27, 16  ;;  %v3661_v37 = vshrl.u32 %v9751_v42, 16  ;;  %v3844_v17 = vld [vmem:[#allocation2 + $0xc8] sm:$0x1] }
 0x39d   : > { %v3658_v8 = vor.u32 %v3656_v43, %v3655_v10  ;;  %v3659_v20 = vrot.slane %v3655_v10, 4  ;;  %v3664_v23 = vshll.u32 %v9751_v42, 16  ;;  %v4191_v63 = vrot.slane %v4189_v11, 5  ;;  %v13229_v2 = vld [vmem:[#allocation2 + $0x5c] sm:$0x1] }
 0x39e   : > { %10695 = vmatmul.mubr.bf16.gmra.mrb[28].mxu1 %v9309_v35  ;;  %v3638_v52 = vrot.slane %v3636_v50, 7  ;;  %v3663_v58 = vrot.slane %v3661_v37, 7  ;;  %v4195_v38 = vshll.u32 %v13209_v12, 16  ;;  %v3644_v48 = vshrl.u32 %v9749_v40, 16  ;;  %v13235_v28 = vld [vmem:[#allocation2 + $0x60] sm:$0xf] }
 0x39f   : > { %v3848_v30 = vsel %vm12790_vm7, %v3658_v8, %v3847_v7  ;;  %v3647_v32 = vshll.u32 %v9749_v40, 16  ;;  %v4199_v0 = vshrl.u32 %v13209_v12, 16  ;;  %v4192_v57 = vor.u32 %v4191_v63, %v4188_v56  ;;  %v13244_v7 = vld [vmem:[#allocation2 + $0x64] sm:$0xf]  ;;  %v13257_v63 = vld [vmem:[#allocation2 + $0x68] sm:$0x1] }
 0x3a0   : > { %3849 = vst [vmem:[#allocation2 + $0xcc] sm:$0xf] %v3848_v30  ;;  %v3641_v22 = vor.u32 %v3639_v51, %v3638_v52  ;;  %v3642_v61 = vrot.slane %v3638_v52, 4  ;;  %v3666_v19 = vor.u32 %v3664_v23, %v3663_v58  ;;  %v3668_v13 = vrot.slane %v3663_v58, 4  ;;  %v13253_v52 = vld [vmem:[#allocation2 + $0x6c] sm:$0xf] }
 0x3a1   : > { %v3646_v60 = vrot.slane %v3644_v48, 7  ;;  %v4197_v26 = vrot.slane %v4195_v38, 5  ;;  %v4201_v33 = vrot.slane %v4199_v0, 4  ;;  %v4205_v1 = vshll.u32 %v13215_v62, 16  ;;  %v13255_v58 = vld [vmem:[#allocation2 + $0x70] sm:$0xf] }
 0x3a2   : > { %v3841_v54 = vsel %vm12790_vm7, %v3641_v22, %v3840_v21  ;;  %v3667_v14 = vsel %vm12805_vm9, %v3659_v20, %v3666_v19  ;;  %v3852_v47 = vsel %vm12799_vm8, %v3668_v13, %v3851_v16  ;;  %v4193_v45 = vrot.slane %v4192_v57, 4 }
 0x3a3   : > { %3842 = vst [vmem:[#allocation2 + $0xc0] sm:$0xf] %v3841_v54  ;;  %3850 = vst [vmem:[#allocation2 + $0xd0] sm:$0xf] %v3667_v14  ;;  %v3649_v3 = vor.u32 %v3647_v32, %v3646_v60  ;;  %v3651_v18 = vrot.slane %v3646_v60, 4  ;;  %v4202_v44 = vor.u32 %v4201_v33, %v4197_v26  ;;  %v4207_v39 = vrot.slane %v4205_v1, 5 }
 0x3a4   : > { %3853 = vst [vmem:[#allocation2 + $0xd4] sm:$0x1] %v3852_v47  ;;  %3972 = vst [vmem:[#allocation2 + $0xd0] sm:$0xf] %v11951_v59  ;;  %v4210_v34 = vshrl.u32 %v13220_v15, 16  ;;  %v4213_v43 = vshll.u32 %v13220_v15, 16  ;;  %v4198_v55 = vsel %vm13027_vm13, %v4193_v45, %v4197_v26 }
 0x3a5   : > { %v4219_v36 = vshll.u32 %v13218_v24, 16  ;;  %v3650_v27 = vsel %vm12805_vm9, %v3642_v61, %v3649_v3  ;;  %v3845_v42 = vsel %vm12799_vm8, %v3651_v18, %v3844_v17  ;;  %v4203_v49 = vrot.slane %v4202_v44, 4  ;;  %v13266_v33 = vld [vmem:[#allocation2 + $0x74] sm:$0x1]  ;;  %v13271_v1 = vld [vmem:[#allocation2 + $0x78] sm:$0xf] }
 0x3a6   : > { %3843 = vst [vmem:[#allocation2 + $0xc4] sm:$0xf] %v3650_v27  ;;  %3846 = vst [vmem:[#allocation2 + $0xc8] sm:$0x1] %v3845_v42  ;;  %v4212_v10 = vrot.slane %v4210_v34, 4  ;;  %v4215_v56 = vrot.slane %v4213_v43, 5 }
 0x3a7   : > { %v4221_v11 = vrot.slane %v4219_v36, 5  ;;  %v4223_v35 = vshrl.u32 %v13218_v24, 16  ;;  %v3905_v50 = vld [vmem:[#allocation2 + $0xcc] sm:$0x1]  ;;  %v4208_v9 = vsel %vm13027_vm13, %v4203_v49, %v4207_v39  ;;  %v4229_v51 = vshll.u32 %v13229_v2, 16 }
 0x3a8   : > { %v4234_v37 = vshrl.u32 %v13235_v28, 16  ;;  %v4237_v8 = vshll.u32 %v13235_v28, 16  ;;  %v3906_v20 = vsel %vm12799_vm8, 0, %v3905_v50  ;;  %v9310_v21 = vcombine.low %v4198_v55, %v4208_v9  ;;  %v13281_v27 = vld [vmem:[#allocation2 + $0x7c] sm:$0xf] }
 0x3a9   : > { %v4216_v23 = vor.u32 %v4215_v56, %v4212_v10  ;;  %v4225_v40 = vrot.slane %v4223_v35, 4  ;;  %3907 = vst [vmem:[#allocation2 + $0xcc] sm:$0x1] %v3906_v20  ;;  %v4231_v16 = vrot.slane %v4229_v51, 5  ;;  %v4243_v48 = vshll.u32 %v13244_v7, 16 }
 0x3aa   : > { %v4236_v38 = vrot.slane %v4234_v37, 4  ;;  %v4239_v30 = vrot.slane %v4237_v8, 5  ;;  %3971 = vst [vmem:[#allocation2 + $0xcc] sm:$0xf] %v11951_v59  ;;  %v3902_v32 = vld [vmem:[#allocation2 + $0xc0] sm:$0x1]  ;;  %10698 = vmatprep.mubr.bf16.mxu1 %v9310_v21 }
 0x3ab   : > { %v3960_v0 = vld [vmem:[#allocation2 + $0xd4] sm:$0x1]  ;;  %v4217_v22 = vrot.slane %v4216_v23, 4  ;;  %v4226_v61 = vor.u32 %v4225_v40, %v4221_v11  ;;  %v4247_v19 = vshrl.u32 %v13244_v7, 16  ;;  %v3903_v13 = vsel %vm12799_vm8, 0, %v3902_v32 }
 0x3ac   : > { %v3961_v60 = vsel %vm12840_vm10, 0, %v3960_v0  ;;  %v4240_v57 = vor.u32 %v4239_v30, %v4236_v38  ;;  %v4245_v26 = vrot.slane %v4243_v48, 5  ;;  %3904 = vst [vmem:[#allocation2 + $0xc0] sm:$0x1] %v3903_v13  ;;  %v4253_v17 = vshll.u32 %v13257_v63, 16 }
 0x3ad   : > { %3962 = vst [vmem:[#allocation2 + $0xd4] sm:$0x1] %v3961_v60  ;;  %v4222_v54 = vsel %vm13027_vm13, %v4217_v22, %v4221_v11  ;;  %v4227_v14 = vrot.slane %v4226_v61, 4  ;;  %v4249_v47 = vrot.slane %v4247_v19, 4  ;;  %v3957_v4 = vld [vmem:[#allocation2 + $0xc8] sm:$0x1] }
 0x3ae   : > { %3973 = vst [vmem:[#allocation2 + $0xd4] sm:$0x1] %v11951_v59  ;;  %v4241_v3 = vrot.slane %v4240_v57, 4  ;;  %v4258_v18 = vshrl.u32 %v13253_v52, 16  ;;  %v4261_v45 = vshll.u32 %v13253_v52, 16  ;;  %v4267_v44 = vshll.u32 %v13255_v58, 16 }
 0x3af   : > { %v3958_v39 = vsel %vm12840_vm10, 0, %v3957_v4  ;;  %v4232_v34 = vsel %vm13027_vm13, %v4227_v14, %v4231_v16  ;;  %v4250_v43 = vor.u32 %v4249_v47, %v4245_v26  ;;  %v4255_v36 = vrot.slane %v4253_v17, 5  ;;  %v13287_v50 = vld [vmem:[#allocation2 + $0x80] sm:$0x1]  ;;  %v13292_v8 = vld [vmem:[#allocation2 + $0x88] sm:$0xf] }
 0x3b0   : > { %3959 = vst [vmem:[#allocation2 + $0xc8] sm:$0x1] %v3958_v39  ;;  %v9311_v59 = vcombine.low %v4222_v54, %v4232_v34  ;;  %v4246_v42 = vsel %vm13027_vm13, %v4241_v3, %v4245_v26  ;;  %v4260_v55 = vrot.slane %v4258_v18, 4  ;;  %v4263_v49 = vrot.slane %v4261_v45, 5  ;;  %v13297_v16 = vld [vmem:[#allocation2 + $0x84] sm:$0xf] }
 0x3b1   : > { %v4251_v10 = vrot.slane %v4250_v43, 4  ;;  %v4269_v56 = vrot.slane %v4267_v44, 5  ;;  %v4271_v11 = vshrl.u32 %v13255_v58, 16  ;;  %v4277_v25 = vshll.u32 %v13266_v33, 16  ;;  %v13302_v57 = vld [vmem:[#allocation2 + $0x8c] sm:$0x1] }
 0x3b2   : > { %10699 = vmatmul.mubr.bf16.gmra.mrb[32].mxu1 %v9311_v59  ;;  %v4264_v35 = vor.u32 %v4263_v49, %v4260_v55  ;;  %v4282_v9 = vshrl.u32 %v13271_v1, 16  ;;  %v4285_v51 = vshll.u32 %v13271_v1, 16  ;;  %v4291_v37 = vshll.u32 %v13281_v27, 16  ;;  %v13308_v39 = vld [vmem:[#allocation2 + $0x90] sm:$0xf] }
 0x3b3   : > { %v4256_v20 = vsel %vm13027_vm13, %v4251_v10, %v4255_v36  ;;  %v4273_v21 = vrot.slane %v4271_v11, 4  ;;  %v4279_v23 = vrot.slane %v4277_v25, 5  ;;  %v4295_v40 = vshrl.u32 %v13281_v27, 16  ;;  %v13317_v11 = vld [vmem:[#allocation2 + $0x98] sm:$0x1] }
 0x3b4   : > { %v9312_v38 = vcombine.low %v4246_v42, %v4256_v20  ;;  %v4265_v30 = vrot.slane %v4264_v35, 4  ;;  %v4284_v48 = vrot.slane %v4282_v9, 4  ;;  %v4287_v32 = vrot.slane %v4285_v51, 5  ;;  %v13313_v42 = vld [vmem:[#allocation2 + $0x94] sm:$0xf] }
 0x3b5   : > { %v4274_v0 = vor.u32 %v4273_v21, %v4269_v56  ;;  %v4293_v22 = vrot.slane %v4291_v37, 5  ;;  %v4297_v61 = vrot.slane %v4295_v40, 4  ;;  %v4301_v19 = vshll.u32 %v13287_v50, 16  ;;  %v13323_v37 = vld [vmem:[#allocation2 + $0x9c] sm:$0xf] }
 0x3b6   : > { %10702 = vmatprep.mubr.bf16.mxu1 %v9312_v38  ;;  %v4270_v13 = vsel %vm13027_vm13, %v4265_v30, %v4269_v56  ;;  %v4288_v60 = vor.u32 %v4287_v32, %v4284_v48  ;;  %v4306_v26 = vshrl.u32 %v13297_v16, 16  ;;  %v4309_v54 = vshll.u32 %v13297_v16, 16 }
 0x3b7   : > { %v4275_v14 = vrot.slane %v4274_v0, 4  ;;  %v4298_v47 = vor.u32 %v4297_v61, %v4293_v22  ;;  %v4303_v17 = vrot.slane %v4301_v19, 5  ;;  %v4315_v4 = vshll.u32 %v13292_v8, 16  ;;  %v13328_v0 = vld [vmem:[#allocation2 + $0xa0] sm:$0xf] }
 0x3b8   : > { %v4289_v3 = vrot.slane %v4288_v60, 4  ;;  %v4308_v18 = vrot.slane %v4306_v26, 4  ;;  %v4311_v45 = vrot.slane %v4309_v54, 5  ;;  %v4319_v44 = vshrl.u32 %v13292_v8, 16 }
 0x3b9   : > { %v4280_v34 = vsel %vm13027_vm13, %v4275_v14, %v4279_v23  ;;  %v4299_v43 = vrot.slane %v4298_v47, 4  ;;  %v4317_v36 = vrot.slane %v4315_v4, 5  ;;  %v4325_v59 = vshll.u32 %v13302_v57, 16 }
 0x3ba   : > { %v9313_v55 = vcombine.low %v4270_v13, %v4280_v34  ;;  %v4294_v49 = vsel %vm13027_vm13, %v4289_v3, %v4293_v22  ;;  %v4312_v10 = vor.u32 %v4311_v45, %v4308_v18  ;;  %v4321_v56 = vrot.slane %v4319_v44, 4  ;;  %v13332_v13 = vld [vmem:[#allocation2 + $0xa4] sm:$0x1] }
 0x3bb   : > { %v4304_v25 = vsel %vm13027_vm13, %v4299_v43, %v4303_v17  ;;  %v4327_v35 = vrot.slane %v4325_v59, 5  ;;  %v4330_v9 = vshrl.u32 %v13308_v39, 16  ;;  %v4333_v51 = vshll.u32 %v13308_v39, 16  ;;  %v13336_v17 = vld [vmem:[#allocation2 + $0xa8] sm:$0xf] }
 0x3bc   : > { %10703 = vmatmul.mubr.bf16.gmra.mrb[36].mxu1 %v9313_v55  ;;  %v9314_v20 = vcombine.low %v4294_v49, %v4304_v25  ;;  %v4313_v21 = vrot.slane %v4312_v10, 4  ;;  %v4322_v23 = vor.u32 %v4321_v56, %v4317_v36  ;;  %v4339_v40 = vshll.u32 %v13313_v42, 16  ;;  %v13342_v59 = vld [vmem:[#allocation2 + $0xac] sm:$0xf]  ;;  %v13345_v56 = vld [vmem:[#allocation2 + $0xb0] sm:$0x1] }
 0x3bd   : > { %v4332_v38 = vrot.slane %v4330_v9, 4  ;;  %v4335_v30 = vrot.slane %v4333_v51, 5  ;;  %v4343_v48 = vshrl.u32 %v13313_v42, 16  ;;  %v4349_v32 = vshll.u32 %v13317_v11, 16 }
 0x3be   : > { %10706 = vmatprep.mubr.bf16.mxu1 %v9314_v20  ;;  %v4318_v22 = vsel %vm13027_vm13, %v4313_v21, %v4317_v36  ;;  %v4323_v61 = vrot.slane %v4322_v23, 4  ;;  %v4341_v19 = vrot.slane %v4339_v40, 5  ;;  %v4354_v60 = vshrl.u32 %v13323_v37, 16  ;;  %v13353_v23 = vld [vmem:[#allocation2 + $0xb8] sm:$0xf] }
 0x3bf   : > { %v4336_v26 = vor.u32 %v4335_v30, %v4332_v38  ;;  %v4345_v54 = vrot.slane %v4343_v48, 4  ;;  %v4351_v14 = vrot.slane %v4349_v32, 5  ;;  %v4357_v47 = vshll.u32 %v13323_v37, 16 }
 0x3c0   : > { %v4328_v4 = vsel %vm13027_vm13, %v4323_v61, %v4327_v35  ;;  %v4356_v3 = vrot.slane %v4354_v60, 4  ;;  %v4363_v18 = vshll.u32 %v13328_v0, 16  ;;  %v4367_v45 = vshrl.u32 %v13328_v0, 16  ;;  %v13348_v35 = vld [vmem:[#allocation2 + $0xb4] sm:$0xf] }
 0x3c1   : > { %v9315_v44 = vcombine.low %v4318_v22, %v4328_v4  ;;  %v4337_v34 = vrot.slane %v4336_v26, 4  ;;  %v4346_v43 = vor.u32 %v4345_v54, %v4341_v19  ;;  %v4359_v36 = vrot.slane %v4357_v47, 5 }
 0x3c2   : > { %v4365_v55 = vrot.slane %v4363_v18, 5  ;;  %v4369_v49 = vrot.slane %v4367_v45, 4  ;;  %v4373_v10 = vshll.u32 %v13332_v13, 16  ;;  %v4378_v25 = vshrl.u32 %v13336_v17, 16  ;;  %v13362_v45 = vld [vmem:[#allocation2 + $0xbc] sm:$0x1] }
 0x3c3   : > { %v4342_v9 = vsel %vm13027_vm13, %v4337_v34, %v4341_v19  ;;  %v4347_v51 = vrot.slane %v4346_v43, 4  ;;  %v4360_v20 = vor.u32 %v4359_v36, %v4356_v3  ;;  %v4381_v21 = vshll.u32 %v13336_v17, 16 }
 0x3c4   : > { %10707 = vmatmul.mubr.bf16.gmra.mrb[40].mxu1 %v9315_v44  ;;  %v4370_v40 = vor.u32 %v4369_v49, %v4365_v55  ;;  %v4375_v38 = vrot.slane %v4373_v10, 5  ;;  %v4380_v30 = vrot.slane %v4378_v25, 4  ;;  %v4387_v48 = vshll.u32 %v13342_v59, 16 }
 0x3c5   : > { %v4352_v32 = vsel %vm13027_vm13, %v4347_v51, %v4351_v14  ;;  %v4361_v22 = vrot.slane %v4360_v20, 4  ;;  %v4383_v61 = vrot.slane %v4381_v21, 5  ;;  %v4391_v60 = vshrl.u32 %v13342_v59, 16 }
 0x3c6   : > { %v9316_v19 = vcombine.low %v4342_v9, %v4352_v32  ;;  %v4371_v26 = vrot.slane %v4370_v40, 4  ;;  %v4389_v54 = vrot.slane %v4387_v48, 5  ;;  %v4397_v47 = vshll.u32 %v13345_v56, 16 }
 0x3c7   : > { %v4366_v4 = vsel %vm13027_vm13, %v4361_v22, %v4365_v55  ;;  %v4384_v3 = vor.u32 %v4383_v61, %v4380_v30  ;;  %v4393_v18 = vrot.slane %v4391_v60, 4  ;;  %v4402_v44 = vshrl.u32 %v13348_v35, 16 }
 0x3c8   : > { %10710 = vmatprep.mubr.bf16.mxu1 %v9316_v19  ;;  %v4376_v14 = vsel %vm13027_vm13, %v4371_v26, %v4375_v38  ;;  %v4399_v34 = vrot.slane %v4397_v47, 5  ;;  %v4405_v43 = vshll.u32 %v13348_v35, 16  ;;  %v4411_v36 = vshll.u32 %v13353_v23, 16 }
 0x3c9   : > { %v9317_v49 = vcombine.low %v4366_v4, %v4376_v14  ;;  %v4385_v10 = vrot.slane %v4384_v3, 4  ;;  %v4394_v25 = vor.u32 %v4393_v18, %v4389_v54  ;;  %v4404_v9 = vrot.slane %v4402_v44, 4  ;;  %v5030_v18 = vld [vmem:[#allocation2 + $0x78] sm:$0xe]  ;;  %v5031_v3 = vld [vmem:[#allocation2 + $0x84] sm:$0xe] }
 0x3ca   : > { %v4407_v55 = vrot.slane %v4405_v43, 5  ;;  %v4413_v51 = vrot.slane %v4411_v36, 5  ;;  %v4415_v20 = vshrl.u32 %v13353_v23, 16  ;;  %v4421_v21 = vshll.u32 %v13362_v45, 16 }
 0x3cb   : > { %v4390_v40 = vsel %vm13027_vm13, %v4385_v10, %v4389_v54  ;;  %v4395_v30 = vrot.slane %v4394_v25, 4  ;;  %v9334_v61 = vcombine.low %v13191_v46, %v13209_v12  ;;  %v11882_v25 = vld [vmem:[#allocation2] sm:$0xf]  ;;  %v5129_v43 = vrot.slane %v13244_v7, 5  ;;  %v5032_v54 = vld [vmem:[#allocation2 + $0x90] sm:$0xe] }
 0x3cc   : > { %10711 = vmatmul.mubr.bf16.gmra.mrb[44].mxu1 %v9317_v49  ;;  %v4408_v38 = vor.u32 %v4407_v55, %v4404_v9  ;;  %v4417_v48 = vrot.slane %v4415_v20, 4  ;;  %v4423_v22 = vrot.slane %v4421_v21, 5  ;;  %v13399_v9 = vld [vmem:[#allocation2 + $0x4] sm:$0xf]  ;;  %v11781_v20 = vld [vmem:[%s14777_s3 + $0x88] sm:$0xff]   ;;  %v5150_v4 = vrot.slane %v13292_v8, 5 }
 0x3cd   : > { %v4400_v32 = vsel %vm13027_vm13, %v4395_v30, %v4399_v34  ;;  %v9328_v55 = vcombine.low %v11882_v25, %v13399_v9  ;;  %v5026_v21 = vld [vmem:[#allocation2 + $0x48] sm:$0xe]  ;;  %v13405_v30 = vld [vmem:[#allocation2 + $0x10] sm:$0xf]  ;;  %v5028_v25 = vld [vmem:[#allocation2 + $0x60] sm:$0xe] }
 0x3ce   : > { %v9318_v60 = vcombine.low %v4390_v40, %v4400_v32  ;;  %v4409_v19 = vrot.slane %v4408_v38, 4  ;;  %v4418_v26 = vor.u32 %v4417_v48, %v4413_v51  ;;  %v11884_v40 = vld [vmem:[#allocation2 + $0xc] sm:$0xf]  ;;  %v5115_v48 = vrot.slane %v13209_v12, 5  ;;  %v11886_v32 = vld [vmem:[#allocation2 + $0x18] sm:$0xf] }
 0x3cf   : > { %v9329_v38 = vcombine.low %v11884_v40, %v13405_v30  ;;  %v5029_v49 = vld [vmem:[#allocation2 + $0x6c] sm:$0xe]  ;;  %v5132_v34 = vrot.slane %v13257_v63, 5  ;;  %v5143_v63 = vrot.slane %v13281_v27, 5  ;;  %v5181_v47 = vrot.slane %v13362_v45, 5  ;;  %v11799_v12 = vld [vmem:[%s14777_s3 + $0xb8] sm:$0xff]  }
 0x3d0   : > { %10714 = vmatprep.mubr.bf16.mxu1 %v9318_v60  ;;  %v4414_v44 = vsel %vm13027_vm13, %v4409_v19, %v4413_v51  ;;  %v4419_v14 = vrot.slane %v4418_v26, 4  ;;  %v5118_v19 = vrot.slane %v13215_v62, 5  ;;  %v5027_v26 = vld [vmem:[#allocation2 + $0x54] sm:$0xe]  ;;  %v9333_v62 = vcombine.low %v13155_v29, %v13157_v31  ;;  %v6657_v46 = vld [vmem:[#allocation2 + $0x90] sm:$0xe] }
 0x3d1   : > { %v9361_v36 = vrot.slane %v5029_v49, 9  ;;  %v11796_v31 = vld [vmem:[%s14777_s3 + $0xb0] sm:$0xff]  }
 0x3d2   : > { %v4424_v10 = vsel %vm13027_vm13, %v4419_v14, %v4423_v22  ;;  %v13409_v22 = vld [vmem:[#allocation2 + $0x1c] sm:$0xf]  ;;  %v5117_v14 = vrot.slane %v5115_v48, 4 }
 0x3d3   : > { %v9319_v51 = vcombine.low %v4414_v44, %v4424_v10  ;;  %v9330_v60 = vcombine.low %v11886_v32, %v13409_v22  ;;  %v9358_v44 = vrot.slane %v5026_v21, 9  ;;  %v5122_v10 = vrot.slane %v13218_v24, 5  ;;  %v7549_v21 = vld [vmem:[#allocation2 + $0x60] sm:$0xf] }
 0x3d4   : > { %v9332_v32 = vcombine.low %v13109_v41, %v13143_v53  ;;  %v13438_v41 = vsel %vm13424_vm0, %v5117_v14, %v5118_v19  ;;  %v9359_v53 = vrot.slane %v5027_v26, 9  ;;  %v5136_v26 = vrot.slane %v13255_v58, 5 }
 0x3d5   : > { %10715 = vmatmul.mubr.bf16.gmra.mrb[48].mxu1 %v9319_v51  ;;  %v13415_v51 = vld [vmem:[#allocation2 + $0x28] sm:$0xf]  ;;  %v5145_v14 = vrot.slane %v5143_v63, 4 }
 0x3d6   : > { %10734 = vmatprep.mubr.bf16.mxu1 %v9328_v55  ;;  %v11888_v55 = vld [vmem:[#allocation2 + $0x24] sm:$0xf]  ;;  %v13471_v49 = vsel %vm13424_vm0, %v9361_v36, %v5136_v26 }
 0x3d7   : > { %v9331_v40 = vcombine.low %v11888_v55, %v13415_v51  ;;  %v5124_v55 = vrot.slane %v5122_v10, 4 }
 0x3dd   : > { %10735 = vmatmul.mubr.bf16.vlgmr.msra.gmra.mrb[20].mxu1 %v9329_v38  ;;  %v5125_v38 = vrot.slane %v13229_v2, 5  ;;  %v9360_v2 = vrot.slane %v5028_v25, 9  ;;  %v5131_v25 = vrot.slane %v5129_v43, 4 }
 0x3de   : > { %10738 = vmatprep.mubr.bf16.mxu1 %v9330_v60  ;;  %10767 = vmatpush3.bf16.msra.mxu1 %v13168_v6  ;;  %v11784_v6 = vld [vmem:[%s14777_s3 + $0x90] sm:$0xff]   ;;  %v13434_v60 = vsel %vm13424_vm0, %v9358_v44, %v5115_v48  ;;  %v13446_v48 = vsel %vm13424_vm0, %v9359_v53, %v5122_v10  ;;  %v5139_v44 = vrot.slane %v13266_v33, 5  ;;  %v11787_v10 = vld [vmem:[%s14777_s3 + $0x98] sm:$0xff]   ;;  %v5138_v53 = vrot.slane %v5136_v26, 4 }
 0x3df   : > { %10768 = vmatprep.subr.bf16.mxu1 %v11781_v20  ;;  %v13450_v19 = vsel %vm13424_vm0, %v5124_v55, %v5125_v38  ;;  %v13462_v38 = vsel %vm13424_vm0, %v9360_v2, %v5129_v43  ;;  %v9362_v33 = vrot.slane %v5030_v18, 9  ;;  %v13467_v55 = vsel %vm13424_vm0, %v5131_v25, %v5132_v34  ;;  %v5033_v25 = vld [vmem:[#allocation2 + $0x9c] sm:$0xe]  ;;  %v5035_v43 = vld [vmem:[#allocation2 + $0xb4] sm:$0xe] }
 0x3e0   : > { %v13478_v18 = vsel %vm13424_vm0, %v5138_v53, %v5139_v44  ;;  %v5153_v34 = vrot.slane %v13302_v57, 5  ;;  %v5152_v26 = vrot.slane %v5150_v4, 4  ;;  %v11790_v57 = vld [vmem:[%s14777_s3 + $0xa0] sm:$0xff]   ;;  %v5160_v44 = vrot.slane %v13317_v11, 5 }
 0x3e1   : > { %v13485_v2 = vsel %vm13424_vm0, %v9362_v33, %v5143_v63  ;;  %v5034_v63 = vld [vmem:[#allocation2 + $0xa8] sm:$0xe]  ;;  %v5164_v33 = vrot.slane %v13328_v0, 5  ;;  %v9365_v36 = vrot.slane %v5033_v25, 9  ;;  %v5171_v11 = vrot.slane %v13342_v59, 5 }
 0x3e2   : > { %10769 = vmatpush3.bf16.msra.mxu1 %v11781_v20  ;;  %v5146_v20 = vrot.slane %v13287_v50, 5  ;;  %v9363_v50 = vrot.slane %v5031_v3, 9  ;;  %v13504_v53 = vsel %vm13424_vm0, %v5152_v26, %v5153_v34  ;;  %v9366_v34 = vrot.slane %v5034_v63, 9 }
 0x3e3   : > { %10770 = vmatprep.subr.bf16.mxu1 %v11784_v6  ;;  %v5174_v26 = vrot.slane %v13345_v56, 5  ;;  %v9367_v63 = vrot.slane %v5035_v43, 9  ;;  %v14864_v43 = vcombine.low %v13235_v28, %v13244_v7  ;;  %v14868_v28 = vcombine.low %v13308_v39, %v13313_v42 }
 0x3e4   : > { %v5073_v7 = vrot.slane %v13399_v9, 5  ;;  %v5080_v39 = vrot.slane %v13405_v30, 5  ;;  %v11891_v9 = vld [vmem:[#allocation2 + $0x14] sm:$0x1] }
 0x3e5   : > { %10739 = vmatmul.mubr.bf16.gmra.mrb[24].mxu1 %v9331_v40  ;;  %v13489_v40 = vsel %vm13424_vm0, %v5145_v14, %v5146_v20  ;;  %v13500_v14 = vsel %vm13424_vm0, %v9363_v50, %v5150_v4  ;;  %v5167_v20 = vrot.slane %v13332_v13, 5  ;;  %v5166_v50 = vrot.slane %v5164_v33, 4  ;;  %v11793_v13 = vld [vmem:[%s14777_s3 + $0xa8] sm:$0xff]  }
 0x3e6   : > { %10742 = vmatprep.mubr.bf16.mxu1 %v9332_v32  ;;  %10771 = vmatpush3.bf16.msra.mxu1 %v11784_v6  ;;  %v9364_v32 = vrot.slane %v5032_v54, 9  ;;  %v5157_v6 = vrot.slane %v13313_v42, 5  ;;  %v5173_v54 = vrot.slane %v5171_v11, 4  ;;  %v5087_v42 = vrot.slane %v13409_v22, 5 }
 0x3e7   : > { %10772 = vmatprep.subr.bf16.mxu1 %v11787_v10  ;;  %v13532_v56 = vsel %vm13424_vm0, %v5166_v50, %v5167_v20  ;;  %v5020_v20 = vld [vmem:[#allocation2] sm:$0xe]  ;;  %v11890_v50 = vld [vmem:[#allocation2 + $0x8] sm:$0x1] }
 0x3e8   : > { %v5159_v3 = vrot.slane %v5157_v6, 4  ;;  %v13513_v4 = vsel %vm13424_vm0, %v9364_v32, %v5157_v6  ;;  %v5178_v32 = vrot.slane %v13353_v23, 5 }
 0x3ea   : > { %10773 = vmatpush3.bf16.msra.mxu1 %v11787_v10  ;;  %v13521_v25 = vsel %vm13424_vm0, %v5159_v3, %v5160_v44  ;;  %v13525_v10 = vsel %vm13424_vm0, %v9365_v36, %v5164_v33  ;;  %v13542_v3 = vsel %vm13424_vm0, %v9366_v34, %v5171_v11  ;;  %v13546_v44 = vsel %vm13424_vm0, %v5173_v54, %v5174_v26 }
 0x3eb   : > { %10774 = vmatprep.subr.bf16.mxu1 %v11790_v57  ;;  %v5180_v33 = vrot.slane %v5178_v32, 4  ;;  %v13558_v45 = vsel %vm13424_vm0, %v9367_v63, %v5178_v32  ;;  %v9352_v54 = vrot.slane %v5020_v20, 9  ;;  %v5075_v11 = vrot.slane %v5073_v7, 4  ;;  %v11895_v20 = vld [vmem:[#allocation2 + $0x38] sm:$0x1] }
 0x3ec   : > { %v5083_v34 = vrot.slane %v11891_v9, 5  ;;  %v5082_v26 = vrot.slane %v5080_v39, 4  ;;  %v5089_v32 = vrot.slane %v5087_v42, 4  ;;  %v14890_v29 = vcombine.low %v13513_v4, %v13521_v25 }
 0x3ed   : > { %10743 = vmatmul.mubr.bf16.gmra.mrb[28].mxu1 %v9333_v62  ;;  %v13562_v62 = vsel %vm13424_vm0, %v5180_v33, %v5181_v47  ;;  %v11800_v47 = vld [vmem:[%s14777_s3 + $0xc0] sm:$0xff]  }
 0x3ee   : > { %10746 = vmatprep.mubr.bf16.mxu1 %v9334_v61  ;;  %10775 = vmatpush3.bf16.msra.mxu1 %v11790_v57  ;;  %v14863_v61 = vcombine.low %v13220_v15, %v13218_v24  ;;  %v14865_v57 = vcombine.low %v13253_v52, %v13255_v58  ;;  %v14866_v24 = vcombine.low %v13271_v1, %v13281_v27  ;;  %v5076_v52 = vrot.slane %v11890_v50, 5 }
 0x3ef   : > { %10776 = vmatprep.subr.bf16.mxu1 %v11793_v13  ;;  %v14867_v15 = vcombine.low %v13297_v16, %v13292_v8  ;;  %v14869_v58 = vcombine.low %v13323_v37, %v13328_v0  ;;  %v14870_v1 = vcombine.low %v13336_v17, %v13342_v59  ;;  %v5074_v27 = vsel %vm13424_vm0, %v9352_v54, %v5073_v7  ;;  %v5021_v0 = vld [vmem:[#allocation2 + $0xc] sm:$0xe]  ;;  %v11892_v17 = vld [vmem:[#allocation2 + $0x20] sm:$0x1]  ;;  %v5023_v7 = vld [vmem:[#allocation2 + $0x24] sm:$0xe] }
 0x3f0   : > { %v5077_v8 = vsel %vm13424_vm0, %v5075_v11, %v5076_v52  ;;  %v14871_v37 = vcombine.low %v13348_v35, %v13353_v23  ;;  %v5090_v59 = vrot.slane %v11892_v17, 5  ;;  %v9353_v63 = vrot.slane %v5021_v0, 9  ;;  %v5024_v11 = vld [vmem:[#allocation2 + $0x30] sm:$0xe]  ;;  %v11897_v0 = vld [vmem:[#allocation2 + $0x44] sm:$0x1] }
 0x3f1   : > { %v9384_v16 = vcombine.low %v5074_v27, %v5077_v8  ;;  %v5084_v33 = vsel %vm13424_vm0, %v5082_v26, %v5083_v34  ;;  %v5094_v35 = vrot.slane %v13415_v51, 5  ;;  %v5104_v54 = vrot.slane %v11895_v20, 5  ;;  %v11802_v52 = vld [vmem:[%s14777_s3 + $0xd0] sm:$0xff]   ;;  %v11803_v34 = vld [vmem:[%s14777_s3 + $0xd8] sm:$0xff]  }
 0x3f2   : > { %10777 = vmatpush3.bf16.msra.mxu1 %v11793_v13  ;;  %v5022_v13 = vld [vmem:[#allocation2 + $0x18] sm:$0xe]  ;;  %v5091_v22 = vsel %vm13424_vm0, %v5089_v32, %v5090_v59  ;;  %v9356_v27 = vrot.slane %v5024_v11, 9  ;;  %v5111_v17 = vrot.slane %v11897_v0, 5  ;;  %v5025_v59 = vld [vmem:[#allocation2 + $0x3c] sm:$0xe] }
 0x3f3   : > { %10778 = vmatprep.subr.bf16.mxu1 %v11796_v31  ;;  %v9354_v30 = vrot.slane %v5022_v13, 9  ;;  %v5096_v51 = vrot.slane %v5094_v35, 4  ;;  %v11804_v13 = vld [vmem:[%s14777_s3 + $0xe0] sm:$0xff]   ;;  %v9357_v32 = vrot.slane %v5025_v59, 9  ;;  %v6650_v11 = vld [vmem:[#allocation2 + $0x3c] sm:$0xe] }
 0x3f4   : > { %v6652_v59 = vld [vmem:[#allocation2 + $0x54] sm:$0xe] }
 0x3f5   : > { %10747 = vmatmul.mubr.bf16.gmra.mrb[32].mxu1 %v14863_v61  ;;  %v11801_v61 = vld [vmem:[%s14777_s3 + $0xc8] sm:$0xff]  }
 0x3f6   : > { %10750 = vmatprep.mubr.bf16.mxu1 %v14864_v43  ;;  %10779 = vmatpush3.bf16.msra.mxu1 %v11796_v31  ;;  %v5081_v31 = vsel %vm13424_vm0, %v9353_v63, %v5080_v39  ;;  %v11893_v43 = vld [vmem:[#allocation2 + $0x34] sm:$0xf] }
 0x3f7   : > { %10780 = vmatprep.subr.bf16.mxu1 %v11799_v12  ;;  %v9385_v23 = vcombine.low %v5081_v31, %v5084_v33  ;;  %v14872_v31 = vcombine.low %v13434_v60, %v13438_v41  ;;  %v11807_v60 = vld [vmem:[%s14777_s3 + $0xf8] sm:$0xff]  }
 0x3f8   : > { %v13657_v41 = vld [vmem:[#allocation2 + $0x38] sm:$0x1] }
 0x3fa   : > { %10781 = vmatpush3.bf16.msra.mxu1 %v11799_v12  ;;  %v5088_v12 = vsel %vm13424_vm0, %v9354_v30, %v5087_v42 }
 0x3fb   : > { %10814 = vmatprep.subr.bf16.mxu1 %v11800_v47 }
 0x3fd   : > { %10751 = vmatmul.mubr.bf16.gmra.mrb[36].mxu1 %v14865_v57  ;;  %v5101_v57 = vrot.slane %v11893_v43, 5  ;;  %v6648_v43 = vld [vmem:[#allocation2 + $0x24] sm:$0xe] }
 0x3fe   : > { %10754 = vmatprep.mubr.bf16.mxu1 %v14866_v24  ;;  %v9386_v24 = vcombine.low %v5088_v12, %v5091_v22  ;;  %v11805_v22 = vld [vmem:[%s14777_s3 + $0xe8] sm:$0xff]   ;;  %v9490_v20 = vrot.slane %v6648_v43, 9 }
 0x3ff   : > { %v5103_v50 = vrot.slane %v5101_v57, 4  ;;  %v5102_v9 = vsel %vm13424_vm0, %v9356_v27, %v5101_v57  ;;  %v13650_v12 = vld [vmem:[#allocation2 + $0x2c] sm:$0x1]  ;;  %v6649_v57 = vld [vmem:[#allocation2 + $0x30] sm:$0xe] }
 0x400   : > { %v6651_v27 = vld [vmem:[#allocation2 + $0x48] sm:$0xe] }
 0x401   : > { %v5105_v8 = vsel %vm13424_vm0, %v5103_v50, %v5104_v54  ;;  %v14874_v50 = vcombine.low %v13462_v38, %v13467_v55  ;;  %v6736_v55 = vrot.slane %v13657_v41, 5  ;;  %v9493_v0 = vrot.slane %v6651_v27, 9 }
 0x405   : > { %10755 = vmatmul.mubr.bf16.gmra.mrb[40].mxu1 %v14867_v15  ;;  %v11894_v15 = vld [vmem:[#allocation2 + $0x2c] sm:$0x1] }
 0x406   : > { %10758 = vmatprep.mubr.bf16.mxu1 %v14868_v28  ;;  %v5097_v28 = vrot.slane %v11894_v15, 5  ;;  %v13661_v15 = vld [vmem:[#allocation2 + $0x44] sm:$0x1] }
 0x40d   : > { %10759 = vmatmul.mubr.bf16.gmra.mrb[44].mxu1 %v14869_v58  ;;  %v9355_v58 = vrot.slane %v5023_v7, 9  ;;  %v14873_v7 = vcombine.low %v13446_v48, %v13450_v19  ;;  %v13679_v48 = vld [vmem:[%s14777_s3 + $0x100] sm:$0xff]   ;;  %v13681_v19 = vld [vmem:[#allocation2 + $0x58] sm:$0xf] }
 0x40e   : > { %10762 = vmatprep.mubr.bf16.mxu1 %v14870_v1  ;;  %v5098_v1 = vsel %vm13424_vm0, %v5096_v51, %v5097_v28  ;;  %v13663_v28 = vld [vmem:[#allocation2 + $0x4c] sm:$0xf]  ;;  %v6729_v51 = vrot.slane %v13650_v12, 5 }
 0x415   : > { %10763 = vmatmul.mubr.bf16.gmra.mrb[48].mxu1 %v14871_v37  ;;  %v9388_v37 = vcombine.low %v5102_v9, %v5105_v8 }
 0x416   : > { %10782 = vmatprep.mubr.bf16.mxu1 %v9384_v16  ;;  %v5095_v16 = vsel %vm13424_vm0, %v9355_v58, %v5094_v35  ;;  %v11806_v35 = vld [vmem:[%s14777_s3 + $0xf0] sm:$0xff]   ;;  %v9491_v58 = vrot.slane %v6649_v57, 9 }
 0x417   : > { %v9387_v42 = vcombine.low %v5095_v16, %v5098_v1  ;;  %v13688_v16 = vld [vmem:[#allocation2 + $0x5c] sm:$0x1] }
 0x41d   : > { %10783 = vmatmul.mubr.bf16.vlgmr.msra.gmra.mrb[20].mxu1 %v9385_v23  ;;  %v13648_v23 = vld [vmem:[#allocation2 + $0x28] sm:$0xf] }
 0x41e   : > { %10786 = vmatprep.mubr.bf16.mxu1 %v9386_v24  ;;  %10815 = vmatpush3.bf16.msra.mxu1 %v11800_v47  ;;  %v11896_v47 = vld [vmem:[#allocation2 + $0x40] sm:$0xf]  ;;  %v6726_v54 = vrot.slane %v13648_v23, 5 }
 0x41f   : > { %10816 = vmatprep.subr.bf16.mxu1 %v11801_v61  ;;  %v5108_v39 = vrot.slane %v11896_v47, 5  ;;  %v13659_v24 = vld [vmem:[#allocation2 + $0x40] sm:$0xf] }
 0x420   : > { %v13685_v8 = vsel %vm13424_vm0, %v9490_v20, %v6726_v54  ;;  %v6728_v38 = vrot.slane %v6726_v54, 4  ;;  %v6740_v9 = vrot.slane %v13659_v24, 5  ;;  %v9494_v54 = vrot.slane %v6652_v59, 9 }
 0x421   : > { %v5110_v26 = vrot.slane %v5108_v39, 4  ;;  %v5109_v33 = vsel %vm13424_vm0, %v9357_v32, %v5108_v39 }
 0x422   : > { %10817 = vmatpush3.bf16.msra.mxu1 %v11801_v61  ;;  %v13652_v61 = vld [vmem:[#allocation2 + $0x34] sm:$0xf] }
 0x423   : > { %10818 = vmatprep.subr.bf16.mxu1 %v11802_v52  ;;  %v5112_v63 = vsel %vm13424_vm0, %v5110_v26, %v5111_v17  ;;  %v6733_v1 = vrot.slane %v13652_v61, 5  ;;  %v6747_v17 = vrot.slane %v13663_v28, 5  ;;  %v13701_v26 = vld [vmem:[#allocation2 + $0x64] sm:$0xf] }
 0x424   : > { %v9389_v30 = vcombine.low %v5109_v33, %v5112_v63  ;;  %v6742_v33 = vrot.slane %v6740_v9, 4 }
 0x425   : > { %10787 = vmatmul.mubr.bf16.gmra.mrb[24].mxu1 %v9387_v42  ;;  %v13692_v47 = vsel %vm13424_vm0, %v9491_v58, %v6733_v1  ;;  %v6735_v39 = vrot.slane %v6733_v1, 4  ;;  %v9492_v42 = vrot.slane %v6650_v11, 9  ;;  %v13722_v43 = vsel %vm13424_vm0, %v9493_v0, %v6747_v17  ;;  %v13736_v58 = vld [vmem:[#allocation2 + $0x7c] sm:$0xf]  ;;  %v13751_v0 = vld [vmem:[#allocation2 + $0x80] sm:$0x1] }
 0x426   : > { %10790 = vmatprep.mubr.bf16.mxu1 %v9388_v37  ;;  %10819 = vmatpush3.bf16.msra.mxu1 %v11802_v52  ;;  %v13673_v52 = vld [vmem:[#allocation2 + $0x50] sm:$0x1]  ;;  %v6743_v37 = vrot.slane %v13661_v15, 5  ;;  %14876 = vst [vmem:[#allocation4_spill] sm:$0xff] %v13722_v43  ;;  %v6757_v11 = vrot.slane %v13688_v16, 5  ;;  %v11830_v43 = vld [vmem:[#allocation2 + $0xc0] sm:$0xff]  }
 0x427   : > { %10820 = vmatprep.subr.bf16.mxu1 %v11803_v34  ;;  %v13707_v32 = vsel %vm13424_vm0, %v6735_v39, %v6736_v55  ;;  %v13711_v63 = vsel %vm13424_vm0, %v9492_v42, %v6740_v9  ;;  %v6750_v57 = vrot.slane %v13673_v52, 5  ;;  %v6761_v55 = vrot.slane %v13701_v26, 5  ;;  %v6654_v39 = vld [vmem:[#allocation2 + $0x6c] sm:$0xe]  ;;  %v6656_v1 = vld [vmem:[#allocation2 + $0x84] sm:$0xe] }
 0x428   : > { %14875 = vst [vmem:[#allocation3_spill] sm:$0xff] %v13711_v63  ;;  %v13729_v20 = vsel %vm13424_vm0, %v6742_v33, %v6743_v37  ;;  %v14880_v42 = vcombine.low %v13485_v2, %v13489_v40  ;;  %v6655_v37 = vld [vmem:[#allocation2 + $0x78] sm:$0xe]  ;;  %v9498_v6 = vrot.slane %v6656_v1, 9  ;;  %v8291_v63 = vld [vmem:[#allocation2 + $0x60] sm:$0xe] }
 0x429   : > { %14877 = vst [vmem:[#allocation5_spill] sm:$0xff] %v13729_v20  ;;  %v6763_v2 = vrot.slane %v6761_v55, 4 }
 0x42a   : > { %10821 = vmatpush3.bf16.msra.mxu1 %v11803_v34  ;;  %v13697_v34 = vsel %vm13424_vm0, %v6728_v38, %v6729_v51  ;;  %v6754_v51 = vrot.slane %v13681_v19, 5 }
 0x42b   : > { %10822 = vmatprep.subr.bf16.mxu1 %v11804_v13 }
 0x42c   : > { %v13757_v59 = vsel %vm13424_vm0, %v9494_v54, %v6754_v51  ;;  %v13772_v54 = vld [vmem:[#allocation2 + $0x94] sm:$0xf] }
 0x42d   : > { %10791 = vmatmul.mubr.bf16.gmra.mrb[28].mxu1 %v9389_v30  ;;  %v6653_v30 = vld [vmem:[#allocation2 + $0x60] sm:$0xe]  ;;  %14881 = vst [vmem:[#allocation7_spill] sm:$0xff] %v13757_v59 }
 0x42e   : > { %10794 = vmatprep.mubr.bf16.mxu1 %v14872_v31  ;;  %10823 = vmatpush3.bf16.msra.mxu1 %v11804_v13  ;;  %v13716_v31 = vld [vmem:[#allocation2 + $0x70] sm:$0xf]  ;;  %v9495_v38 = vrot.slane %v6653_v30, 9  ;;  %v13764_v30 = vld [vmem:[#allocation2 + $0x8c] sm:$0x1]  ;;  %v6778_v13 = vrot.slane %v13751_v0, 5 }
 0x42f   : > { %10824 = vmatprep.subr.bf16.mxu1 %v11805_v22  ;;  %v6768_v40 = vrot.slane %v13716_v31, 5 }
 0x430   : > { %v13761_v33 = vsel %vm13424_vm0, %v9495_v38, %v6761_v55 }
 0x431   : > { %14882 = vst [vmem:[#allocation8_spill] sm:$0xff] %v13761_v33  ;;  %v6770_v55 = vrot.slane %v6768_v40, 4 }
 0x432   : > { %10825 = vmatpush3.bf16.msra.mxu1 %v11805_v22  ;;  %v13714_v22 = vld [vmem:[#allocation2 + $0x68] sm:$0x1] }
 0x433   : > { %10826 = vmatprep.subr.bf16.mxu1 %v11806_v35  ;;  %v6764_v9 = vrot.slane %v13714_v22, 5 }
 0x435   : > { %10795 = vmatmul.mubr.bf16.gmra.mrb[32].mxu1 %v14873_v7  ;;  %v13725_v7 = vld [vmem:[#allocation2 + $0x74] sm:$0x1]  ;;  %v13778_v38 = vsel %vm13424_vm0, %v6763_v2, %v6764_v9 }
 0x436   : > { %10798 = vmatprep.mubr.bf16.mxu1 %v14874_v50  ;;  %10827 = vmatpush3.bf16.msra.mxu1 %v11806_v35  ;;  %v14878_v50 = vcombine.low %v13471_v49, %v13478_v18  ;;  %v6756_v18 = vrot.slane %v6754_v51, 4  ;;  %14884 = vst [vmem:[#allocation10_spill] sm:$0xff] %v13778_v38  ;;  %v9497_v49 = vrot.slane %v6655_v37, 9  ;;  %v5927_v35 = vld [vmem:[#allocation2 + $0x98] sm:$0x1]  ;;  %v9499_v38 = vrot.slane %v6657_v46, 9 }
 0x437   : > { %10828 = vmatprep.subr.bf16.mxu1 %v11807_v60  ;;  %v13787_v51 = vld [vmem:[#allocation2 + $0xa0] sm:$0xf]  ;;  %v6792_v33 = vrot.slane %v5927_v35, 5 }
 0x43a   : > { %10829 = vmatpush3.bf16.msra.mxu1 %v11807_v60  ;;  %v6749_v60 = vrot.slane %v6747_v17, 4  ;;  %v13753_v17 = vld [vmem:[#allocation2 + $0x88] sm:$0xf] }
 0x43b   : > { %10862 = vmatprep.subr.bf16.mxu1 %v13679_v48  ;;  %v6782_v2 = vrot.slane %v13753_v17, 5 }
 0x43c   : > { %v13742_v27 = vsel %vm13424_vm0, %v6749_v60, %v6750_v57  ;;  %v13768_v60 = vsel %vm13424_vm0, %v6756_v18, %v6757_v11  ;;  %v9496_v57 = vrot.slane %v6654_v39, 9  ;;  %v6785_v11 = vrot.slane %v13764_v30, 5 }
 0x43d   : > { %10799 = vmatmul.mubr.bf16.gmra.mrb[36].mxu1 %v14878_v50  ;;  %14879 = vst [vmem:[#allocation6_spill] sm:$0xff] %v13742_v27  ;;  %14883 = vst [vmem:[#allocation9_spill] sm:$0xff] %v13768_v60  ;;  %v6771_v50 = vrot.slane %v13725_v7, 5  ;;  %v6658_v60 = vld [vmem:[#allocation2 + $0x9c] sm:$0xe]  ;;  %v13816_v1 = vsel %vm13424_vm0, %v9498_v6, %v6782_v2 }
 0x43e   : > { %10802 = vmatprep.mubr.bf16.mxu1 %v14880_v42  ;;  %v6775_v42 = vrot.slane %v13736_v58, 5  ;;  %v13784_v39 = vsel %vm13424_vm0, %v9496_v57, %v6768_v40  ;;  %v5930_v40 = vld [vmem:[#allocation2 + $0xa4] sm:$0x1]  ;;  %v5932_v57 = vld [vmem:[#allocation2 + $0xac] sm:$0xf]  ;;  %14891 = vst [vmem:[#allocation15_spill] sm:$0xff] %v13816_v1 }
 0x43f   : > { %14885 = vst [vmem:[#allocation11_spill] sm:$0xff] %v13784_v39  ;;  %v13791_v9 = vsel %vm13424_vm0, %v6770_v55, %v6771_v50  ;;  %v6789_v50 = vrot.slane %v13772_v54, 5  ;;  %v6784_v55 = vrot.slane %v6782_v2, 4  ;;  %v6799_v4 = vrot.slane %v5930_v40, 5  ;;  %v7545_v27 = vld [vmem:[#allocation2 + $0x50] sm:$0x1] }
 0x440   : > { %v6777_v18 = vrot.slane %v6775_v42, 4  ;;  %14886 = vst [vmem:[#allocation12_spill] sm:$0xff] %v13791_v9  ;;  %v13795_v37 = vsel %vm13424_vm0, %v9497_v49, %v6775_v42  ;;  %v14889_v49 = vcombine.low %v13500_v14, %v13504_v53  ;;  %v6796_v14 = vrot.slane %v13787_v51, 5  ;;  %v6659_v53 = vld [vmem:[#allocation2 + $0xa8] sm:$0xe] }
 0x441   : > { %14887 = vst [vmem:[#allocation13_spill] sm:$0xff] %v13795_v37  ;;  %v5936_v9 = vld [vmem:[#allocation2 + $0xbc] sm:$0x1]  ;;  %v13821_v46 = vsel %vm13424_vm0, %v6784_v55, %v6785_v11  ;;  %v13825_v35 = vsel %vm13424_vm0, %v9499_v38, %v6789_v50  ;;  %v6803_v25 = vrot.slane %v5932_v57, 5  ;;  %v5939_v42 = vld [vmem:[#allocation2 + $0xc8] sm:$0x1] }
 0x442   : > { %v13803_v36 = vsel %vm13424_vm0, %v6777_v18, %v6778_v13  ;;  %v5933_v13 = vld [vmem:[#allocation2 + $0xb0] sm:$0x1]  ;;  %v6791_v18 = vrot.slane %v6789_v50, 4  ;;  %14892 = vst [vmem:[#allocation16_spill] sm:$0xff] %v13821_v46  ;;  %14893 = vst [vmem:[#allocation17_spill] sm:$0xff] %v13825_v35  ;;  %v6798_v37 = vrot.slane %v6796_v14, 4 }
 0x443   : > { %14888 = vst [vmem:[#allocation14_spill] sm:$0xff] %v13803_v36  ;;  %v9500_v36 = vrot.slane %v6658_v60, 9  ;;  %v9501_v55 = vrot.slane %v6659_v53, 9  ;;  %v6805_v39 = vrot.slane %v6803_v25, 4  ;;  %v6806_v38 = vrot.slane %v5933_v13, 5 }
 0x444   : > { %v13831_v2 = vsel %vm13424_vm0, %v6791_v18, %v6792_v33  ;;  %v6660_v50 = vld [vmem:[#allocation2 + $0xb4] sm:$0xe]  ;;  %v13841_v57 = vsel %vm13424_vm0, %v6798_v37, %v6799_v4  ;;  %v6813_v33 = vrot.slane %v5936_v9, 5  ;;  %v6661_v18 = vld [vmem:[#allocation2 + $0xc0] sm:$0xe]  ;;  %v14899_v9 = vcombine.low %v13525_v10, %v13532_v56 }
 0x445   : > { %10803 = vmatmul.mubr.bf16.gmra.mrb[40].mxu1 %v14889_v49  ;;  %v5935_v49 = vld [vmem:[#allocation2 + $0xb8] sm:$0xf]  ;;  %14894 = vst [vmem:[#allocation18_spill] sm:$0xff] %v13831_v2  ;;  %v13837_v40 = vsel %vm13424_vm0, %v9500_v36, %v6796_v14  ;;  %14896 = vst [vmem:[#allocation20_spill] sm:$0xff] %v13841_v57  ;;  %v13847_v53 = vsel %vm13424_vm0, %v9501_v55, %v6803_v25  ;;  %v13851_v13 = vsel %vm13424_vm0, %v6805_v39, %v6806_v38  ;;  %v11813_v38 = vld [vmem:[%s14777_s3 + $0x108] sm:$0xff]  }
 0x446   : > { %10806 = vmatprep.mubr.bf16.mxu1 %v14890_v29  ;;  %v5938_v29 = vld [vmem:[#allocation2 + $0xc4] sm:$0xf]  ;;  %14895 = vst [vmem:[#allocation19_spill] sm:$0xff] %v13837_v40  ;;  %v6810_v6 = vrot.slane %v5935_v49, 5  ;;  %14897 = vst [vmem:[#allocation21_spill] sm:$0xff] %v13847_v53  ;;  %v9502_v37 = vrot.slane %v6660_v50, 9  ;;  %v14900_v25 = vcombine.low %v13542_v3, %v13546_v44 }
 0x447   : > { %14898 = vst [vmem:[#allocation22_spill] sm:$0xff] %v13851_v13  ;;  %v6817_v36 = vrot.slane %v5938_v29, 5  ;;  %v6820_v49 = vrot.slane %v5939_v42, 5  ;;  %v9503_v60 = vrot.slane %v6661_v18, 9  ;;  %v11808_v44 = vld [vmem:[#allocation2 + $0xc] sm:$0xff]   ;;  %v11809_v55 = vld [vmem:[#allocation2 + $0x18] sm:$0xff]  }
 0x448   : > { %v6812_v4 = vrot.slane %v6810_v6, 4  ;;  %v13863_v39 = vsel %vm13424_vm0, %v9502_v37, %v6810_v6  ;;  %v14905_v6 = vcombine.low %v13558_v45, %v13562_v62  ;;  %v11811_v50 = vld [vmem:[#allocation2 + $0x24] sm:$0xff]   ;;  %v11812_v45 = vld [vmem:[#allocation2 + $0x30] sm:$0xff]   ;;  %v11819_v62 = vld [vmem:[%s14777_s3 + $0x118] sm:$0xff]   ;;  %v6022_v46 = vshll.u32 %v13652_v61, 16 }
 0x449   : > { %v6819_v11 = vrot.slane %v6817_v36, 4  ;;  %14901 = vst [vmem:[#allocation23_spill] sm:$0xff] %v13863_v39  ;;  %v13873_v10 = vsel %vm13424_vm0, %v9503_v60, %v6817_v36  ;;  %v11814_v36 = vld [vmem:[#allocation2 + $0x3c] sm:$0xff]   ;;  %v13894_v37 = vld [vmem:[#allocation2 + $0x10] sm:$0xf]  ;;  %v11817_v3 = vld [vmem:[#allocation2 + $0x54] sm:$0xff]  }
 0x44a   : > { %v13867_v29 = vsel %vm13424_vm0, %v6812_v4, %v6813_v33  ;;  %14903 = vst [vmem:[#allocation25_spill] sm:$0xff] %v13873_v10  ;;  %v5892_v33 = vld [vmem:[#allocation2 + $0xc] sm:$0xf]  ;;  %v5896_v4 = vld [vmem:[#allocation2 + $0x1c] sm:$0xf]  ;;  %v11818_v13 = vld [vmem:[#allocation2 + $0x60] sm:$0xff]  }
 0x44b   : > { %14902 = vst [vmem:[#allocation24_spill] sm:$0xff] %v13867_v29  ;;  %v13877_v56 = vsel %vm13424_vm0, %v6819_v11, %v6820_v49  ;;  %v11816_v11 = vld [vmem:[%s14777_s3 + $0x110] sm:$0xff]   ;;  %v5941_v18 = vshrl.u32 %v5892_v33, 16  ;;  %v5944_v60 = vshll.u32 %v5892_v33, 16  ;;  %v11822_v49 = vld [vmem:[%s14777_s3 + $0x120] sm:$0xff]   ;;  %v5978_v33 = vshrl.u32 %v5896_v4, 16 }
 0x44c   : > { %14904 = vst [vmem:[#allocation26_spill] sm:$0xff] %v13877_v56  ;;  %v13904_v42 = vld [vmem:[#allocation2 + $0x14] sm:$0x1]  ;;  %v13908_v56 = vld [vmem:[#allocation2 + $0x20] sm:$0x1] }
 0x44d   : > { %10807 = vmatmul.mubr.bf16.gmra.mrb[44].mxu1 %v14899_v9  ;;  %v5943_v9 = vrot.slane %v5941_v18, 4  ;;  %v5980_v39 = vrot.slane %v5978_v33, 4  ;;  %v6002_v33 = vshrl.u32 %v13648_v23, 16 }
 0x44e   : > { %10810 = vmatprep.mubr.bf16.mxu1 %v14900_v25  ;;  %v5946_v25 = vrot.slane %v5944_v60, 5 }
 0x44f   : > { %v6004_v35 = vrot.slane %v6002_v33, 4  ;;  %v13950_v33 = vrot.slane %v6022_v46, 5  ;;  %v6070_v46 = vshll.u32 %v13663_v28, 16 }
 0x450   : > { %v5947_v18 = vor.u32 %v5946_v25, %v5943_v9  ;;  %v11828_v9 = vld [vmem:[%s14777_s3 + $0x130] sm:$0xff]  }
 0x452   : > { %v13915_v25 = vrot.slane %v5947_v18, 4 }
 0x455   : > { %10811 = vmatmul.mubr.bf16.gmra.mrb[48].mxu1 %v14905_v6  ;;  %v5954_v6 = vshrl.u32 %v13894_v37, 16 }
 0x456   : > { %10830 = vmatprep.mubr.bf16.mxu1 %v11808_v44  ;;  %v5950_v44 = vshll.u32 %v13894_v37, 16 }
 0x457   : > { %v5956_v14 = vrot.slane %v5954_v6, 4  ;;  %v5960_v6 = vshll.u32 %v13904_v42, 16 }
 0x458   : > { %v13906_v60 = vrot.slane %v5950_v44, 5 }
 0x459   : > { %v5962_v40 = vrot.slane %v5960_v6, 5 }
 0x45a   : > { %v5957_v44 = vor.u32 %v5956_v14, %v13906_v60  ;;  %v11831_v14 = vld [vmem:[%s14777_s3 + $0x138] sm:$0xff]  }
 0x45c   : > { %v5958_v57 = vrot.slane %v5957_v44, 4  ;;  %v6026_v44 = vshrl.u32 %v13652_v61, 16 }
 0x45d   : > { %10831 = vmatmul.mubr.bf16.vlgmr.msra.gmra.mrb[20].mxu1 %v11809_v55 }
 0x45e   : > { %10834 = vmatprep.mubr.bf16.mxu1 %v11811_v50  ;;  %10863 = vmatpush3.bf16.msra.mxu1 %v13679_v48  ;;  %v5895_v48 = vld [vmem:[#allocation2 + $0x18] sm:$0xf]  ;;  %v5974_v50 = vshll.u32 %v5896_v4, 16  ;;  %v5963_v61 = vsel %vm13027_vm13, %v5958_v57, %v5962_v40  ;;  %v6032_v40 = vshll.u32 %v13657_v41, 16 }
 0x45f   : > { %10864 = vmatprep.subr.bf16.mxu1 %v11813_v38  ;;  %v5965_v55 = vshrl.u32 %v5895_v48, 16 }
 0x462   : > { %10865 = vmatpush3.bf16.msra.mxu1 %v11813_v38  ;;  %v5968_v38 = vshll.u32 %v5895_v48, 16  ;;  %v5967_v48 = vrot.slane %v5965_v55, 4  ;;  %v5984_v55 = vshll.u32 %v13908_v56, 16 }
 0x463   : > { %10866 = vmatprep.subr.bf16.mxu1 %v11816_v11 }
 0x464   : > { %v5970_v10 = vrot.slane %v5968_v38, 5  ;;  %v5901_v38 = vld [vmem:[#allocation2 + $0x30] sm:$0xf] }
 0x465   : > { %10835 = vmatmul.mubr.bf16.gmra.mrb[24].mxu1 %v11812_v45  ;;  %v5898_v45 = vld [vmem:[#allocation2 + $0x24] sm:$0xf]  ;;  %v6013_v18 = vshrl.u32 %v5901_v38, 16  ;;  %v6016_v53 = vshll.u32 %v5901_v38, 16  ;;  %v5907_v38 = vld [vmem:[#allocation2 + $0x48] sm:$0xf] }
 0x466   : > { %10838 = vmatprep.mubr.bf16.mxu1 %v11814_v36  ;;  %10867 = vmatpush3.bf16.msra.mxu1 %v11816_v11  ;;  %v11815_v11 = vld [vmem:[#allocation2 + $0x48] sm:$0xff]   ;;  %v5989_v4 = vshrl.u32 %v5898_v45, 16  ;;  %v5992_v29 = vshll.u32 %v5898_v45, 16  ;;  %v5971_v45 = vor.u32 %v5970_v10, %v5967_v48  ;;  %v5986_v10 = vrot.slane %v5984_v55, 5  ;;  %v5904_v48 = vld [vmem:[#allocation2 + $0x3c] sm:$0xf] }
 0x467   : > { %10868 = vmatprep.subr.bf16.mxu1 %v11819_v62  ;;  %v11825_v36 = vld [vmem:[%s14777_s3 + $0x128] sm:$0xff]   ;;  %v6015_v6 = vrot.slane %v6013_v18, 4  ;;  %v6018_v55 = vrot.slane %v6016_v53, 5  ;;  %v6037_v1 = vshrl.u32 %v5904_v48, 16  ;;  %v6040_v59 = vshll.u32 %v5904_v48, 16 }
 0x468   : > { %v5910_v18 = vld [vmem:[#allocation2 + $0x54] sm:$0xf] }
 0x469   : > { %v6019_v48 = vor.u32 %v6018_v55, %v6015_v6  ;;  %v6039_v57 = vrot.slane %v6037_v1, 4 }
 0x46a   : > { %10869 = vmatpush3.bf16.msra.mxu1 %v11819_v62  ;;  %v13910_v62 = vrot.slane %v5974_v50, 5  ;;  %v5991_v50 = vrot.slane %v5989_v4, 4 }
 0x46b   : > { %10870 = vmatprep.subr.bf16.mxu1 %v11822_v49 }
 0x46d   : > { %10839 = vmatmul.mubr.bf16.gmra.mrb[28].mxu1 %v11815_v11  ;;  %v5994_v11 = vrot.slane %v5992_v29, 5  ;;  %v11820_v29 = vld [vmem:[#allocation2 + $0x6c] sm:$0xff]  }
 0x46e   : > { %10842 = vmatprep.mubr.bf16.mxu1 %v11817_v3  ;;  %10871 = vmatpush3.bf16.msra.mxu1 %v11822_v49  ;;  %v5998_v3 = vshll.u32 %v13648_v23, 16  ;;  %v5981_v49 = vor.u32 %v5980_v39, %v13910_v62  ;;  %v5953_v39 = vsel %vm13027_vm13, %v13915_v25, %v13906_v60  ;;  %v5972_v23 = vrot.slane %v5971_v45, 4  ;;  %v13937_v60 = vld [vmem:[%s14777_s3 + $0x140] sm:$0xff]  }
 0x46f   : > { %10872 = vmatprep.subr.bf16.mxu1 %v11825_v36  ;;  %v5995_v4 = vor.u32 %v5994_v11, %v5991_v50  ;;  %v6050_v25 = vshrl.u32 %v13659_v24, 16  ;;  %v6061_v45 = vshrl.u32 %v5907_v38, 16  ;;  %v6064_v50 = vshll.u32 %v5907_v38, 16  ;;  %v11821_v38 = vld [vmem:[#allocation2 + $0x78] sm:$0xff]  }
 0x470   : > { %v5982_v2 = vrot.slane %v5981_v49, 4  ;;  %v5977_v53 = vsel %vm13027_vm13, %v5972_v23, %v13910_v62  ;;  %v6008_v11 = vshll.u32 %v13650_v12, 16 }
 0x471   : > { %v6052_v12 = vrot.slane %v6050_v25, 4  ;;  %v6063_v23 = vrot.slane %v6061_v45, 4  ;;  %v6034_v45 = vrot.slane %v6032_v40, 5  ;;  %v6080_v40 = vshll.u32 %v13673_v52, 16 }
 0x472   : > { %10873 = vmatpush3.bf16.msra.mxu1 %v11825_v36  ;;  %v13930_v36 = vrot.slane %v5998_v3, 5  ;;  %v5987_v3 = vsel %vm13027_vm13, %v5982_v2, %v5986_v10  ;;  %v6066_v2 = vrot.slane %v6064_v50, 5  ;;  %v11823_v10 = vld [vmem:[#allocation2 + $0x84] sm:$0xff]   ;;  %v6056_v50 = vshll.u32 %v13661_v15, 16 }
 0x473   : > { %10874 = vmatprep.subr.bf16.mxu1 %v11828_v9  ;;  %v13960_v41 = vcombine.low %v5977_v53, %v5987_v3  ;;  %v6122_v52 = vshrl.u32 %v13701_v26, 16 }
 0x474   : > { %v6005_v49 = vor.u32 %v6004_v35, %v13930_v36  ;;  %v6074_v35 = vshrl.u32 %v13663_v28, 16 }
 0x475   : > { %10843 = vmatmul.mubr.bf16.gmra.mrb[32].mxu1 %v11818_v13  ;;  %v6046_v13 = vshll.u32 %v13659_v24, 16  ;;  %v6028_v24 = vrot.slane %v6026_v44, 4  ;;  %v13958_v44 = vcombine.low %v5953_v39, %v5963_v61  ;;  %v6067_v39 = vor.u32 %v6066_v2, %v6063_v23 }
 0x476   : > { %10846 = vmatprep.mubr.bf16.mxu1 %v11820_v29  ;;  %10875 = vmatpush3.bf16.msra.mxu1 %v11828_v9  ;;  %v5996_v9 = vrot.slane %v5995_v4, 4  ;;  %v6042_v29 = vrot.slane %v6040_v59, 5  ;;  %v6085_v4 = vshrl.u32 %v5910_v18, 16  ;;  %v6010_v59 = vrot.slane %v6008_v11, 5 }
 0x477   : > { %10876 = vmatprep.subr.bf16.mxu1 %v11831_v14  ;;  %v13954_v62 = vrot.slane %v6046_v13, 5  ;;  %v6029_v1 = vor.u32 %v6028_v24, %v13950_v33  ;;  %v6006_v55 = vrot.slane %v6005_v49, 4  ;;  %v6020_v13 = vrot.slane %v6019_v48, 4 }
 0x478   : > { %v6001_v6 = vsel %vm13027_vm13, %v5996_v9, %v13930_v36  ;;  %v6043_v25 = vor.u32 %v6042_v29, %v6039_v57  ;;  %v6072_v61 = vrot.slane %v6070_v46, 5  ;;  %v6076_v53 = vrot.slane %v6074_v35, 4  ;;  %v5913_v9 = vld [vmem:[#allocation2 + $0x60] sm:$0xf]  ;;  %v11824_v57 = vld [vmem:[#allocation2 + $0x90] sm:$0xff]  }
 0x479   : > { %v6053_v28 = vor.u32 %v6052_v12, %v13954_v62  ;;  %v6087_v3 = vrot.slane %v6085_v4, 4  ;;  %v6011_v24 = vsel %vm13027_vm13, %v6006_v55, %v6010_v59  ;;  %v6098_v36 = vshrl.u32 %v13681_v19, 16  ;;  %v11826_v46 = vld [vmem:[#allocation2 + $0x9c] sm:$0xff]  }
 0x47a   : > { %10877 = vmatpush3.bf16.msra.mxu1 %v11831_v14  ;;  %v6088_v14 = vshll.u32 %v5910_v18, 16  ;;  %v6030_v18 = vrot.slane %v6029_v1, 4  ;;  %v13972_v49 = vcombine.low %v6001_v6, %v6011_v24  ;;  %v6025_v15 = vsel %vm13027_vm13, %v6020_v13, %v13950_v33 }
 0x47b   : > { %10910 = vmatprep.subr.bf16.mxu1 %v13937_v60  ;;  %v6044_v48 = vrot.slane %v6043_v25, 4  ;;  %v6054_v12 = vrot.slane %v6053_v28, 4  ;;  %v6058_v23 = vrot.slane %v6056_v50, 5  ;;  %v6068_v2 = vrot.slane %v6067_v39, 4 }
 0x47c   : > { %v6090_v11 = vrot.slane %v6088_v14, 5  ;;  %v6035_v29 = vsel %vm13027_vm13, %v6030_v18, %v6034_v45  ;;  %v6109_v4 = vshrl.u32 %v5913_v9, 16  ;;  %v6112_v14 = vshll.u32 %v5913_v9, 16  ;;  %v11827_v9 = vld [vmem:[#allocation2 + $0xa8] sm:$0xff]  }
 0x47d   : > { %10847 = vmatmul.mubr.bf16.gmra.mrb[36].mxu1 %v11821_v38  ;;  %v6094_v38 = vshll.u32 %v13681_v19, 16  ;;  %v6077_v19 = vor.u32 %v6076_v53, %v6072_v61  ;;  %v6100_v33 = vrot.slane %v6098_v36, 4  ;;  %v6118_v1 = vshll.u32 %v13701_v26, 16 }
 0x47e   : > { %10850 = vmatprep.mubr.bf16.mxu1 %v11823_v10  ;;  %v5916_v10 = vld [vmem:[#allocation2 + $0x6c] sm:$0xf]  ;;  %v6091_v35 = vor.u32 %v6090_v11, %v6087_v3  ;;  %v6049_v6 = vsel %vm13027_vm13, %v6044_v48, %v13954_v62  ;;  %v6082_v55 = vrot.slane %v6080_v40, 5  ;;  %v13987_v45 = vcombine.low %v6025_v15, %v6035_v29  ;;  %v14000_v62 = vld [vmem:[#allocation2 + $0x1c] sm:$0xf] }
 0x47f   : > { %v13980_v59 = vrot.slane %v6094_v38, 5  ;;  %v6133_v13 = vshrl.u32 %v5916_v10, 16  ;;  %v6136_v25 = vshll.u32 %v5916_v10, 16  ;;  %v6059_v28 = vsel %vm13027_vm13, %v6054_v12, %v6058_v23  ;;  %14906 = vst [vmem:[#allocation27_spill] sm:$0xff] %v14000_v62  ;;  %v14020_v29 = vld [vmem:[#allocation2 + $0x78] sm:$0xf] }
 0x480   : > { %v6073_v50 = vsel %vm13027_vm13, %v6068_v2, %v6072_v61  ;;  %v6104_v39 = vshll.u32 %v13688_v16, 16  ;;  %v6078_v53 = vrot.slane %v6077_v19, 4  ;;  %v13994_v26 = vrot.slane %v6091_v35, 4  ;;  %v14009_v61 = vld [vmem:[#allocation2 + $0x20] sm:$0x1]  ;;  %v11829_v23 = vld [vmem:[#allocation2 + $0xb4] sm:$0xff]  }
 0x481   : > { %v13996_v3 = vrot.slane %v6109_v4, 4  ;;  %v13998_v11 = vrot.slane %v6112_v14, 5  ;;  %v14002_v24 = vcombine.low %v6049_v6, %v6059_v28  ;;  %v6101_v18 = vor.u32 %v6100_v33, %v13980_v59  ;;  %14907 = vst [vmem:[#allocation28_spill] sm:$0xff] %v14009_v61  ;;  %v14011_v16 = vld [vmem:[#allocation2 + $0x28] sm:$0xf] }
 0x482   : > { %v14005_v38 = vrot.slane %v6118_v1, 5  ;;  %v14007_v36 = vrot.slane %v6122_v52, 4  ;;  %14908 = vst [vmem:[#allocation29_spill] sm:$0xff] %v14011_v16  ;;  %v6083_v15 = vsel %vm13027_vm13, %v6078_v53, %v6082_v55  ;;  %v14015_v48 = vrot.slane %v6133_v13, 4  ;;  %v8285_v12 = vld [vmem:[#allocation2 + $0x18] sm:$0xe] }
 0x483   : > { %v14017_v40 = vrot.slane %v6136_v25, 5  ;;  %v14022_v2 = vcombine.low %v6073_v50, %v6083_v15  ;;  %v14024_v10 = vrot.slane %v6104_v39, 5  ;;  %v6146_v19 = vshrl.u32 %v13716_v31, 16  ;;  %v14028_v35 = vld [vmem:[#allocation2 + $0x2c] sm:$0x1] }
 0x484   : > { %14909 = vst [vmem:[#allocation30_spill] sm:$0xff] %v14028_v35  ;;  %v14036_v33 = vld [vmem:[#allocation2 + $0x34] sm:$0xf]  ;;  %v14038_v1 = vld [vmem:[#allocation2 + $0x38] sm:$0x1]  ;;  %v8351_v52 = vrot.slane %v14000_v62, 5 }
 0x485   : > { %10851 = vmatmul.mubr.bf16.gmra.mrb[40].mxu1 %v11824_v57  ;;  %v6142_v57 = vshll.u32 %v13716_v31, 16  ;;  %14910 = vst [vmem:[#allocation31_spill] sm:$0xff] %v14036_v33  ;;  %14911 = vst [vmem:[#allocation32_spill] sm:$0xff] %v14038_v1  ;;  %v8354_v6 = vrot.slane %v14009_v61, 5  ;;  %v14042_v31 = vrot.slane %v6101_v18, 4  ;;  %v9624_v25 = vrot.slane %v8285_v12, 9 }
 0x486   : > { %10854 = vmatprep.mubr.bf16.mxu1 %v11826_v46  ;;  %v8286_v28 = vld [vmem:[#allocation2 + $0x24] sm:$0xe]  ;;  %v14051_v53 = vld [vmem:[#allocation2 + $0x40] sm:$0xf]  ;;  %v14053_v15 = vld [vmem:[#allocation2 + $0x44] sm:$0x1] }
 0x487   : > { %v14049_v39 = vrot.slane %v6142_v57, 5  ;;  %14912 = vst [vmem:[#allocation33_spill] sm:$0xff] %v14051_v53  ;;  %14913 = vst [vmem:[#allocation34_spill] sm:$0xff] %v14053_v15  ;;  %v8358_v18 = vrot.slane %v14011_v16, 5  ;;  %v14056_v4 = vrot.slane %v6146_v19, 4  ;;  %v14063_v12 = vsel %vm13424_vm0, %v9624_v25, %v8351_v52 }
 0x488   : > { %v14059_v13 = vld [vmem:[#allocation2 + $0x4c] sm:$0xf]  ;;  %14915 = vst [vmem:[#allocation36_spill] sm:$0xff] %v14063_v12  ;;  %v8361_v57 = vrot.slane %v14028_v35, 5  ;;  %v7547_v50 = vld [vmem:[#allocation2 + $0x58] sm:$0xf] }
 0x489   : > { %14914 = vst [vmem:[#allocation35_spill] sm:$0xff] %v14059_v13  ;;  %v9625_v14 = vrot.slane %v8286_v28, 9  ;;  %v8360_v61 = vrot.slane %v8358_v18, 4  ;;  %v8365_v19 = vrot.slane %v14036_v33, 5  ;;  %v8288_v16 = vld [vmem:[#allocation2 + $0x3c] sm:$0xe] }
 0x48a   : > { %v8368_v25 = vrot.slane %v14038_v1, 5  ;;  %v7548_v35 = vld [vmem:[#allocation2 + $0x5c] sm:$0x1]  ;;  %v8289_v55 = vld [vmem:[#allocation2 + $0x48] sm:$0xe]  ;;  %v9627_v20 = vrot.slane %v8288_v16, 9 }
 0x48b   : > { %v14082_v28 = vsel %vm13424_vm0, %v8360_v61, %v8361_v57  ;;  %v8367_v33 = vrot.slane %v8365_v19, 4  ;;  %v8290_v12 = vld [vmem:[#allocation2 + $0x54] sm:$0xe]  ;;  %v14088_v1 = vld [vmem:[#allocation2 + $0x64] sm:$0xf]  ;;  %v8379_v57 = vrot.slane %v14059_v13, 5 }
 0x48c   : > { %14918 = vst [vmem:[#allocation39_spill] sm:$0xff] %v14082_v28  ;;  %14919 = vst [vmem:[#allocation40_spill] sm:$0xff] %v14088_v1  ;;  %v7553_v16 = vld [vmem:[#allocation2 + $0x70] sm:$0xf]  ;;  %v7554_v62 = vld [vmem:[#allocation2 + $0x74] sm:$0x1] }
 0x48d   : > { %10855 = vmatmul.mubr.bf16.gmra.mrb[44].mxu1 %v11827_v9  ;;  %v8353_v9 = vrot.slane %v8351_v52, 4  ;;  %v8372_v52 = vrot.slane %v14051_v53, 5  ;;  %v8386_v53 = vrot.slane %v7547_v50, 5  ;;  %v8292_v28 = vld [vmem:[#allocation2 + $0x6c] sm:$0xe] }
 0x48e   : > { %10858 = vmatprep.mubr.bf16.mxu1 %v11829_v23  ;;  %v8287_v23 = vld [vmem:[#allocation2 + $0x30] sm:$0xe] }
 0x48f   : > { %v14068_v46 = vsel %vm13424_vm0, %v8353_v9, %v8354_v6  ;;  %v14078_v6 = vsel %vm13424_vm0, %v9625_v14, %v8358_v18  ;;  %v9626_v9 = vrot.slane %v8287_v23, 9  ;;  %v7551_v14 = vld [vmem:[#allocation2 + $0x68] sm:$0x1]  ;;  %v14096_v18 = vsel %vm13424_vm0, %v8367_v33, %v8368_v25 }
 0x490   : > { %14916 = vst [vmem:[#allocation37_spill] sm:$0xff] %v14068_v46  ;;  %14917 = vst [vmem:[#allocation38_spill] sm:$0xff] %v14078_v6  ;;  %v8375_v46 = vrot.slane %v14053_v15, 5  ;;  %v8382_v23 = vrot.slane %v7545_v27, 5  ;;  %v8374_v6 = vrot.slane %v8372_v52, 4  ;;  %v9628_v15 = vrot.slane %v8289_v55, 9 }
 0x491   : > { %v14092_v61 = vsel %vm13424_vm0, %v9626_v9, %v8365_v19  ;;  %14921 = vst [vmem:[#allocation42_spill] sm:$0xff] %v14096_v18  ;;  %v7556_v19 = vld [vmem:[#allocation2 + $0x7c] sm:$0xf]  ;;  %v14104_v33 = vsel %vm13424_vm0, %v9627_v20, %v8372_v52  ;;  %v8381_v25 = vrot.slane %v8379_v57, 4  ;;  %v9629_v9 = vrot.slane %v8290_v12, 9 }
 0x492   : > { %14920 = vst [vmem:[#allocation41_spill] sm:$0xff] %v14092_v61  ;;  %14922 = vst [vmem:[#allocation43_spill] sm:$0xff] %v14104_v33  ;;  %v8389_v27 = vrot.slane %v7548_v35, 5  ;;  %v14108_v13 = vsel %vm13424_vm0, %v8374_v6, %v8375_v46  ;;  %v14112_v55 = vsel %vm13424_vm0, %v9628_v15, %v8379_v57  ;;  %v8388_v50 = vrot.slane %v8386_v53, 4  ;;  %v7557_v18 = vld [vmem:[#allocation2 + $0x80] sm:$0x1] }
 0x493   : > { %14923 = vst [vmem:[#allocation44_spill] sm:$0xff] %v14108_v13  ;;  %14924 = vst [vmem:[#allocation45_spill] sm:$0xff] %v14112_v55  ;;  %v7560_v61 = vld [vmem:[#allocation2 + $0x8c] sm:$0x1]  ;;  %v14119_v35 = vsel %vm13424_vm0, %v8381_v25, %v8382_v23  ;;  %v9630_v12 = vrot.slane %v8291_v63, 9  ;;  %v8396_v46 = vrot.slane %v7551_v14, 5  ;;  %v14125_v6 = vsel %vm13424_vm0, %v9629_v9, %v8386_v53 }
 0x494   : > { %14925 = vst [vmem:[#allocation46_spill] sm:$0xff] %v14119_v35  ;;  %v7562_v52 = vld [vmem:[#allocation2 + $0x94] sm:$0xf]  ;;  %14926 = vst [vmem:[#allocation47_spill] sm:$0xff] %v14125_v6  ;;  %v14129_v57 = vsel %vm13424_vm0, %v8388_v50, %v8389_v27  ;;  %v8293_v20 = vld [vmem:[#allocation2 + $0x78] sm:$0xe] }
 0x495   : > { %10859 = vmatmul.mubr.bf16.gmra.mrb[48].mxu1 %v11830_v43  ;;  %v7559_v43 = vld [vmem:[#allocation2 + $0x88] sm:$0xf]  ;;  %14927 = vst [vmem:[#allocation48_spill] sm:$0xff] %v14129_v57  ;;  %v9631_v25 = vrot.slane %v8292_v28, 9  ;;  %v8400_v63 = vrot.slane %v7553_v16, 5  ;;  %v8403_v14 = vrot.slane %v7554_v62, 5 }
 0x496   : > { %10878 = vmatprep.mubr.bf16.mxu1 %v13958_v44  ;;  %v8393_v44 = vrot.slane %v14088_v1, 5  ;;  %v8294_v13 = vld [vmem:[#allocation2 + $0x84] sm:$0xe]  ;;  %v11833_v15 = vld [vmem:[%s14777_s3 + $0x148] sm:$0xff]   ;;  %v7563_v35 = vld [vmem:[#allocation2 + $0x98] sm:$0x1] }
 0x497   : > { %v8407_v27 = vrot.slane %v7556_v19, 5  ;;  %v8410_v50 = vrot.slane %v7557_v18, 5  ;;  %v7565_v23 = vld [vmem:[#allocation2 + $0xa0] sm:$0xf]  ;;  %v7566_v28 = vld [vmem:[#allocation2 + $0xa4] sm:$0x1] }
 0x498   : > { %v8395_v1 = vrot.slane %v8393_v44, 4  ;;  %v14138_v53 = vsel %vm13424_vm0, %v9630_v12, %v8393_v44  ;;  %v8402_v16 = vrot.slane %v8400_v63, 4  ;;  %v9632_v57 = vrot.slane %v8293_v20, 9  ;;  %v8295_v55 = vld [vmem:[#allocation2 + $0x90] sm:$0xe] }
 0x499   : > { %v8414_v6 = vrot.slane %v7559_v43, 5  ;;  %v7568_v33 = vld [vmem:[#allocation2 + $0xac] sm:$0xf]  ;;  %v14149_v44 = vsel %vm13424_vm0, %v9631_v25, %v8400_v63  ;;  %v9633_v12 = vrot.slane %v8294_v13, 9  ;;  %v8417_v19 = vrot.slane %v7560_v61, 5  ;;  %v11834_v13 = vld [vmem:[%s14777_s3 + $0x150] sm:$0xff]  }
 0x49a   : > { %v14142_v9 = vsel %vm13424_vm0, %v8395_v1, %v8396_v46  ;;  %14928 = vst [vmem:[#allocation49_spill] sm:$0xff] %v14149_v44  ;;  %v8409_v1 = vrot.slane %v8407_v27, 4  ;;  %v7571_v18 = vld [vmem:[#allocation2 + $0xb8] sm:$0xf]  ;;  %v14155_v20 = vsel %vm13424_vm0, %v8402_v16, %v8403_v14  ;;  %v8421_v46 = vrot.slane %v7562_v52, 5  ;;  %v15000_v5 = vld [vmem:[#allocation45_spill] sm:$0xff] }
 0x49b   : > { %14929 = vst [vmem:[#allocation50_spill] sm:$0xff] %v14155_v20  ;;  %v8416_v43 = vrot.slane %v8414_v6, 4  ;;  %v8296_v25 = vld [vmem:[#allocation2 + $0x9c] sm:$0xe]  ;;  %v9634_v63 = vrot.slane %v8295_v55, 9  ;;  %v8424_v14 = vrot.slane %v7563_v35, 5 }
 0x49c   : > { %v14168_v61 = vsel %vm13424_vm0, %v8409_v1, %v8410_v50  ;;  %v8423_v62 = vrot.slane %v8421_v46, 4  ;;  %v9635_v1 = vrot.slane %v8296_v25, 9  ;;  %v8428_v55 = vrot.slane %v7565_v23, 5  ;;  %v8298_v20 = vld [vmem:[#allocation2 + $0xb4] sm:$0xe]  ;;  %v11835_v23 = vld [vmem:[%s14777_s3 + $0x158] sm:$0xff]  }
 0x49d   : > { %10879 = vmatmul.mubr.bf16.vlgmr.msra.gmra.mrb[20].mxu1 %v13960_v41  ;;  %v14159_v41 = vsel %vm13424_vm0, %v9632_v57, %v8407_v27  ;;  %v7572_v57 = vld [vmem:[#allocation2 + $0xbc] sm:$0x1]  ;;  %v14174_v27 = vsel %vm13424_vm0, %v9633_v12, %v8414_v6  ;;  %v14178_v16 = vsel %vm13424_vm0, %v8416_v43, %v8417_v19  ;;  %v8431_v35 = vrot.slane %v7566_v28, 5  ;;  %v7574_v44 = vld [vmem:[#allocation2 + $0xc4] sm:$0xf] }
 0x49e   : > { %10882 = vmatprep.mubr.bf16.mxu1 %v13972_v49  ;;  %10911 = vmatpush3.bf16.msra.mxu1 %v13937_v60  ;;  %v7569_v49 = vld [vmem:[#allocation2 + $0xb0] sm:$0x1]  ;;  %14930 = vst [vmem:[#allocation51_spill] sm:$0xff] %v14178_v16  ;;  %v8297_v60 = vld [vmem:[#allocation2 + $0xa8] sm:$0xe]  ;;  %v14184_v6 = vsel %vm13424_vm0, %v9634_v63, %v8421_v46  ;;  %v14188_v12 = vsel %vm13424_vm0, %v8423_v62, %v8424_v14  ;;  %v8435_v19 = vrot.slane %v7568_v33, 5 }
 0x49f   : > { %10912 = vmatprep.subr.bf16.mxu1 %v11833_v15  ;;  %v7575_v52 = vld [vmem:[#allocation2 + $0xc8] sm:$0x1]  ;;  %v8438_v43 = vrot.slane %v7569_v49, 5  ;;  %v8430_v28 = vrot.slane %v8428_v55, 4  ;;  %v9636_v25 = vrot.slane %v8297_v60, 9  ;;  %v8442_v50 = vrot.slane %v7571_v18, 5 }
 0x4a0   : > { %v8299_v16 = vld [vmem:[#allocation2 + $0xc0] sm:$0xe]  ;;  %v14197_v46 = vsel %vm13424_vm0, %v9635_v1, %v8428_v55  ;;  %v8437_v62 = vrot.slane %v8435_v19, 4  ;;  %v9637_v63 = vrot.slane %v8298_v20, 9  ;;  %v8445_v33 = vrot.slane %v7572_v57, 5 }
 0x4a1   : > { %v14202_v49 = vsel %vm13424_vm0, %v8430_v28, %v8431_v35  ;;  %v14206_v14 = vsel %vm13424_vm0, %v9636_v25, %v8435_v19  ;;  %v8444_v60 = vrot.slane %v8442_v50, 4  ;;  %v8449_v18 = vrot.slane %v7574_v44, 5  ;;  %v5922_v1 = vld [vmem:[#allocation2 + $0x84] sm:$0xf] }
 0x4a2   : > { %10913 = vmatpush3.bf16.msra.mxu1 %v11833_v15  ;;  %v9666_v15 = vcombine.low %v14184_v6, %v14188_v12  ;;  %v9638_v57 = vrot.slane %v8299_v16, 9  ;;  %v8452_v55 = vrot.slane %v7575_v52, 5  ;;  %v11836_v35 = vld [vmem:[%s14777_s3 + $0x160] sm:$0xff]   ;;  %v14931_v16 = vshrl.u32 %v14020_v29, 16  ;;  %v9682_v12 = vld [vmem:[%s12015_s6 + $0x49] sm:$0xff] }
 0x4a3   : > { %10914 = vmatprep.subr.bf16.mxu1 %v11834_v13  ;;  %v8451_v19 = vrot.slane %v8449_v18, 4  ;;  %v6170_v25 = vshrl.u32 %v13736_v58, 16  ;;  %v6181_v44 = vshrl.u32 %v5922_v1, 16  ;;  %v6184_v20 = vshll.u32 %v5922_v1, 16 }
 0x4a4   : > { %v6159_v52 = vrot.slane %v14931_v16, 4  ;;  %v14934_v16 = vshll.u32 %v13714_v22, 16  ;;  %v5925_v22 = vld [vmem:[#allocation2 + $0x90] sm:$0xf] }
 0x4a5   : > { %10883 = vmatmul.mubr.bf16.gmra.mrb[24].mxu1 %v13987_v45  ;;  %v14213_v45 = vsel %vm13424_vm0, %v8437_v62, %v8438_v43  ;;  %v14932_v43 = vshll.u32 %v14020_v29, 16  ;;  %v6107_v29 = vsel %vm13027_vm13, %v14042_v31, %v14024_v10  ;;  %v6149_v10 = vor.u32 %v14056_v4, %v14049_v39  ;;  %v11837_v31 = vld [vmem:[%s14777_s3 + $0x168] sm:$0xff]   ;;  %v5928_v62 = vld [vmem:[#allocation2 + $0x9c] sm:$0xf] }
 0x4a6   : > { %10886 = vmatprep.mubr.bf16.mxu1 %v14002_v24  ;;  %10915 = vmatpush3.bf16.msra.mxu1 %v11834_v13  ;;  %v14222_v24 = vsel %vm13424_vm0, %v9637_v63, %v8442_v50  ;;  %v14226_v13 = vsel %vm13424_vm0, %v8444_v60, %v8445_v33  ;;  %v14237_v50 = vsel %vm13424_vm0, %v9638_v57, %v8449_v18  ;;  %v6130_v1 = vrot.slane %v14934_v16, 5 }
 0x4a7   : > { %10916 = vmatprep.subr.bf16.mxu1 %v11835_v23  ;;  %v6162_v28 = vrot.slane %v14932_v43, 5  ;;  %v14241_v63 = vsel %vm13424_vm0, %v8451_v19, %v8452_v55  ;;  %v14933_v33 = vor.u32 %v13998_v11, %v13996_v3  ;;  %v14935_v57 = vsel %vm13027_vm13, %v13994_v26, %v13980_v59 }
 0x4a8   : > { %v9470_v55 = vcombine.low %v14935_v57, %v6107_v29  ;;  %v6190_v3 = vshll.u32 %v13753_v17, 16  ;;  %v6194_v11 = vshrl.u32 %v13753_v17, 16  ;;  %v14937_v59 = vor.u32 %v14017_v40, %v14015_v48 }
 0x4a9   : > { %v6116_v60 = vrot.slane %v14933_v33, 4  ;;  %v14938_v4 = vshll.u32 %v13736_v58, 16  ;;  %v6172_v29 = vrot.slane %v6170_v25, 4  ;;  %v14939_v17 = vshll.u32 %v13725_v7, 16 }
 0x4aa   : > { %10917 = vmatpush3.bf16.msra.mxu1 %v11835_v23  ;;  %v14936_v23 = vor.u32 %v14007_v36, %v14005_v38  ;;  %v6140_v26 = vrot.slane %v14937_v59, 4  ;;  %v6163_v16 = vor.u32 %v6162_v28, %v6159_v52  ;;  %v6183_v57 = vrot.slane %v6181_v44, 4 }
 0x4ab   : > { %10918 = vmatprep.subr.bf16.mxu1 %v11836_v35  ;;  %v14274_v43 = vrot.slane %v14938_v4, 5  ;;  %v6154_v33 = vrot.slane %v14939_v17, 5  ;;  %v6186_v18 = vrot.slane %v6184_v20, 5  ;;  %v6121_v36 = vsel %vm13027_vm13, %v6116_v60, %v14005_v38  ;;  %v11838_v20 = vld [vmem:[%s14777_s3 + $0x170] sm:$0xff]  }
 0x4ac   : > { %v6126_v19 = vrot.slane %v14936_v23, 4  ;;  %v6205_v48 = vshrl.u32 %v5925_v22, 16  ;;  %v6208_v40 = vshll.u32 %v5925_v22, 16  ;;  %v6150_v25 = vrot.slane %v6149_v10, 4 }
 0x4ad   : > { %10887 = vmatmul.mubr.bf16.gmra.mrb[28].mxu1 %v14022_v2  ;;  %v6176_v2 = vshll.u32 %v13751_v0, 16  ;;  %v14285_v7 = vrot.slane %v6190_v3, 5  ;;  %v6196_v52 = vrot.slane %v6194_v11, 4  ;;  %v6145_v38 = vsel %vm13027_vm13, %v6140_v26, %v14049_v39 }
 0x4ae   : > { %10890 = vmatprep.mubr.bf16.mxu1 %v9470_v55  ;;  %v6131_v58 = vsel %vm13027_vm13, %v6126_v19, %v6130_v1  ;;  %10919 = vmatpush3.bf16.msra.mxu1 %v11836_v35  ;;  %v6173_v44 = vor.u32 %v6172_v29, %v14274_v43  ;;  %v6229_v35 = vshrl.u32 %v5928_v62, 16  ;;  %v6232_v28 = vshll.u32 %v5928_v62, 16  ;;  %v11839_v62 = vld [vmem:[%s14777_s3 + $0x178] sm:$0xff]   ;;  %v5931_v29 = vld [vmem:[#allocation2 + $0xa8] sm:$0xf] }
 0x4af   : > { %10920 = vmatprep.subr.bf16.mxu1 %v11837_v31  ;;  %v6155_v60 = vsel %vm13027_vm13, %v6150_v25, %v6154_v33  ;;  %v6164_v0 = vrot.slane %v6163_v16, 4  ;;  %v6187_v1 = vor.u32 %v6186_v18, %v6183_v57  ;;  %v6200_v55 = vshll.u32 %v13764_v30, 16 }
 0x4b0   : > { %v6207_v10 = vrot.slane %v6205_v48, 4  ;;  %v6210_v3 = vrot.slane %v6208_v40, 5  ;;  %v6214_v11 = vshll.u32 %v13772_v54, 16  ;;  %v6218_v22 = vshrl.u32 %v13772_v54, 16 }
 0x4b1   : > { %v9471_v23 = vcombine.low %v6121_v36, %v6131_v58  ;;  %v9472_v39 = vcombine.low %v6145_v38, %v6155_v60  ;;  %v6178_v19 = vrot.slane %v6176_v2, 5  ;;  %v6197_v59 = vor.u32 %v6196_v52, %v14285_v7  ;;  %v5934_v58 = vld [vmem:[#allocation2 + $0xb4] sm:$0xf]  ;;  %v11898_v2 = vld [vmem:[#allocation2 + $0x98] sm:$0x1] }
 0x4b2   : > { %10921 = vmatpush3.bf16.msra.mxu1 %v11837_v31  ;;  %v6231_v18 = vrot.slane %v6229_v35, 4  ;;  %v6234_v26 = vrot.slane %v6232_v28, 5  ;;  %v6238_v30 = vshll.u32 %v13787_v51, 16  ;;  %v6242_v4 = vshrl.u32 %v13787_v51, 16 }
 0x4b3   : > { %10922 = vmatprep.subr.bf16.mxu1 %v11838_v20  ;;  %v6169_v54 = vsel %vm13027_vm13, %v6164_v0, %v14274_v43  ;;  %v6174_v31 = vrot.slane %v6173_v44, 4  ;;  %v6188_v17 = vrot.slane %v6187_v1, 4  ;;  %v6202_v33 = vrot.slane %v6200_v55, 5  ;;  %v14313_v43 = vld [vmem:[%s14777_s3 + $0x180] sm:$0xff]  }
 0x4b4   : > { %v6211_v16 = vor.u32 %v6210_v3, %v6207_v10  ;;  %v6216_v57 = vrot.slane %v6214_v11, 5  ;;  %v6220_v36 = vrot.slane %v6218_v22, 4  ;;  %v6198_v40 = vrot.slane %v6197_v59, 4  ;;  %v11899_v3 = vld [vmem:[#allocation2 + $0xa4] sm:$0x1] }
 0x4b5   : > { %10891 = vmatmul.mubr.bf16.gmra.mrb[32].mxu1 %v9471_v23  ;;  %v6179_v48 = vsel %vm13027_vm13, %v6174_v31, %v6178_v19  ;;  %v6253_v51 = vshrl.u32 %v5931_v29, 16  ;;  %v6256_v25 = vshll.u32 %v5931_v29, 16  ;;  %v6224_v52 = vshll.u32 %v11898_v2, 16 }
 0x4b6   : > { %10894 = vmatprep.mubr.bf16.mxu1 %v9472_v39  ;;  %10923 = vmatpush3.bf16.msra.mxu1 %v11838_v20  ;;  %v6235_v38 = vor.u32 %v6234_v26, %v6231_v18  ;;  %v6240_v44 = vrot.slane %v6238_v30, 5  ;;  %v6244_v35 = vrot.slane %v6242_v4, 4  ;;  %v9473_v28 = vcombine.low %v6169_v54, %v6179_v48  ;;  %v11900_v39 = vld [vmem:[#allocation2 + $0xac] sm:$0xf]  ;;  %v11901_v54 = vld [vmem:[#allocation2 + $0xb8] sm:$0xf] }
 0x4b7   : > { %10924 = vmatprep.subr.bf16.mxu1 %v11839_v62  ;;  %v6193_v20 = vsel %vm13027_vm13, %v6188_v17, %v14285_v7  ;;  %v6277_v60 = vshrl.u32 %v5934_v58, 16  ;;  %v6280_v0 = vshll.u32 %v5934_v58, 16  ;;  %v6203_v1 = vsel %vm13027_vm13, %v6198_v40, %v6202_v33  ;;  %v5937_v33 = vld [vmem:[#allocation2 + $0xc0] sm:$0xf] }
 0x4b8   : > { %v6212_v55 = vrot.slane %v6211_v16, 4  ;;  %v6221_v10 = vor.u32 %v6220_v36, %v6216_v57  ;;  %v6248_v11 = vshll.u32 %v11899_v3, 16  ;;  %v6255_v22 = vrot.slane %v6253_v51, 4 }
 0x4b9   : > { %v6258_v23 = vrot.slane %v6256_v25, 5  ;;  %v6262_v19 = vshll.u32 %v11900_v39, 16  ;;  %v6266_v59 = vshrl.u32 %v11900_v39, 16  ;;  %v9474_v18 = vcombine.low %v6193_v20, %v6203_v1  ;;  %v11904_v39 = vld [vmem:[#allocation2 + $0xc4] sm:$0xf] }
 0x4ba   : > { %10925 = vmatpush3.bf16.msra.mxu1 %v11839_v62  ;;  %v6226_v26 = vrot.slane %v6224_v52, 5  ;;  %v6236_v7 = vrot.slane %v6235_v38, 4  ;;  %v6245_v30 = vor.u32 %v6244_v35, %v6240_v44  ;;  %v6279_v4 = vrot.slane %v6277_v60, 4 }
 0x4bb   : > { %10958 = vmatprep.subr.bf16.mxu1 %v14313_v43  ;;  %v6282_v29 = vrot.slane %v6280_v0, 5  ;;  %v6286_v31 = vshll.u32 %v11901_v54, 16  ;;  %v6290_v17 = vshrl.u32 %v11901_v54, 16  ;;  %v6217_v62 = vsel %vm13027_vm13, %v6212_v55, %v6216_v57  ;;  %v11902_v0 = vld [vmem:[#allocation2 + $0xb0] sm:$0x1] }
 0x4bc   : > { %v6250_v16 = vrot.slane %v6248_v11, 5  ;;  %v6222_v36 = vrot.slane %v6221_v10, 4  ;;  %v6259_v58 = vor.u32 %v6258_v23, %v6255_v22  ;;  %v6264_v48 = vrot.slane %v6262_v19, 5  ;;  %v11903_v11 = vld [vmem:[#allocation2 + $0xbc] sm:$0x1] }
 0x4bd   : > { %10895 = vmatmul.mubr.bf16.gmra.mrb[36].mxu1 %v9473_v28  ;;  %v6268_v40 = vrot.slane %v6266_v59, 4  ;;  %v6241_v51 = vsel %vm13027_vm13, %v6236_v7, %v6240_v44  ;;  %v6246_v25 = vrot.slane %v6245_v30, 4  ;;  %v6301_v2 = vshrl.u32 %v5937_v33, 16 }
 0x4be   : > { %10898 = vmatprep.mubr.bf16.mxu1 %v9474_v18  ;;  %v6304_v52 = vshll.u32 %v5937_v33, 16  ;;  %v6227_v38 = vsel %vm13027_vm13, %v6222_v36, %v6226_v26  ;;  %v6283_v35 = vor.u32 %v6282_v29, %v6279_v4  ;;  %v6288_v28 = vrot.slane %v6286_v31, 5  ;;  %v11905_v36 = vld [vmem:[#allocation2 + $0xc8] sm:$0x1] }
 0x4bf   : > { %v6292_v20 = vrot.slane %v6290_v17, 4  ;;  %v9475_v60 = vcombine.low %v6217_v62, %v6227_v38  ;;  %v6251_v57 = vsel %vm13027_vm13, %v6246_v25, %v6250_v16  ;;  %v6272_v1 = vshll.u32 %v11902_v0, 16 }
 0x4c0   : > { %v9476_v55 = vcombine.low %v6241_v51, %v6251_v57  ;;  %v6260_v10 = vrot.slane %v6259_v58, 4  ;;  %v6269_v3 = vor.u32 %v6268_v40, %v6264_v48  ;;  %v6296_v44 = vshll.u32 %v11903_v11, 16 }
 0x4c1   : > { %v6303_v22 = vrot.slane %v6301_v2, 4  ;;  %v6306_v23 = vrot.slane %v6304_v52, 5  ;;  %v6310_v19 = vshll.u32 %v11904_v39, 16  ;;  %v6314_v59 = vshrl.u32 %v11904_v39, 16 }
 0x4c2   : > { %v6284_v18 = vrot.slane %v6283_v35, 4  ;;  %v6293_v26 = vor.u32 %v6292_v20, %v6288_v28  ;;  %v6274_v7 = vrot.slane %v6272_v1, 5  ;;  %v6265_v30 = vsel %vm13027_vm13, %v6260_v10, %v6264_v48 }
 0x4c3   : > { %v6298_v4 = vrot.slane %v6296_v44, 5  ;;  %v6270_v29 = vrot.slane %v6269_v3, 4  ;;  %v6307_v54 = vor.u32 %v6306_v23, %v6303_v22  ;;  %v6312_v31 = vrot.slane %v6310_v19, 5  ;;  %v6647_v22 = vld [vmem:[#allocation2 + $0x18] sm:$0xe] }
 0x4c4   : > { %v6316_v17 = vrot.slane %v6314_v59, 4  ;;  %v6289_v33 = vsel %vm13027_vm13, %v6284_v18, %v6288_v28  ;;  %v6294_v62 = vrot.slane %v6293_v26, 4  ;;  %v6320_v58 = vshll.u32 %v11905_v36, 16  ;;  %v6646_v28 = vld [vmem:[#allocation2 + $0xc] sm:$0xe]  ;;  %v11847_v36 = vld [vmem:[%s14777_s3 + $0x1b8] sm:$0xff]  }
 0x4c5   : > { %10899 = vmatmul.mubr.bf16.gmra.mrb[40].mxu1 %v9475_v60  ;;  %v6275_v16 = vsel %vm13027_vm13, %v6270_v29, %v6274_v7  ;;  %v6712_v48 = vrot.slane %v13894_v37, 5  ;;  %v6308_v2 = vrot.slane %v6307_v54, 4  ;;  %v6715_v38 = vrot.slane %v13904_v42, 5  ;;  %v11841_v26 = vld [vmem:[%s14777_s3 + $0x188] sm:$0xff]   ;;  %v11842_v7 = vld [vmem:[%s14777_s3 + $0x190] sm:$0xff]   ;;  %v14942_v29 = vld [vmem:[#allocation3_spill] sm:$0xff] }
 0x4c6   : > { %10902 = vmatprep.mubr.bf16.mxu1 %v9476_v55  ;;  %v9477_v40 = vcombine.low %v6265_v30, %v6275_v16  ;;  %v6299_v51 = vsel %vm13027_vm13, %v6294_v62, %v6298_v4  ;;  %v6317_v52 = vor.u32 %v6316_v17, %v6312_v31  ;;  %v6322_v35 = vrot.slane %v6320_v58, 5  ;;  %v11906_v55 = vld [vmem:[#allocation2 + $0x1c] sm:$0xf]  ;;  %v11845_v54 = vld [vmem:[%s14777_s3 + $0x1a8] sm:$0xff]   ;;  %v14946_v17 = vld [vmem:[#allocation6_spill] sm:$0xff] }
 0x4c7   : > { %v9478_v25 = vcombine.low %v6289_v33, %v6299_v51  ;;  %v6714_v20 = vrot.slane %v6712_v48, 4  ;;  %v6313_v60 = vsel %vm13027_vm13, %v6308_v2, %v6312_v31  ;;  %v9488_v0 = vrot.slane %v6646_v28, 9  ;;  %v11843_v30 = vld [vmem:[%s14777_s3 + $0x198] sm:$0xff]   ;;  %v14945_v31 = vld [vmem:[#allocation4_spill] sm:$0xff]  ;;  %v14949_v33 = vld [vmem:[#allocation9_spill] sm:$0xff] }
 0x4c8   : > { %v6318_v57 = vrot.slane %v6317_v52, 4  ;;  %v6719_v10 = vrot.slane %v11906_v55, 5  ;;  %v6722_v44 = vrot.slane %v13908_v56, 5  ;;  %v9489_v39 = vrot.slane %v6647_v22, 9  ;;  %v11846_v16 = vld [vmem:[%s14777_s3 + $0x1b0] sm:$0xff]   ;;  %v14951_v58 = vld [vmem:[#allocation8_spill] sm:$0xff] }
 0x4c9   : > { %v6716_v1 = vsel %vm13424_vm0, %v6714_v20, %v6715_v38  ;;  %v6713_v42 = vsel %vm13424_vm0, %v9488_v0, %v6712_v48  ;;  %v14940_v56 = vcombine.low %v13685_v8, %v13697_v34  ;;  %v14941_v4 = vcombine.low %v13692_v47, %v13707_v32  ;;  %v14943_v8 = vld [vmem:[#allocation5_spill] sm:$0xff]  ;;  %v14948_v32 = vld [vmem:[#allocation7_spill] sm:$0xff]  ;;  %v11850_v52 = vld [vmem:[%s14777_s3 + $0x1c0] sm:$0xff]  }
 0x4ca   : > { %v6323_v37 = vsel %vm13027_vm13, %v6318_v57, %v6322_v35  ;;  %v9520_v11 = vcombine.low %v6713_v42, %v6716_v1  ;;  %v6721_v23 = vrot.slane %v6719_v10, 4  ;;  %v6720_v59 = vsel %vm13424_vm0, %v9489_v39, %v6719_v10  ;;  %v14954_v48 = vld [vmem:[#allocation11_spill] sm:$0xff]  ;;  %v14957_v38 = vld [vmem:[#allocation13_spill] sm:$0xff]  ;;  %v14958_v35 = vld [vmem:[#allocation14_spill] sm:$0xff] }
 0x4cb   : > { %v9479_v3 = vcombine.low %v6313_v60, %v6323_v37  ;;  %v14944_v34 = vcombine.low %v14942_v29, %v14943_v8  ;;  %v14947_v47 = vcombine.low %v14945_v31, %v14946_v17  ;;  %v14950_v62 = vcombine.low %v14948_v32, %v14949_v33  ;;  %v14960_v20 = vld [vmem:[#allocation15_spill] sm:$0xff]  ;;  %v14961_v60 = vld [vmem:[#allocation16_spill] sm:$0xff]  ;;  %v14963_v0 = vld [vmem:[#allocation17_spill] sm:$0xff] }
 0x4cc   : > { %v6723_v19 = vsel %vm13424_vm0, %v6721_v23, %v6722_v44  ;;  %v14959_v28 = vcombine.low %v14957_v38, %v14958_v35  ;;  %v14962_v57 = vcombine.low %v14960_v20, %v14961_v60  ;;  %v14964_v1 = vld [vmem:[#allocation18_spill] sm:$0xff]  ;;  %v14966_v55 = vld [vmem:[#allocation19_spill] sm:$0xff]  ;;  %v14967_v10 = vld [vmem:[#allocation20_spill] sm:$0xff] }
 0x4cd   : > { %10903 = vmatmul.mubr.bf16.gmra.mrb[44].mxu1 %v9477_v40  ;;  %v9521_v18 = vcombine.low %v6720_v59, %v6723_v19  ;;  %v14952_v40 = vld [vmem:[#allocation10_spill] sm:$0xff]  ;;  %v14965_v37 = vcombine.low %v14963_v0, %v14964_v1  ;;  %v14969_v42 = vld [vmem:[#allocation21_spill] sm:$0xff]  ;;  %v14972_v22 = vld [vmem:[#allocation23_spill] sm:$0xff] }
 0x4ce   : > { %10906 = vmatprep.mubr.bf16.mxu1 %v9478_v25  ;;  %v14953_v51 = vcombine.low %v14951_v58, %v14952_v40  ;;  %v14955_v25 = vld [vmem:[#allocation12_spill] sm:$0xff]  ;;  %v11848_v19 = vld [vmem:[#allocation2 + $0x18] sm:$0xff]   ;;  %v14975_v59 = vld [vmem:[#allocation25_spill] sm:$0xff] }
 0x4cf   : > { %v14956_v2 = vcombine.low %v14954_v48, %v14955_v25  ;;  %v14973_v23 = vld [vmem:[#allocation24_spill] sm:$0xff]  ;;  %v11859_v8 = vld [vmem:[%s14777_s3 + $0x1d8] sm:$0xff]   ;;  %v11865_v31 = vld [vmem:[%s14777_s3 + $0x1e8] sm:$0xff]  }
 0x4d0   : > { %v14974_v39 = vcombine.low %v14972_v22, %v14973_v23  ;;  %v11852_v29 = vld [vmem:[#allocation2 + $0x3c] sm:$0xff]   ;;  %v11858_v32 = vld [vmem:[#allocation2 + $0x6c] sm:$0xff]   ;;  %v11861_v58 = vld [vmem:[#allocation2 + $0x84] sm:$0xff]  }
 0x4d1   : > { %v11857_v17 = vld [vmem:[#allocation2 + $0x60] sm:$0xff]   ;;  %v11871_v33 = vld [vmem:[%s14777_s3 + $0x1f8] sm:$0xff]   ;;  %v11863_v40 = vld [vmem:[#allocation2 + $0x90] sm:$0xff]  }
 0x4d2   : > { %v14978_v25 = vld [vmem:[#allocation27_spill] sm:$0xff]  ;;  %v7534_v38 = vld [vmem:[#allocation2 + $0x24] sm:$0xf] }
 0x4d3   : > { %v11864_v0 = vld [vmem:[#allocation2 + $0x9c] sm:$0xff]   ;;  %v7607_v1 = vshll.u32 %v7534_v38, 16 }
 0x4d5   : > { %10907 = vmatmul.mubr.bf16.gmra.mrb[48].mxu1 %v9479_v3  ;;  %v14968_v3 = vcombine.low %v14966_v55, %v14967_v10 }
 0x4d6   : > { %10926 = vmatprep.mubr.bf16.mxu1 %v9520_v11  ;;  %v14970_v11 = vld [vmem:[#allocation22_spill] sm:$0xff] }
 0x4d7   : > { %v14971_v44 = vcombine.low %v14969_v42, %v14970_v11  ;;  %v11866_v42 = vld [vmem:[#allocation2 + $0xa8] sm:$0xff]  }
 0x4dd   : > { %10927 = vmatmul.mubr.bf16.vlgmr.msra.gmra.mrb[20].mxu1 %v9521_v18  ;;  %v14976_v18 = vld [vmem:[#allocation26_spill] sm:$0xff] }
 0x4de   : > { %10930 = vmatprep.mubr.bf16.mxu1 %v14940_v56  ;;  %10959 = vmatpush3.bf16.msra.mxu1 %v14313_v43  ;;  %v11844_v43 = vld [vmem:[%s14777_s3 + $0x1a0] sm:$0xff]  }
 0x4df   : > { %10960 = vmatprep.subr.bf16.mxu1 %v11841_v26  ;;  %v11849_v56 = vld [vmem:[#allocation2 + $0x24] sm:$0xff]  }
 0x4e2   : > { %10961 = vmatpush3.bf16.msra.mxu1 %v11841_v26  ;;  %v14977_v26 = vcombine.low %v14975_v59, %v14976_v18 }
 0x4e3   : > { %10962 = vmatprep.subr.bf16.mxu1 %v11842_v7 }
 0x4e5   : > { %10931 = vmatmul.mubr.bf16.gmra.mrb[24].mxu1 %v14941_v4  ;;  %v11856_v4 = vld [vmem:[%s14777_s3 + $0x1d0] sm:$0xff]  }
 0x4e6   : > { %10934 = vmatprep.mubr.bf16.mxu1 %v14944_v34  ;;  %10963 = vmatpush3.bf16.msra.mxu1 %v11842_v7  ;;  %v11853_v7 = vld [vmem:[%s14777_s3 + $0x1c8] sm:$0xff]  }
 0x4e7   : > { %10964 = vmatprep.subr.bf16.mxu1 %v11843_v30  ;;  %v11854_v34 = vld [vmem:[#allocation2 + $0x48] sm:$0xff]  }
 0x4ea   : > { %10965 = vmatpush3.bf16.msra.mxu1 %v11843_v30  ;;  %v11851_v30 = vld [vmem:[#allocation2 + $0x30] sm:$0xff]  }
 0x4eb   : > { %10966 = vmatprep.subr.bf16.mxu1 %v11844_v43 }
 0x4ed   : > { %10935 = vmatmul.mubr.bf16.gmra.mrb[28].mxu1 %v14947_v47  ;;  %v11868_v47 = vld [vmem:[%s14777_s3 + $0x1f0] sm:$0xff]  }
 0x4ee   : > { %10938 = vmatprep.mubr.bf16.mxu1 %v14950_v62  ;;  %10967 = vmatpush3.bf16.msra.mxu1 %v11844_v43  ;;  %v11862_v43 = vld [vmem:[%s14777_s3 + $0x1e0] sm:$0xff]   ;;  %v11860_v62 = vld [vmem:[#allocation2 + $0x78] sm:$0xff]  }
 0x4ef   : > { %10968 = vmatprep.subr.bf16.mxu1 %v11845_v54 }
 0x4f2   : > { %10969 = vmatpush3.bf16.msra.mxu1 %v11845_v54  ;;  %v11855_v54 = vld [vmem:[#allocation2 + $0x54] sm:$0xff]  }
 0x4f3   : > { %10970 = vmatprep.subr.bf16.mxu1 %v11846_v16 }
 0x4f5   : > { %10939 = vmatmul.mubr.bf16.gmra.mrb[32].mxu1 %v14953_v51 }
 0x4f6   : > { %10942 = vmatprep.mubr.bf16.mxu1 %v14956_v2  ;;  %10971 = vmatpush3.bf16.msra.mxu1 %v11846_v16  ;;  %v14443_v16 = vld [vmem:[%s14777_s3 + $0x200] sm:$0xff]   ;;  %v7589_v2 = vshll.u32 %v14978_v25, 16 }
 0x4f7   : > { %10972 = vmatprep.subr.bf16.mxu1 %v11847_v36 }
 0x4f8   : > { %v14448_v20 = vrot.slane %v7589_v2, 5 }
 0x4fa   : > { %10973 = vmatpush3.bf16.msra.mxu1 %v11847_v36  ;;  %v7531_v36 = vld [vmem:[#allocation2 + $0x18] sm:$0xf] }
 0x4fb   : > { %11006 = vmatprep.subr.bf16.mxu1 %v11850_v52  ;;  %v7580_v51 = vshrl.u32 %v7531_v36, 16  ;;  %v7583_v48 = vshll.u32 %v7531_v36, 16 }
 0x4fd   : > { %10943 = vmatmul.mubr.bf16.gmra.mrb[36].mxu1 %v14959_v28  ;;  %v7582_v35 = vrot.slane %v7580_v51, 4  ;;  %v7585_v28 = vrot.slane %v7583_v48, 5  ;;  %v7543_v51 = vld [vmem:[#allocation2 + $0x48] sm:$0xf]  ;;  %v11869_v48 = vld [vmem:[#allocation2 + $0xc0] sm:$0xff]  }
 0x4fe   : > { %10946 = vmatprep.mubr.bf16.mxu1 %v14962_v57  ;;  %v7604_v57 = vshrl.u32 %v7534_v38, 16 }
 0x4ff   : > { %v7586_v11 = vor.u32 %v7585_v28, %v7582_v35 }
 0x505   : > { %10947 = vmatmul.mubr.bf16.gmra.mrb[40].mxu1 %v14965_v37  ;;  %v14979_v37 = vld [vmem:[#allocation29_spill] sm:$0xff] }
 0x506   : > { %10950 = vmatprep.mubr.bf16.mxu1 %v14968_v3  ;;  %v7613_v55 = vshll.u32 %v14979_v37, 16  ;;  %v7617_v10 = vshrl.u32 %v14979_v37, 16  ;;  %v7537_v3 = vld [vmem:[#allocation2 + $0x30] sm:$0xf]  ;;  %v14473_v37 = vld [vmem:[#allocation2 + $0xd4] sm:$0x1] }
 0x507   : > { %v7628_v18 = vshrl.u32 %v7537_v3, 16 }
 0x50d   : > { %10951 = vmatmul.mubr.bf16.gmra.mrb[44].mxu1 %v14971_v44  ;;  %v14980_v44 = vld [vmem:[#allocation28_spill] sm:$0xff] }
 0x50e   : > { %10954 = vmatprep.mubr.bf16.mxu1 %v14974_v39  ;;  %v7599_v22 = vshll.u32 %v14980_v44, 16  ;;  %v7606_v39 = vrot.slane %v7604_v57, 4 }
 0x515   : > { %10955 = vmatmul.mubr.bf16.gmra.mrb[48].mxu1 %v14977_v26  ;;  %v7540_v26 = vld [vmem:[#allocation2 + $0x3c] sm:$0xf] }
 0x516   : > { %10974 = vmatprep.mubr.bf16.mxu1 %v11848_v19  ;;  %v14981_v19 = vld [vmem:[#allocation30_spill] sm:$0xff] }
 0x517   : > { %v7623_v59 = vshll.u32 %v14981_v19, 16 }
 0x51d   : > { %10975 = vmatmul.mubr.bf16.vlgmr.msra.gmra.mrb[20].mxu1 %v11849_v56  ;;  %v7609_v56 = vrot.slane %v7607_v1, 5  ;;  %v14471_v1 = vld [vmem:[#allocation2 + $0xd0] sm:$0xf] }
 0x51e   : > { %10978 = vmatprep.mubr.bf16.mxu1 %v11851_v30  ;;  %11007 = vmatpush3.bf16.msra.mxu1 %v11850_v52  ;;  %v7593_v52 = vshrl.u32 %v14978_v25, 16  ;;  %v7619_v30 = vrot.slane %v7617_v10, 4  ;;  %v7679_v10 = vshll.u32 %v7543_v51, 16 }
 0x51f   : > { %11008 = vmatprep.subr.bf16.mxu1 %v11853_v7 }
 0x520   : > { %v7595_v60 = vrot.slane %v7593_v52, 4  ;;  %v14983_v52 = vld [vmem:[#allocation33_spill] sm:$0xff] }
 0x521   : > { %v7661_v38 = vshll.u32 %v14983_v52, 16  ;;  %v7665_v35 = vshrl.u32 %v14983_v52, 16 }
 0x522   : > { %11009 = vmatpush3.bf16.msra.mxu1 %v11853_v7  ;;  %v7596_v23 = vor.u32 %v7595_v60, %v14448_v20  ;;  %v14455_v7 = vrot.slane %v7613_v55, 5  ;;  %v7676_v55 = vshrl.u32 %v7543_v51, 16 }
 0x523   : > { %11010 = vmatprep.subr.bf16.mxu1 %v11856_v4 }
 0x524   : > { %v7620_v36 = vor.u32 %v7619_v30, %v14455_v7 }
 0x525   : > { %10979 = vmatmul.mubr.bf16.gmra.mrb[24].mxu1 %v11852_v29  ;;  %v14982_v29 = vld [vmem:[#allocation31_spill] sm:$0xff] }
 0x526   : > { %10982 = vmatprep.mubr.bf16.mxu1 %v11854_v34  ;;  %11011 = vmatpush3.bf16.msra.mxu1 %v11856_v4  ;;  %v7631_v4 = vshll.u32 %v7537_v3, 16  ;;  %v7641_v34 = vshrl.u32 %v14982_v29, 16  ;;  %v8300_v3 = vld [vmem:[#allocation2 + $0xcc] sm:$0xe] }
 0x527   : > { %11012 = vmatprep.subr.bf16.mxu1 %v11859_v8 }
 0x528   : > { %v7643_v2 = vrot.slane %v7641_v34, 4 }
 0x52a   : > { %11013 = vmatpush3.bf16.msra.mxu1 %v11859_v8  ;;  %v7637_v8 = vshll.u32 %v14982_v29, 16  ;;  %v14985_v29 = vld [vmem:[#allocation35_spill] sm:$0xff] }
 0x52b   : > { %11014 = vmatprep.subr.bf16.mxu1 %v11862_v43 }
 0x52c   : > { %v14462_v25 = vrot.slane %v7637_v8, 5  ;;  %v7685_v8 = vshll.u32 %v14985_v29, 16 }
 0x52d   : > { %10983 = vmatmul.mubr.bf16.gmra.mrb[28].mxu1 %v11855_v54  ;;  %v7601_v54 = vrot.slane %v7599_v22, 5  ;;  %v7621_v22 = vrot.slane %v7620_v36, 4 }
 0x52e   : > { %10986 = vmatprep.mubr.bf16.mxu1 %v11857_v17  ;;  %11015 = vmatpush3.bf16.msra.mxu1 %v11862_v43  ;;  %v7587_v43 = vrot.slane %v7586_v11, 4  ;;  %v7655_v17 = vshll.u32 %v7540_v26, 16  ;;  %v8459_v11 = vrot.slane %v14473_v37, 5  ;;  %v7644_v30 = vor.u32 %v7643_v2, %v14462_v25  ;;  %v14986_v2 = vld [vmem:[#allocation34_spill] sm:$0xff] }
 0x52f   : > { %11016 = vmatprep.subr.bf16.mxu1 %v11865_v31  ;;  %v7671_v52 = vshll.u32 %v14986_v2, 16 }
 0x530   : > { %v7592_v28 = vsel %vm13027_vm13, %v7587_v43, %v14448_v20  ;;  %v14984_v20 = vld [vmem:[#allocation32_spill] sm:$0xff]  ;;  %v7678_v43 = vrot.slane %v7676_v55, 4  ;;  %v11907_v55 = vld [vmem:[#allocation2 + $0x58] sm:$0xf] }
 0x532   : > { %11017 = vmatpush3.bf16.msra.mxu1 %v11865_v31  ;;  %v7652_v31 = vshrl.u32 %v7540_v26, 16 }
 0x533   : > { %11018 = vmatprep.subr.bf16.mxu1 %v11868_v47 }
 0x534   : > { %v7654_v57 = vrot.slane %v7652_v31, 4  ;;  %v7689_v31 = vshrl.u32 %v14985_v29, 16 }
 0x535   : > { %10987 = vmatmul.mubr.bf16.gmra.mrb[32].mxu1 %v11858_v32  ;;  %v14459_v32 = vrot.slane %v7623_v59, 5  ;;  %v7663_v59 = vrot.slane %v7661_v38, 5  ;;  %v7645_v38 = vrot.slane %v7644_v30, 4  ;;  %v7552_v30 = vld [vmem:[#allocation2 + $0x6c] sm:$0xf] }
 0x536   : > { %10990 = vmatprep.mubr.bf16.mxu1 %v11860_v62  ;;  %11019 = vmatpush3.bf16.msra.mxu1 %v11868_v47  ;;  %v7597_v47 = vrot.slane %v7596_v23, 4  ;;  %v7610_v62 = vor.u32 %v7609_v56, %v7606_v39  ;;  %v7647_v23 = vshll.u32 %v14984_v20, 16  ;;  %v9639_v39 = vrot.slane %v8300_v3, 9  ;;  %v11870_v56 = vld [vmem:[#allocation2 + $0xcc] sm:$0xff]  }
 0x537   : > { %11020 = vmatprep.subr.bf16.mxu1 %v11871_v33 }
 0x538   : > { %v7602_v60 = vsel %vm13027_vm13, %v7597_v47, %v7601_v54  ;;  %v7611_v44 = vrot.slane %v7610_v62, 4  ;;  %v7681_v54 = vrot.slane %v7679_v10, 5  ;;  %v7649_v36 = vrot.slane %v7647_v23, 5 }
 0x539   : > { %v7709_v10 = vshll.u32 %v11907_v55, 16  ;;  %v7673_v23 = vrot.slane %v7671_v52, 5 }
 0x53a   : > { %11021 = vmatpush3.bf16.msra.mxu1 %v11871_v33  ;;  %v11867_v33 = vld [vmem:[#allocation2 + $0xb4] sm:$0xff]   ;;  %v7616_v62 = vsel %vm13027_vm13, %v7611_v44, %v14455_v7  ;;  %v7682_v7 = vor.u32 %v7681_v54, %v7678_v43  ;;  %v14987_v43 = vld [vmem:[#allocation40_spill] sm:$0xff]  ;;  %v11873_v54 = vld [vmem:[%s14777_s3 + $0x208] sm:$0xff]  }
 0x53b   : > { %11054 = vmatprep.subr.bf16.mxu1 %v14443_v16 }
 0x53d   : > { %10991 = vmatmul.mubr.bf16.gmra.mrb[36].mxu1 %v11861_v58  ;;  %v7630_v58 = vrot.slane %v7628_v18, 4  ;;  %v7667_v18 = vrot.slane %v7665_v35, 4 }
 0x53e   : > { %10994 = vmatprep.mubr.bf16.mxu1 %v11863_v40  ;;  %v7633_v40 = vrot.slane %v7631_v4, 5 }
 0x540   : > { %v7634_v19 = vor.u32 %v7633_v40, %v7630_v58  ;;  %v7626_v40 = vsel %vm13027_vm13, %v7621_v22, %v14459_v32  ;;  %v7724_v32 = vshrl.u32 %v7549_v21, 16  ;;  %v7650_v22 = vsel %vm13027_vm13, %v7645_v38, %v7649_v36 }
 0x541   : > { %v9601_v3 = vcombine.low %v7616_v62, %v7626_v40  ;;  %v7748_v40 = vshrl.u32 %v7552_v30, 16 }
 0x542   : > { %v7635_v51 = vrot.slane %v7634_v19, 4  ;;  %v11908_v19 = vld [vmem:[#allocation2 + $0x50] sm:$0x1] }
 0x544   : > { %v7640_v44 = vsel %vm13027_vm13, %v7635_v51, %v14462_v25  ;;  %v7733_v25 = vshll.u32 %v14987_v43, 16  ;;  %v7751_v51 = vshll.u32 %v7552_v30, 16 }
 0x545   : > { %10995 = vmatmul.mubr.bf16.gmra.mrb[40].mxu1 %v11864_v0  ;;  %v7657_v0 = vrot.slane %v7655_v17, 5  ;;  %v7546_v17 = vld [vmem:[#allocation2 + $0x54] sm:$0xf]  ;;  %v9602_v62 = vcombine.low %v7640_v44, %v7650_v22 }
 0x546   : > { %10998 = vmatprep.mubr.bf16.mxu1 %v11866_v42  ;;  %v8456_v42 = vrot.slane %v14471_v1, 5  ;;  %v7753_v44 = vrot.slane %v7751_v51, 5 }
 0x547   : > { %v7658_v4 = vor.u32 %v7657_v0, %v7654_v57  ;;  %v14498_v57 = vrot.slane %v7685_v8, 5  ;;  %v7691_v0 = vrot.slane %v7689_v31, 4  ;;  %v14508_v8 = vrot.slane %v7709_v10, 5 }
 0x548   : > { %v8458_v26 = vrot.slane %v8456_v42, 4  ;;  %v14482_v34 = vsel %vm13424_vm0, %v9639_v39, %v8456_v42  ;;  %v7713_v42 = vshrl.u32 %v11907_v55, 16 }
 0x549   : > { %v7659_v35 = vrot.slane %v7658_v4, 4  ;;  %v7683_v4 = vrot.slane %v7682_v7, 4  ;;  %v7692_v29 = vor.u32 %v7691_v0, %v14498_v57  ;;  %v11910_v7 = vld [vmem:[#allocation2 + $0x70] sm:$0xf] }
 0x54a   : > { %v14487_v47 = vsel %vm13424_vm0, %v8458_v26, %v8459_v11  ;;  %v7727_v11 = vshll.u32 %v7549_v21, 16  ;;  %v7715_v31 = vrot.slane %v7713_v42, 4  ;;  %v11909_v21 = vld [vmem:[#allocation2 + $0x5c] sm:$0x1]  ;;  %v7757_v0 = vshll.u32 %v11910_v7, 16 }
 0x54b   : > { %v9671_v58 = vcombine.low %v14482_v34, %v14487_v47  ;;  %v7664_v39 = vsel %vm13027_vm13, %v7659_v35, %v7663_v59  ;;  %v7719_v38 = vshll.u32 %v11909_v21, 16  ;;  %v7555_v35 = vld [vmem:[#allocation2 + $0x78] sm:$0xf]  ;;  %v7761_v55 = vshrl.u32 %v11910_v7, 16 }
 0x54c   : > { %v7716_v10 = vor.u32 %v7715_v31, %v14508_v8  ;;  %v7772_v22 = vshrl.u32 %v7555_v35, 16  ;;  %v9681_v34 = vld [vmem:[%s12015_s6 + $0x39] sm:$0xff] }
 0x54d   : > { %10999 = vmatmul.mubr.bf16.gmra.mrb[44].mxu1 %v11867_v33  ;;  %v9600_v33 = vcombine.low %v7592_v28, %v7602_v60  ;;  %v7700_v28 = vshrl.u32 %v7546_v17, 16  ;;  %v7703_v60 = vshll.u32 %v7546_v17, 16  ;;  %v7726_v17 = vrot.slane %v7724_v32, 4 }
 0x54e   : > { %11002 = vmatprep.mubr.bf16.mxu1 %v11869_v48  ;;  %v7668_v48 = vor.u32 %v7667_v18, %v7663_v59  ;;  %v7695_v18 = vshll.u32 %v11908_v19, 16  ;;  %v7737_v59 = vshrl.u32 %v14987_v43, 16  ;;  %v14525_v32 = vrot.slane %v7733_v25, 5  ;;  %v7558_v43 = vld [vmem:[#allocation2 + $0x84] sm:$0xf] }
 0x54f   : > { %v7702_v26 = vrot.slane %v7700_v28, 4  ;;  %v7688_v28 = vsel %vm13027_vm13, %v7683_v4, %v14498_v57  ;;  %v14529_v4 = vrot.slane %v7757_v0, 5  ;;  %v7717_v31 = vrot.slane %v7716_v10, 4 }
 0x550   : > { %v7669_v20 = vrot.slane %v7668_v48, 4  ;;  %v7697_v2 = vrot.slane %v7695_v18, 5  ;;  %v7774_v51 = vrot.slane %v7772_v22, 4 }
 0x552   : > { %v7674_v36 = vsel %vm13027_vm13, %v7669_v20, %v7673_v23  ;;  %v7775_v20 = vshll.u32 %v7555_v35, 16  ;;  %v7721_v23 = vrot.slane %v7719_v38, 5  ;;  %v7796_v38 = vshrl.u32 %v7558_v43, 16 }
 0x553   : > { %v9603_v48 = vcombine.low %v7664_v39, %v7674_v36  ;;  %v11911_v39 = vld [vmem:[#allocation2 + $0x7c] sm:$0xf]  ;;  %v7799_v35 = vshll.u32 %v7558_v43, 16  ;;  %v11916_v43 = vld [vmem:[#allocation2 + $0x94] sm:$0xf] }
 0x554   : > { %v7781_v19 = vshll.u32 %v11911_v39, 16  ;;  %v7785_v18 = vshrl.u32 %v11911_v39, 16  ;;  %v11915_v39 = vld [vmem:[#allocation2 + $0x88] sm:$0xf] }
 0x555   : > { %11003 = vmatmul.mubr.bf16.gmra.mrb[48].mxu1 %v11870_v56  ;;  %v7705_v56 = vrot.slane %v7703_v60, 5  ;;  %v7693_v60 = vrot.slane %v7692_v29, 4  ;;  %v7763_v29 = vrot.slane %v7761_v55, 4  ;;  %v7722_v55 = vsel %vm13027_vm13, %v7717_v31, %v7721_v23 }
 0x556   : > { %11022 = vmatprep.mubr.bf16.mxu1 %v9600_v33  ;;  %v7729_v33 = vrot.slane %v7727_v11, 5  ;;  %v7739_v11 = vrot.slane %v7737_v59, 4  ;;  %v11875_v59 = vld [vmem:[%s14777_s3 + $0x218] sm:$0xff]   ;;  %v7787_v21 = vrot.slane %v7785_v18, 4  ;;  %v7801_v23 = vrot.slane %v7799_v35, 5 }
 0x557   : > { %v7706_v52 = vor.u32 %v7705_v56, %v7702_v26  ;;  %v7698_v26 = vsel %vm13027_vm13, %v7693_v60, %v7697_v2  ;;  %v11912_v56 = vld [vmem:[#allocation2 + $0x68] sm:$0x1]  ;;  %v7777_v2 = vrot.slane %v7775_v20, 5  ;;  %v7764_v60 = vor.u32 %v7763_v29, %v14529_v4 }
 0x558   : > { %v7730_v42 = vor.u32 %v7729_v33, %v7726_v17  ;;  %v7743_v30 = vshll.u32 %v11912_v56, 16  ;;  %v9604_v25 = vcombine.low %v7688_v28, %v7698_v26  ;;  %v7740_v33 = vor.u32 %v7739_v11, %v14525_v32  ;;  %v11876_v11 = vld [vmem:[%s14777_s3 + $0x220] sm:$0xff]  }
 0x559   : > { %v7707_v57 = vrot.slane %v7706_v52, 4  ;;  %v14535_v52 = vrot.slane %v7781_v19, 5  ;;  %v7805_v19 = vshll.u32 %v11915_v39, 16  ;;  %v7765_v18 = vrot.slane %v7764_v60, 4 }
 0x55a   : > { %v7731_v17 = vrot.slane %v7730_v42, 4  ;;  %v7741_v10 = vrot.slane %v7740_v33, 4  ;;  %v7745_v42 = vrot.slane %v7743_v30, 5  ;;  %v7833_v31 = vshrl.u32 %v11916_v43, 16  ;;  %v11877_v33 = vld [vmem:[%s14777_s3 + $0x228] sm:$0xff]  }
 0x55b   : > { %v7712_v28 = vsel %vm13027_vm13, %v7707_v57, %v14508_v8  ;;  %v7788_v20 = vor.u32 %v7787_v21, %v14535_v52  ;;  %v7798_v57 = vrot.slane %v7796_v38, 4  ;;  %v14560_v21 = vrot.slane %v7805_v19, 5  ;;  %v7567_v38 = vld [vmem:[#allocation2 + $0xa8] sm:$0xf] }
 0x55c   : > { %v9605_v30 = vcombine.low %v7712_v28, %v7722_v55  ;;  %v7746_v29 = vsel %vm13027_vm13, %v7741_v10, %v7745_v42  ;;  %v7835_v55 = vrot.slane %v7833_v31, 4  ;;  %v11878_v42 = vld [vmem:[%s14777_s3 + $0x230] sm:$0xff]  }
 0x55d   : > { %11023 = vmatmul.mubr.bf16.vlgmr.msra.gmra.mrb[20].mxu1 %v9601_v3  ;;  %v11874_v3 = vld [vmem:[%s14777_s3 + $0x210] sm:$0xff]  }
 0x55e   : > { %11026 = vmatprep.mubr.bf16.mxu1 %v9602_v62  ;;  %11055 = vmatpush3.bf16.msra.mxu1 %v14443_v16  ;;  %v7750_v16 = vrot.slane %v7748_v40, 4  ;;  %v7561_v62 = vld [vmem:[#allocation2 + $0x90] sm:$0xf]  ;;  %v11913_v40 = vld [vmem:[#allocation2 + $0x74] sm:$0x1] }
 0x55f   : > { %11056 = vmatprep.subr.bf16.mxu1 %v11873_v54  ;;  %v7820_v7 = vshrl.u32 %v7561_v62, 16  ;;  %v7823_v0 = vshll.u32 %v7561_v62, 16 }
 0x560   : > { %v7754_v36 = vor.u32 %v7753_v44, %v7750_v16  ;;  %v7778_v16 = vor.u32 %v7777_v2, %v7774_v51  ;;  %v11914_v44 = vld [vmem:[#allocation2 + $0x80] sm:$0x1]  ;;  %v7789_v51 = vrot.slane %v7788_v20, 4  ;;  %v7802_v2 = vor.u32 %v7801_v23, %v7798_v57  ;;  %v11919_v23 = vld [vmem:[#allocation2 + $0x98] sm:$0x1] }
 0x561   : > { %v7791_v22 = vshll.u32 %v11914_v44, 16  ;;  %v7822_v26 = vrot.slane %v7820_v7, 4  ;;  %v7825_v56 = vrot.slane %v7823_v0, 5  ;;  %v7868_v44 = vshrl.u32 %v7567_v38, 16 }
 0x562   : > { %11057 = vmatpush3.bf16.msra.mxu1 %v11873_v54  ;;  %v7767_v54 = vshll.u32 %v11913_v40, 16  ;;  %v7755_v8 = vrot.slane %v7754_v36, 4  ;;  %v7803_v57 = vrot.slane %v7802_v2, 4 }
 0x563   : > { %11058 = vmatprep.subr.bf16.mxu1 %v11874_v3  ;;  %v7793_v40 = vrot.slane %v7791_v22, 5  ;;  %v7826_v28 = vor.u32 %v7825_v56, %v7822_v26  ;;  %v7871_v22 = vshll.u32 %v7567_v38, 16  ;;  %v11921_v38 = vld [vmem:[#allocation2 + $0xa4] sm:$0x1] }
 0x565   : > { %11027 = vmatmul.mubr.bf16.gmra.mrb[24].mxu1 %v9603_v48  ;;  %v7736_v48 = vsel %vm13027_vm13, %v7731_v17, %v14525_v32  ;;  %v7809_v32 = vshrl.u32 %v11915_v39, 16  ;;  %v7564_v17 = vld [vmem:[#allocation2 + $0x9c] sm:$0xf]  ;;  %v7794_v20 = vsel %vm13027_vm13, %v7789_v51, %v7793_v40  ;;  %v7839_v39 = vshll.u32 %v11919_v23, 16  ;;  %v11922_v23 = vld [vmem:[#allocation2 + $0xb0] sm:$0x1] }
 0x566   : > { %11030 = vmatprep.mubr.bf16.mxu1 %v9604_v25  ;;  %11059 = vmatpush3.bf16.msra.mxu1 %v11874_v3  ;;  %v7769_v3 = vrot.slane %v7767_v54, 5  ;;  %v7829_v25 = vshll.u32 %v11916_v43, 16  ;;  %v9606_v62 = vcombine.low %v7736_v48, %v7746_v29  ;;  %v7779_v54 = vrot.slane %v7778_v16, 4  ;;  %v11920_v43 = vld [vmem:[#allocation2 + $0xac] sm:$0xf] }
 0x567   : > { %11060 = vmatprep.subr.bf16.mxu1 %v11875_v59  ;;  %v7811_v35 = vrot.slane %v7809_v32, 4  ;;  %v7844_v60 = vshrl.u32 %v7564_v17, 16  ;;  %v7847_v7 = vshll.u32 %v7564_v17, 16  ;;  %v7870_v17 = vrot.slane %v7868_v44, 4 }
 0x568   : > { %v7770_v36 = vsel %vm13027_vm13, %v7765_v18, %v7769_v3  ;;  %v7831_v0 = vrot.slane %v7829_v25, 5  ;;  %v11918_v3 = vld [vmem:[#allocation2 + $0x8c] sm:$0x1]  ;;  %v7827_v18 = vrot.slane %v7826_v28, 4  ;;  %v7877_v25 = vshll.u32 %v11920_v43, 16 }
 0x569   : > { %v7815_v16 = vshll.u32 %v11918_v3, 16  ;;  %v7812_v19 = vor.u32 %v7811_v35, %v14560_v21  ;;  %v7846_v32 = vrot.slane %v7844_v60, 4  ;;  %v7849_v26 = vrot.slane %v7847_v7, 5  ;;  %v7573_v28 = vld [vmem:[#allocation2 + $0xc0] sm:$0xf] }
 0x56a   : > { %11061 = vmatpush3.bf16.msra.mxu1 %v11875_v59  ;;  %v7760_v59 = vsel %vm13027_vm13, %v7755_v8, %v14529_v4  ;;  %v11917_v4 = vld [vmem:[#allocation2 + $0xa0] sm:$0xf]  ;;  %v7836_v56 = vor.u32 %v7835_v55, %v7831_v0  ;;  %v7841_v40 = vrot.slane %v7839_v39, 5  ;;  %v7863_v35 = vshll.u32 %v11921_v38, 16 }
 0x56b   : > { %11062 = vmatprep.subr.bf16.mxu1 %v11876_v11  ;;  %v7853_v48 = vshll.u32 %v11917_v4, 16  ;;  %v7857_v10 = vshrl.u32 %v11917_v4, 16  ;;  %v9607_v8 = vcombine.low %v7760_v59, %v7770_v36  ;;  %v7881_v59 = vshrl.u32 %v11920_v43, 16 }
 0x56c   : > { %v7817_v36 = vrot.slane %v7815_v16, 5  ;;  %v7813_v51 = vrot.slane %v7812_v19, 4  ;;  %v7850_v2 = vor.u32 %v7849_v26, %v7846_v32  ;;  %v7832_v60 = vsel %vm13027_vm13, %v7827_v18, %v7831_v0  ;;  %v11923_v19 = vld [vmem:[#allocation2 + $0xb8] sm:$0xf]  ;;  %v7576_v26 = vld [vmem:[#allocation2 + $0xcc] sm:$0xf] }
 0x56d   : > { %11031 = vmatmul.mubr.bf16.gmra.mrb[28].mxu1 %v9605_v30  ;;  %v14571_v30 = vrot.slane %v7853_v48, 5  ;;  %v7859_v29 = vrot.slane %v7857_v10, 4  ;;  %v7837_v7 = vrot.slane %v7836_v56, 4  ;;  %v7879_v4 = vrot.slane %v7877_v25, 5 }
 0x56e   : > { %11034 = vmatprep.mubr.bf16.mxu1 %v9606_v62  ;;  %11063 = vmatpush3.bf16.msra.mxu1 %v11876_v11  ;;  %v7784_v11 = vsel %vm13027_vm13, %v7779_v54, %v14535_v52  ;;  %v11879_v52 = vld [vmem:[%s14777_s3 + $0x238] sm:$0xff]   ;;  %v7873_v62 = vrot.slane %v7871_v22, 5  ;;  %v7570_v54 = vld [vmem:[#allocation2 + $0xb4] sm:$0xf]  ;;  %v7883_v10 = vrot.slane %v7881_v59, 4  ;;  %v7916_v44 = vshrl.u32 %v7573_v28, 16 }
 0x56f   : > { %11064 = vmatprep.subr.bf16.mxu1 %v11877_v33  ;;  %v9608_v31 = vcombine.low %v7784_v11, %v7794_v20  ;;  %v7860_v55 = vor.u32 %v7859_v29, %v14571_v30  ;;  %v7895_v3 = vshll.u32 %v7570_v54, 16  ;;  %v7842_v16 = vsel %vm13027_vm13, %v7837_v7, %v7841_v40 }
 0x570   : > { %v7874_v48 = vor.u32 %v7873_v62, %v7870_v17  ;;  %v9610_v11 = vcombine.low %v7832_v60, %v7842_v16  ;;  %v7851_v0 = vrot.slane %v7850_v2, 4  ;;  %v7865_v20 = vrot.slane %v7863_v35, 5  ;;  %v11924_v62 = vld [vmem:[#allocation2 + $0xc4] sm:$0xf] }
 0x571   : > { %v7887_v39 = vshll.u32 %v11922_v23, 16  ;;  %v7901_v18 = vshll.u32 %v11923_v19, 16  ;;  %v7905_v32 = vshrl.u32 %v11923_v19, 16  ;;  %v7884_v29 = vor.u32 %v7883_v10, %v7879_v4 }
 0x572   : > { %11065 = vmatpush3.bf16.msra.mxu1 %v11877_v33  ;;  %v7808_v33 = vsel %vm13027_vm13, %v7803_v57, %v14560_v21  ;;  %v7818_v21 = vsel %vm13027_vm13, %v7813_v51, %v7817_v36  ;;  %v7861_v57 = vrot.slane %v7860_v55, 4  ;;  %v7875_v56 = vrot.slane %v7874_v48, 4  ;;  %v11925_v55 = vld [vmem:[#allocation2 + $0xbc] sm:$0x1] }
 0x573   : > { %11066 = vmatprep.subr.bf16.mxu1 %v11878_v42  ;;  %v9609_v22 = vcombine.low %v7808_v33, %v7818_v21  ;;  %v7897_v25 = vrot.slane %v7895_v3, 5  ;;  %v7925_v59 = vshll.u32 %v11924_v62, 16  ;;  %v7929_v36 = vshrl.u32 %v11924_v62, 16 }
 0x574   : > { %v7940_v40 = vshrl.u32 %v7576_v26, 16  ;;  %v7953_v33 = vshrl.u32 %v14471_v1, 16  ;;  %v7856_v51 = vsel %vm13027_vm13, %v7851_v0, %v14571_v30  ;;  %v7866_v2 = vsel %vm13027_vm13, %v7861_v57, %v7865_v20 }
 0x575   : > { %11035 = vmatmul.mubr.bf16.gmra.mrb[32].mxu1 %v9607_v8  ;;  %v7892_v8 = vshrl.u32 %v7570_v54, 16  ;;  %v7949_v54 = vshll.u32 %v14471_v1, 16  ;;  %v7889_v38 = vrot.slane %v7887_v39, 5  ;;  %v7903_v35 = vrot.slane %v7901_v18, 5 }
 0x576   : > { %11038 = vmatprep.mubr.bf16.mxu1 %v9608_v31  ;;  %11067 = vmatpush3.bf16.msra.mxu1 %v11878_v42  ;;  %v7919_v42 = vshll.u32 %v7573_v28, 16  ;;  %v7918_v31 = vrot.slane %v7916_v44, 4  ;;  %v7880_v28 = vsel %vm13027_vm13, %v7875_v56, %v7879_v4  ;;  %v7907_v7 = vrot.slane %v7905_v32, 4 }
 0x577   : > { %11068 = vmatprep.subr.bf16.mxu1 %v11879_v52  ;;  %v7894_v43 = vrot.slane %v7892_v8, 4  ;;  %v7911_v48 = vshll.u32 %v11925_v55, 16  ;;  %v7885_v10 = vrot.slane %v7884_v29, 4  ;;  %v7927_v3 = vrot.slane %v7925_v59, 5  ;;  %v14994_v55 = vld [vmem:[#allocation41_spill] sm:$0xff] }
 0x578   : > { %v7921_v17 = vrot.slane %v7919_v42, 5  ;;  %v7931_v1 = vrot.slane %v7929_v36, 4  ;;  %v7942_v21 = vrot.slane %v7940_v40, 4  ;;  %v7951_v44 = vrot.slane %v7949_v54, 5 }
 0x579   : > { %v7898_v60 = vor.u32 %v7897_v25, %v7894_v43  ;;  %v7955_v30 = vrot.slane %v7953_v33, 4  ;;  %v9611_v42 = vcombine.low %v7856_v51, %v7866_v2  ;;  %v7908_v57 = vor.u32 %v7907_v7, %v7903_v35  ;;  %v14988_v2 = vld [vmem:[#allocation36_spill] sm:$0xff] }
 0x57a   : > { %11069 = vmatpush3.bf16.msra.mxu1 %v11879_v52  ;;  %v7943_v52 = vshll.u32 %v7576_v26, 16  ;;  %v7922_v8 = vor.u32 %v7921_v17, %v7918_v31  ;;  %v7932_v39 = vor.u32 %v7931_v1, %v7927_v3  ;;  %v7913_v19 = vrot.slane %v7911_v48, 5  ;;  %v14995_v48 = vld [vmem:[#allocation42_spill] sm:$0xff] }
 0x57b   : > { %v7899_v4 = vrot.slane %v7898_v60, 4  ;;  %v7956_v32 = vor.u32 %v7955_v30, %v7951_v44  ;;  %v7959_v26 = vshll.u32 %v14473_v37, 16  ;;  %v7909_v43 = vrot.slane %v7908_v57, 4  ;;  %v14992_v60 = vld [vmem:[#allocation39_spill] sm:$0xff]  ;;  %v15004_v30 = vld [vmem:[#allocation48_spill] sm:$0xff] }
 0x57c   : > { %v7945_v16 = vrot.slane %v7943_v52, 5  ;;  %v7923_v23 = vrot.slane %v7922_v8, 4  ;;  %v7933_v31 = vrot.slane %v7932_v39, 4  ;;  %v14997_v8 = vld [vmem:[#allocation43_spill] sm:$0xff] }
 0x57d   : > { %11039 = vmatmul.mubr.bf16.gmra.mrb[36].mxu1 %v9609_v22  ;;  %v7890_v22 = vsel %vm13027_vm13, %v7885_v10, %v7889_v38  ;;  %v7904_v29 = vsel %vm13027_vm13, %v7899_v4, %v7903_v35  ;;  %v7914_v17 = vsel %vm13027_vm13, %v7909_v43, %v7913_v19  ;;  %v7957_v59 = vrot.slane %v7956_v32, 4  ;;  %v14989_v38 = vld [vmem:[#allocation37_spill] sm:$0xff]  ;;  %v15011_v57 = vld [vmem:[#allocation51_spill] sm:$0xff] }
 0x57e   : > { %11042 = vmatprep.mubr.bf16.mxu1 %v9610_v11  ;;  %v11926_v11 = vld [vmem:[#allocation2 + $0xc8] sm:$0x1]  ;;  %v9612_v20 = vcombine.low %v7880_v28, %v7890_v22  ;;  %v7946_v18 = vor.u32 %v7945_v16, %v7942_v21  ;;  %v7928_v25 = vsel %vm13027_vm13, %v7923_v23, %v7927_v3  ;;  %v7961_v36 = vrot.slane %v7959_v26, 5  ;;  %v14991_v28 = vld [vmem:[#allocation38_spill] sm:$0xff]  ;;  %v14998_v3 = vld [vmem:[#allocation44_spill] sm:$0xff] }
 0x57f   : > { %v7935_v0 = vshll.u32 %v11926_v11, 16  ;;  %v9613_v40 = vcombine.low %v7904_v29, %v7914_v17  ;;  %v14990_v35 = vcombine.low %v14988_v2, %v14989_v38  ;;  %v14993_v7 = vcombine.low %v14991_v28, %v14992_v60  ;;  %v15001_v21 = vld [vmem:[#allocation46_spill] sm:$0xff]  ;;  %v15007_v11 = vld [vmem:[#allocation49_spill] sm:$0xff]  ;;  %v9686_v43 = vld [vmem:[%s12015_s6 + $0x79] sm:$0xff] }
 0x580   : > { %v7947_v62 = vrot.slane %v7946_v18, 4  ;;  %v7962_v33 = vsel %vm13027_vm13, %v7957_v59, %v7961_v36  ;;  %v14996_v10 = vcombine.low %v14994_v55, %v14995_v48  ;;  %v14999_v1 = vcombine.low %v14997_v8, %v14998_v3  ;;  %v9684_v17 = vld [vmem:[%s12015_s6 + $0x61] sm:$0xff]  ;;  %v9690_v48 = vld [vmem:[%s12015_s6 + $0xa9] sm:$0xff]  ;;  %v9688_v3 = vld [vmem:[%s12015_s6 + $0x91] sm:$0xff] }
 0x581   : > { %v7937_v56 = vrot.slane %v7935_v0, 5  ;;  %v15002_v16 = vcombine.low %v15000_v5, %v15001_v21  ;;  %v15006_v22 = vcombine.low %v14138_v53, %v14142_v9  ;;  %v15008_v0 = vld [vmem:[#allocation50_spill] sm:$0xff]  ;;  %v15010_v4 = vcombine.low %v14159_v41, %v14168_v61  ;;  %v9687_v36 = vld [vmem:[%s12015_s6 + $0x81] sm:$0xff] }
 0x582   : > { %v7952_v54 = vsel %vm13027_vm13, %v7947_v62, %v7951_v44  ;;  %v15003_v44 = vld [vmem:[#allocation47_spill] sm:$0xff]  ;;  %v15012_v23 = vcombine.low %v14174_v27, %v15011_v57  ;;  %v15013_v53 = vcombine.low %v14197_v46, %v14202_v49  ;;  %v15014_v9 = vcombine.low %v14206_v14, %v14213_v45  ;;  %v14661_v27 = vld [vmem:[%s14778_s4] ss:$0 sm:$0xff] }
 0x583   : > { %v7938_v52 = vsel %vm13027_vm13, %v7933_v31, %v7937_v56  ;;  %v9615_v51 = vcombine.low %v7952_v54, %v7962_v33  ;;  %v15015_v41 = vcombine.low %v14222_v24, %v14226_v13  ;;  %v15016_v61 = vcombine.low %v14237_v50, %v14241_v63  ;;  %v9680_v49 = vld [vmem:[%s12015_s6 + $0x31] sm:$0xff]  ;;  %v9685_v54 = vld [vmem:[%s12015_s6 + $0x69] sm:$0xff] }
 0x584   : > { %v9614_v37 = vcombine.low %v7928_v25, %v7938_v52  ;;  %v9683_v24 = vld [vmem:[%s12015_s6 + $0x51] sm:$0xff] }
 0x585   : > { %11043 = vmatmul.mubr.bf16.gmra.mrb[40].mxu1 %v9611_v42  ;;  %v15005_v42 = vcombine.low %v15003_v44, %v15004_v30  ;;  %v9691_v21 = vld [vmem:[%s12015_s6 + $0xb1] sm:$0xff] }
 0x586   : > { %11046 = vmatprep.mubr.bf16.mxu1 %v9612_v20  ;;  %v15009_v20 = vcombine.low %v15007_v11, %v15008_v0 }
 0x58d   : > { %11047 = vmatmul.mubr.bf16.gmra.mrb[44].mxu1 %v9613_v40 }
 0x58e   : > { %11050 = vmatprep.mubr.bf16.mxu1 %v9614_v37 }
 0x595   : > { %11051 = vmatmul.mubr.bf16.gmra.mrb[48].mxu1 %v9615_v51 }
 0x596   : > { %11070 = vmatprep.mubr.bf16.mxu1 %v14990_v35 }
 0x59d   : > { %11071 = vmatmul.mubr.bf16.vlgmr.msra.gmra.mrb[20].mxu1 %v14993_v7 }
 0x59e   : > { %11074 = vmatprep.mubr.bf16.mxu1 %v14996_v10 }
 0x5a5   : > { %11075 = vmatmul.mubr.bf16.gmra.mrb[24].mxu1 %v14999_v1 }
 0x5a6   : > { %11078 = vmatprep.mubr.bf16.mxu1 %v15002_v16 }
 0x5ad   : > { %11079 = vmatmul.mubr.bf16.gmra.mrb[28].mxu1 %v15005_v42  ;;  %v9689_v42 = vld [vmem:[%s12015_s6 + $0x99] sm:$0xff] }
 0x5ae   : > { %11082 = vmatprep.mubr.bf16.mxu1 %v15006_v22 }
 0x5b5   : > { %11083 = vmatmul.mubr.bf16.gmra.mrb[32].mxu1 %v15009_v20 }
 0x5b6   : > { %11086 = vmatprep.mubr.bf16.mxu1 %v15010_v4 }
 0x5bd   : > { %11087 = vmatmul.mubr.bf16.gmra.mrb[36].mxu1 %v15012_v23 }
 0x5be   : > { %11090 = vmatprep.mubr.bf16.mxu1 %v9666_v15 }
 0x5c5   : > { %11091 = vmatmul.mubr.bf16.gmra.mrb[40].mxu1 %v15013_v53 }
 0x5c6   : > { %11094 = vmatprep.mubr.bf16.mxu1 %v15014_v9 }
 0x5cd   : > { %11095 = vmatmul.mubr.bf16.gmra.mrb[44].mxu1 %v15015_v41  ;;  %v9694_v41 = vld [vmem:[%s12015_s6 + $0xd9] sm:$0xff] }
 0x5ce   : > { %11098 = vmatprep.mubr.bf16.mxu1 %v15016_v61 }
 0x5d5   : > { %11099 = vmatmul.mubr.bf16.gmra.mrb[48].mxu1 %v9671_v58 }
 0x670   : > { %v11072_v6 = vpop.f32.mrb[20].mxu1 }
 0x671   : > { %v8825_v15 = vadd.f32 %v11072_v6, %v14661_v27  ;;  %v8624_v46 = vpop.f32.mrb[21].mxu1 }
 0x672   : > { %v8823_v14 = vadd.f32 %v14661_v27, %v8624_v46  ;;  %v11073_v45 = vpop.f32.mrb[22].mxu1 }
 0x673   : > { %v8857_v13 = vadd.f32 %v9682_v12, %v8825_v15  ;;  %v8826_v50 = vadd.f32 %v11073_v45, %v14661_v27  ;;  %v8627_v63 = vpop.f32.mrb[23].mxu1  ;;  %v9692_v12 = vld [vmem:[%s12015_s6 + $0xc1] sm:$0xff] }
 0x674   : > { %v8855_v47 = vadd.f32 %v9680_v49, %v8823_v14  ;;  %v8824_v58 = vadd.f32 %v14661_v27, %v8627_v63  ;;  %v9695_v49 = vld [vmem:[%s12015_s6 + $0xe1] sm:$0xff] }
 0x675   : > { %v8889_v39 = vmax.f32 %v8857_v13, 0.0  ;;  %v8858_v19 = vadd.f32 %v9683_v24, %v8826_v50  ;;  %v9693_v13 = vld [vmem:[%s12015_s6 + $0xc9] sm:$0xff] }
 0x676   : > { %v8887_v18 = vmax.f32 %v8855_v47, 0.0  ;;  %v8856_v32 = vadd.f32 %v9681_v34, %v8824_v58 }
 0x677   : > { %8921 = vst [vmem:[%s14674_s24 + $0x10] sm:$0xff] %v8889_v39  ;;  %v8890_v26 = vmax.f32 %v8858_v19, 0.0 }
 0x678   : > { %8919 = vst [vmem:[%s14674_s24] sm:$0xff] %v8887_v18  ;;  %v8888_v56 = vmax.f32 %v8856_v32, 0.0  ;;  %v11076_v29 = vpop.f32.mrb[24].mxu1 }
 0x679   : > { %8922 = vst [vmem:[%s14674_s24 + $0x18] sm:$0xff] %v8890_v26  ;;  %v8829_v25 = vadd.f32 %v11076_v29, %v14661_v27  ;;  %v8640_v31 = vpop.f32.mrb[25].mxu1  ;;  %v9698_v26 = vld [vmem:[%s12015_s6 + $0x109] sm:$0xff] }
 0x67a   : > { %8920 = vst [vmem:[%s14674_s24 + $0x8] sm:$0xff] %v8888_v56  ;;  %v8827_v62 = vadd.f32 %v14661_v27, %v8640_v31  ;;  %v11077_v59 = vpop.f32.mrb[26].mxu1 }
 0x67b   : > { %v8861_v40 = vadd.f32 %v9686_v43, %v8829_v25  ;;  %v8830_v52 = vadd.f32 %v11077_v59, %v14661_v27  ;;  %v8643_v37 = vpop.f32.mrb[27].mxu1  ;;  %v9696_v43 = vld [vmem:[%s12015_s6 + $0xf1] sm:$0xff] }
 0x67c   : > { %v8859_v33 = vadd.f32 %v9684_v17, %v8827_v62  ;;  %v8828_v51 = vadd.f32 %v14661_v27, %v8643_v37  ;;  %v9699_v17 = vld [vmem:[%s12015_s6 + $0x111] sm:$0xff] }
 0x67d   : > { %v8893_v2 = vmax.f32 %v8861_v40, 0.0  ;;  %v8862_v38 = vadd.f32 %v9687_v36, %v8830_v52  ;;  %v9697_v40 = vld [vmem:[%s12015_s6 + $0xf9] sm:$0xff] }
 0x67e   : > { %v8891_v35 = vmax.f32 %v8859_v33, 0.0  ;;  %v8860_v28 = vadd.f32 %v9685_v54, %v8828_v51 }
 0x67f   : > { %8925 = vst [vmem:[%s14674_s24 + $0x30] sm:$0xff] %v8893_v2  ;;  %v8894_v60 = vmax.f32 %v8862_v38, 0.0 }
 0x680   : > { %8923 = vst [vmem:[%s14674_s24 + $0x20] sm:$0xff] %v8891_v35  ;;  %v8892_v7 = vmax.f32 %v8860_v28, 0.0  ;;  %v11080_v55 = vpop.f32.mrb[28].mxu1 }
 0x681   : > { %8926 = vst [vmem:[%s14674_s24 + $0x38] sm:$0xff] %v8894_v60  ;;  %v8833_v10 = vadd.f32 %v11080_v55, %v14661_v27  ;;  %v8656_v8 = vpop.f32.mrb[29].mxu1  ;;  %v9702_v60 = vld [vmem:[%s12015_s6 + $0x139] sm:$0xff] }
 0x682   : > { %8924 = vst [vmem:[%s14674_s24 + $0x28] sm:$0xff] %v8892_v7  ;;  %v8831_v1 = vadd.f32 %v14661_v27, %v8656_v8  ;;  %v11081_v5 = vpop.f32.mrb[30].mxu1 }
 0x683   : > { %v8865_v16 = vadd.f32 %v9690_v48, %v8833_v10  ;;  %v8834_v44 = vadd.f32 %v11081_v5, %v14661_v27  ;;  %v8659_v30 = vpop.f32.mrb[31].mxu1  ;;  %v9700_v48 = vld [vmem:[%s12015_s6 + $0x121] sm:$0xff] }
 0x684   : > { %v8863_v22 = vadd.f32 %v9688_v3, %v8831_v1  ;;  %v8832_v11 = vadd.f32 %v14661_v27, %v8659_v30  ;;  %v9703_v3 = vld [vmem:[%s12015_s6 + $0x141] sm:$0xff] }
 0x685   : > { %v8897_v0 = vmax.f32 %v8865_v16, 0.0  ;;  %v8866_v20 = vadd.f32 %v9691_v21, %v8834_v44  ;;  %v9701_v16 = vld [vmem:[%s12015_s6 + $0x129] sm:$0xff] }
 0x686   : > { %v8895_v4 = vmax.f32 %v8863_v22, 0.0  ;;  %v8864_v57 = vadd.f32 %v9689_v42, %v8832_v11 }
 0x687   : > { %8929 = vst [vmem:[%s14674_s24 + $0x50] sm:$0xff] %v8897_v0  ;;  %v8898_v23 = vmax.f32 %v8866_v20, 0.0 }
 0x688   : > { %8927 = vst [vmem:[%s14674_s24 + $0x40] sm:$0xff] %v8895_v4  ;;  %v8896_v53 = vmax.f32 %v8864_v57, 0.0  ;;  %v11084_v9 = vpop.f32.mrb[32].mxu1 }
 0x689   : > { %8930 = vst [vmem:[%s14674_s24 + $0x58] sm:$0xff] %v8898_v23  ;;  %v8837_v61 = vadd.f32 %v11084_v9, %v14661_v27  ;;  %v8672_v6 = vpop.f32.mrb[33].mxu1  ;;  %v9706_v23 = vld [vmem:[%s12015_s6 + $0x169] sm:$0xff] }
 0x68a   : > { %8928 = vst [vmem:[%s14674_s24 + $0x48] sm:$0xff] %v8896_v53  ;;  %v8835_v15 = vadd.f32 %v14661_v27, %v8672_v6  ;;  %v11085_v46 = vpop.f32.mrb[34].mxu1 }
 0x68b   : > { %v8869_v14 = vadd.f32 %v9694_v41, %v8837_v61  ;;  %v8838_v45 = vadd.f32 %v11085_v46, %v14661_v27  ;;  %v8675_v24 = vpop.f32.mrb[35].mxu1  ;;  %v9704_v41 = vld [vmem:[%s12015_s6 + $0x151] sm:$0xff] }
 0x68c   : > { %v8867_v50 = vadd.f32 %v9692_v12, %v8835_v15  ;;  %v8836_v63 = vadd.f32 %v14661_v27, %v8675_v24  ;;  %v9707_v12 = vld [vmem:[%s12015_s6 + $0x171] sm:$0xff] }
 0x68d   : > { %v8901_v34 = vmax.f32 %v8869_v14, 0.0  ;;  %v8870_v47 = vadd.f32 %v9695_v49, %v8838_v45  ;;  %v9705_v14 = vld [vmem:[%s12015_s6 + $0x159] sm:$0xff] }
 0x68e   : > { %v8899_v58 = vmax.f32 %v8867_v50, 0.0  ;;  %v8868_v39 = vadd.f32 %v9693_v13, %v8836_v63 }
 0x68f   : > { %8933 = vst [vmem:[%s14674_s24 + $0x70] sm:$0xff] %v8901_v34  ;;  %v8902_v19 = vmax.f32 %v8870_v47, 0.0 }
 0x690   : > { %8931 = vst [vmem:[%s14674_s24 + $0x60] sm:$0xff] %v8899_v58  ;;  %v8900_v18 = vmax.f32 %v8868_v39, 0.0  ;;  %v11088_v32 = vpop.f32.mrb[36].mxu1 }
 0x691   : > { %8934 = vst [vmem:[%s14674_s24 + $0x78] sm:$0xff] %v8902_v19  ;;  %v8841_v56 = vadd.f32 %v11088_v32, %v14661_v27  ;;  %v8688_v29 = vpop.f32.mrb[37].mxu1  ;;  %v9710_v19 = vld [vmem:[%s12015_s6 + $0x199] sm:$0xff] }
 0x692   : > { %8932 = vst [vmem:[%s14674_s24 + $0x68] sm:$0xff] %v8900_v18  ;;  %v8839_v25 = vadd.f32 %v14661_v27, %v8688_v29  ;;  %v11089_v31 = vpop.f32.mrb[38].mxu1 }
 0x693   : > { %v8873_v62 = vadd.f32 %v9698_v26, %v8841_v56  ;;  %v8842_v59 = vadd.f32 %v11089_v31, %v14661_v27  ;;  %v8691_v36 = vpop.f32.mrb[39].mxu1  ;;  %v9708_v26 = vld [vmem:[%s12015_s6 + $0x181] sm:$0xff] }
 0x694   : > { %v8871_v52 = vadd.f32 %v9696_v43, %v8839_v25  ;;  %v8840_v37 = vadd.f32 %v14661_v27, %v8691_v36  ;;  %v9711_v43 = vld [vmem:[%s12015_s6 + $0x1a1] sm:$0xff] }
 0x695   : > { %v8905_v54 = vmax.f32 %v8873_v62, 0.0  ;;  %v8874_v33 = vadd.f32 %v9699_v17, %v8842_v59  ;;  %v9709_v62 = vld [vmem:[%s12015_s6 + $0x189] sm:$0xff] }
 0x696   : > { %v8903_v51 = vmax.f32 %v8871_v52, 0.0  ;;  %v8872_v2 = vadd.f32 %v9697_v40, %v8840_v37 }
 0x697   : > { %8937 = vst [vmem:[%s14674_s24 + $0x90] sm:$0xff] %v8905_v54  ;;  %v8906_v38 = vmax.f32 %v8874_v33, 0.0 }
 0x698   : > { %8935 = vst [vmem:[%s14674_s24 + $0x80] sm:$0xff] %v8903_v51  ;;  %v8904_v35 = vmax.f32 %v8872_v2, 0.0  ;;  %v11092_v28 = vpop.f32.mrb[40].mxu1 }
 0x699   : > { %8938 = vst [vmem:[%s14674_s24 + $0x98] sm:$0xff] %v8906_v38  ;;  %v8845_v7 = vadd.f32 %v11092_v28, %v14661_v27  ;;  %v8704_v55 = vpop.f32.mrb[41].mxu1 }
 0x69a   : > { %8936 = vst [vmem:[%s14674_s24 + $0x88] sm:$0xff] %v8904_v35  ;;  %v8843_v10 = vadd.f32 %v14661_v27, %v8704_v55  ;;  %v11093_v8 = vpop.f32.mrb[42].mxu1 }
 0x69b   : > { %v8877_v1 = vadd.f32 %v9702_v60, %v8845_v7  ;;  %v8846_v5 = vadd.f32 %v11093_v8, %v14661_v27  ;;  %v8707_v21 = vpop.f32.mrb[43].mxu1 }
 0x69c   : > { %v8875_v44 = vadd.f32 %v9700_v48, %v8843_v10  ;;  %v8844_v30 = vadd.f32 %v14661_v27, %v8707_v21 }
 0x69d   : > { %v8909_v42 = vmax.f32 %v8877_v1, 0.0  ;;  %v8878_v22 = vadd.f32 %v9703_v3, %v8846_v5 }
 0x69e   : > { %v8907_v11 = vmax.f32 %v8875_v44, 0.0  ;;  %v8876_v0 = vadd.f32 %v9701_v16, %v8844_v30 }
 0x69f   : > { %8941 = vst [vmem:[%s14674_s24 + $0xb0] sm:$0xff] %v8909_v42  ;;  %v8910_v20 = vmax.f32 %v8878_v22, 0.0 }
 0x6a0   : > { %8939 = vst [vmem:[%s14674_s24 + $0xa0] sm:$0xff] %v8907_v11  ;;  %v8908_v4 = vmax.f32 %v8876_v0, 0.0  ;;  %v11096_v57 = vpop.f32.mrb[44].mxu1 }
 0x6a1   : > { %8942 = vst [vmem:[%s14674_s24 + $0xb8] sm:$0xff] %v8910_v20  ;;  %v8849_v53 = vadd.f32 %v11096_v57, %v14661_v27  ;;  %v8720_v9 = vpop.f32.mrb[45].mxu1 }
 0x6a2   : > { %8940 = vst [vmem:[%s14674_s24 + $0xa8] sm:$0xff] %v8908_v4  ;;  %v8847_v61 = vadd.f32 %v14661_v27, %v8720_v9  ;;  %v11097_v6 = vpop.f32.mrb[46].mxu1 }
 0x6a3   : > { %v8881_v15 = vadd.f32 %v9706_v23, %v8849_v53  ;;  %v8850_v46 = vadd.f32 %v11097_v6, %v14661_v27  ;;  %v8723_v49 = vpop.f32.mrb[47].mxu1 }
 0x6a4   : > { %v8879_v45 = vadd.f32 %v9704_v41, %v8847_v61  ;;  %v8848_v24 = vadd.f32 %v14661_v27, %v8723_v49 }
 0x6a5   : > { %v8913_v13 = vmax.f32 %v8881_v15, 0.0  ;;  %v8882_v50 = vadd.f32 %v9707_v12, %v8850_v46 }
 0x6a6   : > { %v8911_v63 = vmax.f32 %v8879_v45, 0.0  ;;  %v8880_v34 = vadd.f32 %v9705_v14, %v8848_v24 }
 0x6a7   : > { %8945 = vst [vmem:[%s14674_s24 + $0xd0] sm:$0xff] %v8913_v13  ;;  %v8914_v47 = vmax.f32 %v8882_v50, 0.0 }
 0x6a8   : > { %8943 = vst [vmem:[%s14674_s24 + $0xc0] sm:$0xff] %v8911_v63  ;;  %v8912_v58 = vmax.f32 %v8880_v34, 0.0  ;;  %v11100_v39 = vpop.f32.mrb[48].mxu1 }
 0x6a9   : > { %8946 = vst [vmem:[%s14674_s24 + $0xd8] sm:$0xff] %v8914_v47  ;;  %v8853_v18 = vadd.f32 %v11100_v39, %v14661_v27  ;;  %v8736_v32 = vpop.f32.mrb[49].mxu1 }
 0x6aa   : > { %8944 = vst [vmem:[%s14674_s24 + $0xc8] sm:$0xff] %v8912_v58  ;;  %v8851_v56 = vadd.f32 %v14661_v27, %v8736_v32  ;;  %v11101_v29 = vpop.f32.mrb[50].mxu1 }
 0x6ab   : > { %v8885_v25 = vadd.f32 %v9710_v19, %v8853_v18  ;;  %v8854_v31 = vadd.f32 %v11101_v29, %v14661_v27  ;;  %v8739_v17 = vpop.f32.mrb[51].mxu1 }
 0x6ac   : > { %v8883_v59 = vadd.f32 %v9708_v26, %v8851_v56  ;;  %v8852_v36 = vadd.f32 %v14661_v27, %v8739_v17 }
 0x6ad   : > { %v8917_v40 = vmax.f32 %v8885_v25, 0.0  ;;  %v8886_v52 = vadd.f32 %v9711_v43, %v8854_v31 }
 0x6ae   : > { %v8915_v37 = vmax.f32 %v8883_v59, 0.0  ;;  %v8884_v54 = vadd.f32 %v9709_v62, %v8852_v36 }
 0x6af   : > { %8949 = vst [vmem:[%s14674_s24 + $0xf0] sm:$0xff] %v8917_v40  ;;  %v8918_v33 = vmax.f32 %v8886_v52, 0.0 }
 0x6b0   : > { %8947 = vst [vmem:[%s14674_s24 + $0xe0] sm:$0xff] %v8915_v37  ;;  %v8916_v51 = vmax.f32 %v8884_v54, 0.0 }
 0x6b1   : > { %8950 = vst [vmem:[%s14674_s24 + $0xf8] sm:$0xff] %v8918_v33 }
 0x6b2   : > { %8948 = vst [vmem:[%s14674_s24 + $0xe8] sm:$0xff] %v8916_v51 }
 0x6b3 PF: > { %s15_s20 = sadd.s32 1, %s11949_s20   ;;  %s15017_s18 = smov %s11945_s19 }
 0x6b4   : > { %p12_p5 = scmp.ge.s32.totalorder %s15_s20, 4   ;;  %s15018_s19 = smov %s15020_s21 }
 0x6b6   :  { %14 = sbr.rel (!%p12_p5) target bundleno = 2 (0x2), region = 94 }

</bundles_post_ra>
